<compile_context>
chip_gen: v7x
topology: tpu7x:2x2x1
jax: 0.10.0
libtpu: 0.0.40
codegen_flags: <defaults>
</compile_context>

<pallas_src>
import functools

import jax
import jax.numpy as jnp
from jax.experimental import pallas as pl
from jax.experimental.pallas import tpu as pltpu

H = 56              # height (o / n axis)
W = 56              # width  (p axis)
WP = 64             # padded width so (height, width) sites flatten to 64-aligned columns
CIN = 64            # input channels
CMID = 32           # mid channels = CIN // 2
COUT = 64           # output channels
KP = 3 * CIN        # 192: three width taps x CIN stacked on the contraction axis

OUT_COLS = H * WP   # 3584 output sites = columns of the transposed output


def _pick_nblk():
    # v7x has two TensorCores per chip: 4 column blocks -> 2 steps per core so the
    # output writeback overlaps compute.  Single-TC chips keep a coarse 2-block grid
    # (extra steps are pure ~0.35us overhead there).
    try:
        kind = jax.devices()[0].device_kind.lower()
    except Exception:
        return 2
    return 4 if ("v7" in kind or "tpu7" in kind) else 2


NBLK = _pick_nblk()
BLK = OUT_COLS // NBLK        # output columns per grid step (1792 or 896), multiple of 128
MEXT = BLK + 2 * WP           # columns of the fused matmul result needed per step
EXTRA = 2 * WP + 2            # overlap columns read from the next input block (130)
IN_COLS = OUT_COLS + BLK      # packed-input columns, so block index g+1 is always valid
IN_H = IN_COLS // WP          # padded-height rows backing IN_COLS


def _conv_kernel(xc_ref, xn_ref, w_ref, y_ref):
    """One output column block of the transposed fused conv.

    xc_ref: (CIN, BLK)  bf16, current column block of the packed input
    xn_ref: (CIN, BLK)  bf16, next column block (only its first EXTRA columns are used)
    w_ref : (KP, KP)    bf16, fused weights w[k*COUT+i, j*CIN+c] = w2[c,j]*w1[i,c//2,k,j]
    y_ref : (COUT, BLK) f32,  output block y[i, m] for global column base+m
    """
    # Window of packed-input columns [base, base + BLK + EXTRA).
    xw = jnp.concatenate([xc_ref[...], xn_ref[:, :EXTRA]], axis=1)            # (CIN, BLK+130)
    # Rebuild the three width taps (j = 0,1,2) along the contraction axis (sublanes).
    xbig = jnp.concatenate([xw[:, j:j + MEXT] for j in range(3)], axis=0)     # (KP, MEXT)
    # Single MXU matmul: all three height taps (k) stacked along the result's M axis.
    z = jnp.dot(w_ref[...], xbig, preferred_element_type=jnp.float32)         # (KP, MEXT)
    # y[i, m] = sum_k z[k*COUT + i, m + k*WP]   (static, aligned sublane slabs;
    # the k=1 lane offset of 64 is a cheap XLU lane rotate).
    y_ref[...] = (z[0:COUT, 0:BLK]
                  + z[COUT:2 * COUT, WP:WP + BLK]
                  + z[2 * COUT:3 * COUT, 2 * WP:2 * WP + BLK])


@functools.partial(jax.jit, static_argnames=("shift",))
def kernel_generated_0_forward(x, w1, w2, shift=1):
    """x: (1, 64, 56, 56), w1: (64, 32, 3, 3, 1), w2: (64, 3, 1) -> (1, 64, 56, 56)."""
    # ---- fused two-stage weights (tiny; f32 on host, cast to bf16) ----
    w1g = w1[..., 0][:, jnp.arange(CIN) // 2, :, :]                 # (COUT, CIN, 3, 3)
    wc = jnp.einsum('cj,ickj->kjci', w2[:, :, 0], w1g)              # (3, 3, CIN, COUT)
    wbt = jnp.transpose(wc, (0, 3, 1, 2)).reshape(KP, KP).astype(jnp.bfloat16)

    # ---- packed input: stays channel-major (no transpose); the height roll is a
    #      static slice-concat; one pad supplies both conv pads + block slack; bf16.
    #      Column hh*WP + pw of row c holds the rolled, zero-padded x[c, hh-1, pw-1].
    xb = x[0].astype(jnp.bfloat16)                                   # (CIN, H, W)
    s = shift % H
    if s:
        xb = jnp.concatenate([xb[:, H - s:, :], xb[:, :H - s, :]], axis=1)
    xp = jnp.pad(xb, ((0, 0), (1, IN_H - H - 1), (1, WP - W - 1)))   # (CIN, IN_H, WP)
    xT = xp.reshape(CIN, IN_COLS)                                    # (64, IN_COLS)

    y_flat = pl.pallas_call(
        _conv_kernel,
        out_shape=jax.ShapeDtypeStruct((COUT, OUT_COLS), jnp.float32),
        grid_spec=pltpu.PrefetchScalarGridSpec(
            num_scalar_prefetch=0,
            grid=(NBLK,),
            in_specs=[
                pl.BlockSpec((CIN, BLK), lambda g: (0, g)),        # current columns
                pl.BlockSpec((CIN, BLK), lambda g: (0, g + 1)),    # overlap columns
                pl.BlockSpec((KP, KP), lambda g: (0, 0)),          # fused weights
            ],
            out_specs=pl.BlockSpec((COUT, BLK), lambda g: (0, g)),
        ),
        compiler_params=pltpu.CompilerParams(
            dimension_semantics=("parallel",),
        ),
    )(xT, xT, wbt)

    # ---- epilogue: drop the width padding; the kernel output is already NCHW-ordered
    #      (COUT, H, WP), so no transpose is needed.
    y = y_flat.reshape(COUT, H, WP)[:, :, :W][None].astype(x.dtype)
    return y


def ref_forward(x, w1, w2, shift):
    """Literal JAX translation of the torch forward (for verification)."""
    t3 = x.reshape(1, 3584, 56, 1)
    t3p = jnp.pad(t3, ((0, 0), (0, 0), (1, 1), (0, 0)))
    patches = jnp.stack([t3p[:, :, j:j + 56, 0] for j in range(3)], axis=2)   # (1,3584,3,56)
    t3r = patches.reshape(1, 3584 * 3, 56).reshape(1, 64, 56, 3, 56)
    t4 = jnp.einsum('lknjm,kji->lknjmi', t3r, w2)
    t5 = t4.reshape(1, 32, 2, 56, 3, 56, 1).sum(axis=2)
    t6 = jnp.roll(t5, shift, axis=2).reshape(1, 32, 56, 168)
    t6p = jnp.pad(t6, ((0, 0), (0, 0), (1, 1), (0, 0)))
    patches2 = jnp.stack([t6p[:, :, k:k + 56, :] for k in range(3)], axis=2)  # (1,32,3,56,168)
    t6r = patches2.reshape(1, 96, 56 * 168).reshape(1, 32, 3, 56, 3, 56, 1)
    return jnp.einsum('nlkojpm,ilkjm->niop', t6r, w1,
                      precision=jax.lax.Precision.HIGHEST)


if __name__ == "__main__":
    key = jax.random.PRNGKey(0)
    kx, k1, k2 = jax.random.split(key, 3)
    # Shapes are fixed by the module's hard-coded reshapes.
    x = jax.random.normal(kx, (1, CIN, H, W), jnp.float32)
    w1 = jax.random.normal(k1, (COUT, CMID, 3, 3, 1), jnp.float32)   # weights[0]
    w2 = jax.random.normal(k2, (CIN, 3, 1), jnp.float32)             # weights[1]

    ok = True
    for shift in (1, -1):   # the module draws shift_direction from {+1, -1}
        y = jax.block_until_ready(kernel_generated_0_forward(x, w1, w2, shift=shift))
        assert y.shape == (1, COUT, H, W), y.shape
        y_ref = ref_forward(x, w1, w2, shift)
        err = float(jnp.max(jnp.abs(y - y_ref)))
        scale = float(jnp.max(jnp.abs(y_ref))) + 1e-6
        if not err / scale < 2e-2:
            ok = False
            print(f"MISMATCH shift={shift}: max_abs_err={err} rel={err / scale}")
    if ok:
        print("KERNEL_OK")
    else:
        raise SystemExit(1)
</pallas_src>

<mosaic_0001>
module attributes {stable_mosaic.version = 11 : i64} {
  func.func @_conv_kernel(%arg0: i32, %arg1: memref<64x1792xbf16, #tpu.memory_space<vmem>>, %arg2: memref<64x1792xbf16, #tpu.memory_space<vmem>>, %arg3: memref<192x192xbf16, #tpu.memory_space<vmem>>, %arg4: memref<64x1792xf32, #tpu.memory_space<vmem>>) attributes {dimension_semantics = [#tpu.dimension_semantics<parallel>], iteration_bounds = array<i64: 2>, scalar_prefetch = 0 : i64, scratch_operands = 0 : i64, tpu.core_type = #tpu.core_type<tc>, window_params = [{transform_indices = @transform_0, window_bounds = array<i64: 64, 1792>}, {transform_indices = @transform_1, window_bounds = array<i64: 64, 1792>}, {pipeline_mode = #tpu.pipeline_mode<synchronous>, transform_indices = @transform_2, window_bounds = array<i64: 192, 192>}, {transform_indices = @transform_3, window_bounds = array<i64: 64, 1792>}]} {
    %c0 = arith.constant 0 : index
    %c0_0 = arith.constant 0 : index
    %0 = vector.load %arg1[%c0, %c0_0] : memref<64x1792xbf16, #tpu.memory_space<vmem>>, vector<64x1792xbf16>
    %c0_1 = arith.constant 0 : index
    %c0_2 = arith.constant 0 : index
    %1 = vector.load %arg2[%c0_1, %c0_2] : memref<64x1792xbf16, #tpu.memory_space<vmem>>, vector<64x130xbf16>
    %2 = tpu.concatenate %0, %1 in 1 : vector<64x1792xbf16>, vector<64x130xbf16> -> vector<64x1922xbf16>
    %3 = vector.extract_strided_slice %2 {offsets = [0, 0], sizes = [64, 1920], strides = [1, 1]} : vector<64x1922xbf16> to vector<64x1920xbf16>
    %4 = vector.extract_strided_slice %2 {offsets = [0, 1], sizes = [64, 1920], strides = [1, 1]} : vector<64x1922xbf16> to vector<64x1920xbf16>
    %5 = vector.extract_strided_slice %2 {offsets = [0, 2], sizes = [64, 1920], strides = [1, 1]} : vector<64x1922xbf16> to vector<64x1920xbf16>
    %6 = tpu.concatenate %3, %4, %5 in 0 : vector<64x1920xbf16>, vector<64x1920xbf16>, vector<64x1920xbf16> -> vector<192x1920xbf16>
    %c0_3 = arith.constant 0 : index
    %c0_4 = arith.constant 0 : index
    %7 = vector.load %arg3[%c0_3, %c0_4] : memref<192x192xbf16, #tpu.memory_space<vmem>>, vector<192x192xbf16>
    %cst = arith.constant dense<0.000000e+00> : vector<192x1920xf32>
    %8 = tpu.matmul %7, %6, %cst {dimension_numbers = #tpu.dot_dimension_numbers<[1], [0], [0], [1], [0, 0, 1, 1], [], []>} : vector<192x192xbf16>, vector<192x1920xbf16>, vector<192x1920xf32> -> vector<192x1920xf32>
    %9 = vector.extract_strided_slice %8 {offsets = [0, 0], sizes = [64, 1792], strides = [1, 1]} : vector<192x1920xf32> to vector<64x1792xf32>
    %10 = vector.extract_strided_slice %8 {offsets = [64, 64], sizes = [64, 1792], strides = [1, 1]} : vector<192x1920xf32> to vector<64x1792xf32>
    %11 = arith.addf %9, %10 : vector<64x1792xf32>
    %12 = vector.extract_strided_slice %8 {offsets = [128, 128], sizes = [64, 1792], strides = [1, 1]} : vector<192x1920xf32> to vector<64x1792xf32>
    %13 = arith.addf %11, %12 : vector<64x1792xf32>
    %c0_5 = arith.constant 0 : index
    %c0_6 = arith.constant 0 : index
    %14 = vector.load %arg4[%c0_5, %c0_6] : memref<64x1792xf32, #tpu.memory_space<vmem>>, vector<64x1792xf32>
    tpu.vector_store %arg4[%c0_5, %c0_6], %13 {strides = array<i32>} : memref<64x1792xf32, #tpu.memory_space<vmem>>, vector<64x1792xf32>,
    return
  }
  func.func @transform_0(%arg0: i32) -> (i32, i32) {
    %c0_i32 = arith.constant 0 : i32
    %c0_i32_0 = arith.constant 0 : i32
    return %c0_i32, %arg0 : i32, i32
  }
  func.func @transform_1(%arg0: i32) -> (i32, i32) {
    %c1_i32 = arith.constant 1 : i32
    %0 = arith.addi %arg0, %c1_i32 : i32
    %c0_i32 = arith.constant 0 : i32
    %c0_i32_0 = arith.constant 0 : i32
    return %c0_i32, %0 : i32, i32
  }
  func.func @transform_2(%arg0: i32) -> (i32, i32) {
    %c0_i32 = arith.constant 0 : i32
    %c0_i32_0 = arith.constant 0 : i32
    %c0_i32_1 = arith.constant 0 : i32
    return %c0_i32, %c0_i32_0 : i32, i32
  }
  func.func @transform_3(%arg0: i32) -> (i32, i32) {
    %c0_i32 = arith.constant 0 : i32
    %c0_i32_0 = arith.constant 0 : i32
    return %c0_i32, %arg0 : i32, i32
  }
}

</mosaic_0001>

<bundles_post_ra>
// kernel: kernel_generated_0_forward.1
= control target key start
LH: loop header
LB: loop body
LE: loop exit
PB: predicated region body
PF: predicated region fallthrough
CT: control target
= control target key end

     0   :  { %s4448_s12 = smov 0   ;;  %s4450_s13 = smov 0   ;;  %s7434_s0 = inlined_call_operand.vmem [shape: bf16[64,5376], index: 0, kind: input, shape index: {}, may-alias: {0,1}]   ;;  %s7435_s1 = inlined_call_operand.vmem [shape: bf16[64,5376], index: 1, kind: input, shape index: {}, may-alias: {0,1}]   ;;  %s7436_s2 = inlined_call_operand.vmem [shape: bf16[192,192], index: 2, kind: input, shape index: {}]   ;;  %s7437_s3 = inlined_call_operand.vmem [shape: f32[64,3584], index: 3, kind: output, shape index: {}]  }
   0x1   :  { %s4452_s14 = smov 0   ;;  %s4454_s15 = smov 0  }
   0x2   :  { %s4456_s16 = smov 0  }
   0x3 LB: > { %s3928_s17 = sadd.s32 4294967295, %s4422_s16   ;;  %s4475_s18 = sadd.s32 1, %s4422_s16   ;;  %s4422_s16 = sphi %s4456_s16, %s7667_s16   ;;  %s4418_s15 = sphi %s4454_s15, %s7666_s15   ;;  %s4414_s14 = sphi %s4452_s14, %s7665_s14   ;;  %s4410_s13 = sphi %s4450_s13, %s7664_s13   ;;  %s4406_s12 = sphi %s4448_s12, %s7663_s12  }
   0x4   : > { %s17_s19 = ssub.s32 %s4422_s16, %s4475_s18  ;;  %s20_s20 = sadd.s32 1, %s4418_s15 }
   0x5   : > { %p18_p0 = scmp.eq.s32.totalorder %s17_s19, 0  ;;  %p27_p1 = scmp.ne.s32.totalorder %s4418_s15, %s4414_s14 }
   0x6   : > { %p28_p2 = scmp.eq.s32.totalorder %s4422_s16, 0  ;;  %s44_s21 = sadd.s32 1, %s4475_s18 }
   0x7   : > { %s4485_s22 = scalar_select %p18_p0, %s4418_s15, %s20_s20  }
   0x8   : > { %p29_p3 = por %p28_p2, %p27_p1  ;;  %s45_s23 = ssub.s32 %s4475_s18, %s44_s21 }
   0x9   : > { %p46_p4 = scmp.eq.s32.totalorder %s45_s23, 0  ;;  %s48_s24 = sadd.s32 1, %s4410_s13 }
   0xa   : > { %p55_p5 = scmp.ne.s32.totalorder %s4410_s13, %s4406_s12  ;;  %p106_p6 = scmp.eq.s32.totalorder %s3928_s17, 1 }
   0xb   : > { %s4494_s25 = scalar_select %p46_p4, %s4410_s13, %s48_s24  }
   0xc   : > { %p4496_p7 = por %p55_p5, %p28_p2  ;;  %p4500_p8 = por %p106_p6, %p27_p1 }
   0xd   : > { %p3931_p9 = scmp.ge.s32.totalorder %s4422_s16, 2 }
   0xf   : > { %131 = sbr.rel (%p3931_p9) target bundleno = 88 (0x58), region = 20 }
  0x16   : > { %134 = sbr.rel (!%p29_p3) target bundleno = 55 (0x37), region = 24  ;;  %s136_s28 = sand.u32 (%p29_p3), 1, %s4418_s15  }
  0x17   : > { %s4177_s29 = smul.u32 (%p29_p3), 56, %s4422_s16 }
  0x18   : > { %s4179_s30 = smul.u32 (%p29_p3), 448, %s136_s28 }
  0x19   : > { %s4510_s6 = scalar_lea.vmem (%p29_p3), %s7434_s0, %s4177_s29 }
  0x1a   : > { %v154_v0 = vld [vmem:[%s4510_s6] sm:$0xff] (%p29_p3)  ;;  %v156_v1 = vld [vmem:[%s4510_s6 + $0x8] sm:$0xff] (%p29_p3)  ;;  %v158_v2 = vld [vmem:[%s4510_s6 + $0x10] sm:$0xff] (%p29_p3)  ;;  %s4515_s7 = scalar_lea.vmem (%p29_p3), [#allocation2], %s4179_s30 }
  0x1b   : > { %155 = vst [vmem:[%s4515_s7] sm:$0xff] (%p29_p3), %v154_v0  ;;  %157 = vst [vmem:[%s4515_s7 + $0x8] sm:$0xff] (%p29_p3), %v156_v1  ;;  %v160_v3 = vld [vmem:[%s4510_s6 + $0x18] sm:$0xff] (%p29_p3)  ;;  %v162_v4 = vld [vmem:[%s4510_s6 + $0x20] sm:$0xff] (%p29_p3) }
  0x1c   : > { %159 = vst [vmem:[%s4515_s7 + $0x10] sm:$0xff] (%p29_p3), %v158_v2  ;;  %v164_v5 = vld [vmem:[%s4510_s6 + $0x28] sm:$0xff] (%p29_p3)  ;;  %161 = vst [vmem:[%s4515_s7 + $0x18] sm:$0xff] (%p29_p3), %v160_v3  ;;  %v166_v6 = vld [vmem:[%s4510_s6 + $0x30] sm:$0xff] (%p29_p3) }
  0x1d   : > { %163 = vst [vmem:[%s4515_s7 + $0x20] sm:$0xff] %v162_v4  ;;  %165 = vst [vmem:[%s4515_s7 + $0x28] sm:$0xff] %v164_v5  ;;  %v168_v7 = vld [vmem:[%s4510_s6 + $0xa8] sm:$0xff]  ;;  %v170_v8 = vld [vmem:[%s4510_s6 + $0xb0] sm:$0xff] }
  0x1e   : > { %167 = vst [vmem:[%s4515_s7 + $0x30] sm:$0xff] %v166_v6  ;;  %169 = vst [vmem:[%s4515_s7 + $0x38] sm:$0xff] %v168_v7  ;;  %v172_v9 = vld [vmem:[%s4510_s6 + $0xb8] sm:$0xff]  ;;  %v174_v10 = vld [vmem:[%s4510_s6 + $0xc0] sm:$0xff] }
  0x1f   : > { %171 = vst [vmem:[%s4515_s7 + $0x40] sm:$0xff] %v170_v8  ;;  %v176_v11 = vld [vmem:[%s4510_s6 + $0xc8] sm:$0xff]  ;;  %173 = vst [vmem:[%s4515_s7 + $0x48] sm:$0xff] %v172_v9  ;;  %v178_v12 = vld [vmem:[%s4510_s6 + $0xd0] sm:$0xff] }
  0x20   : > { %175 = vst [vmem:[%s4515_s7 + $0x50] sm:$0xff] %v174_v10  ;;  %177 = vst [vmem:[%s4515_s7 + $0x58] sm:$0xff] %v176_v11  ;;  %v180_v13 = vld [vmem:[%s4510_s6 + $0xd8] sm:$0xff]  ;;  %v182_v14 = vld [vmem:[%s4510_s6 + $0x150] sm:$0xff] }
  0x21   : > { %179 = vst [vmem:[%s4515_s7 + $0x60] sm:$0xff] %v178_v12  ;;  %181 = vst [vmem:[%s4515_s7 + $0x68] sm:$0xff] %v180_v13  ;;  %v184_v15 = vld [vmem:[%s4510_s6 + $0x158] sm:$0xff]  ;;  %v186_v16 = vld [vmem:[%s4510_s6 + $0x160] sm:$0xff] }
  0x22   : > { %183 = vst [vmem:[%s4515_s7 + $0x70] sm:$0xff] %v182_v14  ;;  %v188_v17 = vld [vmem:[%s4510_s6 + $0x168] sm:$0xff]  ;;  %185 = vst [vmem:[%s4515_s7 + $0x78] sm:$0xff] %v184_v15  ;;  %v190_v18 = vld [vmem:[%s4510_s6 + $0x170] sm:$0xff] }
  0x23   : > { %187 = vst [vmem:[%s4515_s7 + $0x80] sm:$0xff] %v186_v16  ;;  %189 = vst [vmem:[%s4515_s7 + $0x88] sm:$0xff] %v188_v17  ;;  %v192_v19 = vld [vmem:[%s4510_s6 + $0x178] sm:$0xff]  ;;  %v194_v20 = vld [vmem:[%s4510_s6 + $0x180] sm:$0xff] }
  0x24   : > { %191 = vst [vmem:[%s4515_s7 + $0x90] sm:$0xff] %v190_v18  ;;  %193 = vst [vmem:[%s4515_s7 + $0x98] sm:$0xff] %v192_v19  ;;  %v196_v21 = vld [vmem:[%s4510_s6 + $0x1f8] sm:$0xff]  ;;  %v198_v22 = vld [vmem:[%s4510_s6 + $0x200] sm:$0xff] }
  0x25   : > { %195 = vst [vmem:[%s4515_s7 + $0xa0] sm:$0xff] %v194_v20  ;;  %v200_v23 = vld [vmem:[%s4510_s6 + $0x208] sm:$0xff]  ;;  %197 = vst [vmem:[%s4515_s7 + $0xa8] sm:$0xff] %v196_v21  ;;  %v202_v24 = vld [vmem:[%s4510_s6 + $0x210] sm:$0xff] }
  0x26   : > { %199 = vst [vmem:[%s4515_s7 + $0xb0] sm:$0xff] %v198_v22  ;;  %201 = vst [vmem:[%s4515_s7 + $0xb8] sm:$0xff] %v200_v23  ;;  %v204_v25 = vld [vmem:[%s4510_s6 + $0x218] sm:$0xff]  ;;  %v206_v26 = vld [vmem:[%s4510_s6 + $0x220] sm:$0xff] }
  0x27   : > { %203 = vst [vmem:[%s4515_s7 + $0xc0] sm:$0xff] %v202_v24  ;;  %205 = vst [vmem:[%s4515_s7 + $0xc8] sm:$0xff] %v204_v25  ;;  %v208_v27 = vld [vmem:[%s4510_s6 + $0x228] sm:$0xff]  ;;  %v210_v28 = vld [vmem:[%s4510_s6 + $0x2a0] sm:$0xff] }
  0x28   : > { %207 = vst [vmem:[%s4515_s7 + $0xd0] sm:$0xff] %v206_v26  ;;  %v212_v29 = vld [vmem:[%s4510_s6 + $0x2a8] sm:$0xff]  ;;  %209 = vst [vmem:[%s4515_s7 + $0xd8] sm:$0xff] %v208_v27  ;;  %v214_v30 = vld [vmem:[%s4510_s6 + $0x2b0] sm:$0xff] }
  0x29   : > { %211 = vst [vmem:[%s4515_s7 + $0xe0] sm:$0xff] %v210_v28  ;;  %213 = vst [vmem:[%s4515_s7 + $0xe8] sm:$0xff] %v212_v29  ;;  %v216_v31 = vld [vmem:[%s4510_s6 + $0x2b8] sm:$0xff]  ;;  %v218_v32 = vld [vmem:[%s4510_s6 + $0x2c0] sm:$0xff] }
  0x2a   : > { %215 = vst [vmem:[%s4515_s7 + $0xf0] sm:$0xff] %v214_v30  ;;  %217 = vst [vmem:[%s4515_s7 + $0xf8] sm:$0xff] %v216_v31  ;;  %v220_v33 = vld [vmem:[%s4510_s6 + $0x2c8] sm:$0xff]  ;;  %v222_v34 = vld [vmem:[%s4510_s6 + $0x2d0] sm:$0xff] }
  0x2b   : > { %219 = vst [vmem:[%s4515_s7 + $0x100] sm:$0xff] %v218_v32  ;;  %v224_v35 = vld [vmem:[%s4510_s6 + $0x348] sm:$0xff]  ;;  %221 = vst [vmem:[%s4515_s7 + $0x108] sm:$0xff] %v220_v33  ;;  %v226_v36 = vld [vmem:[%s4510_s6 + $0x350] sm:$0xff] }
  0x2c   : > { %223 = vst [vmem:[%s4515_s7 + $0x110] sm:$0xff] %v222_v34  ;;  %225 = vst [vmem:[%s4515_s7 + $0x118] sm:$0xff] %v224_v35  ;;  %v228_v37 = vld [vmem:[%s4510_s6 + $0x358] sm:$0xff]  ;;  %v230_v38 = vld [vmem:[%s4510_s6 + $0x360] sm:$0xff] }
  0x2d   : > { %227 = vst [vmem:[%s4515_s7 + $0x120] sm:$0xff] %v226_v36  ;;  %229 = vst [vmem:[%s4515_s7 + $0x128] sm:$0xff] %v228_v37  ;;  %v232_v39 = vld [vmem:[%s4510_s6 + $0x368] sm:$0xff]  ;;  %v234_v40 = vld [vmem:[%s4510_s6 + $0x370] sm:$0xff] }
  0x2e   : > { %231 = vst [vmem:[%s4515_s7 + $0x130] sm:$0xff] %v230_v38  ;;  %v236_v41 = vld [vmem:[%s4510_s6 + $0x378] sm:$0xff]  ;;  %233 = vst [vmem:[%s4515_s7 + $0x138] sm:$0xff] %v232_v39  ;;  %v238_v42 = vld [vmem:[%s4510_s6 + $0x3f0] sm:$0xff] }
  0x2f   : > { %235 = vst [vmem:[%s4515_s7 + $0x140] sm:$0xff] %v234_v40  ;;  %237 = vst [vmem:[%s4515_s7 + $0x148] sm:$0xff] %v236_v41  ;;  %v240_v43 = vld [vmem:[%s4510_s6 + $0x3f8] sm:$0xff]  ;;  %v242_v44 = vld [vmem:[%s4510_s6 + $0x400] sm:$0xff] }
  0x30   : > { %239 = vst [vmem:[%s4515_s7 + $0x150] sm:$0xff] %v238_v42  ;;  %241 = vst [vmem:[%s4515_s7 + $0x158] sm:$0xff] %v240_v43  ;;  %v244_v45 = vld [vmem:[%s4510_s6 + $0x408] sm:$0xff]  ;;  %v246_v46 = vld [vmem:[%s4510_s6 + $0x410] sm:$0xff] }
  0x31   : > { %243 = vst [vmem:[%s4515_s7 + $0x160] sm:$0xff] %v242_v44  ;;  %v248_v47 = vld [vmem:[%s4510_s6 + $0x418] sm:$0xff]  ;;  %245 = vst [vmem:[%s4515_s7 + $0x168] sm:$0xff] %v244_v45  ;;  %v250_v48 = vld [vmem:[%s4510_s6 + $0x420] sm:$0xff] }
  0x32   : > { %247 = vst [vmem:[%s4515_s7 + $0x170] sm:$0xff] %v246_v46  ;;  %249 = vst [vmem:[%s4515_s7 + $0x178] sm:$0xff] %v248_v47  ;;  %v252_v49 = vld [vmem:[%s4510_s6 + $0x498] sm:$0xff]  ;;  %v254_v50 = vld [vmem:[%s4510_s6 + $0x4a0] sm:$0xff] }
  0x33   : > { %251 = vst [vmem:[%s4515_s7 + $0x180] sm:$0xff] %v250_v48  ;;  %253 = vst [vmem:[%s4515_s7 + $0x188] sm:$0xff] %v252_v49  ;;  %v256_v51 = vld [vmem:[%s4510_s6 + $0x4a8] sm:$0xff]  ;;  %v258_v52 = vld [vmem:[%s4510_s6 + $0x4b0] sm:$0xff] }
  0x34   : > { %255 = vst [vmem:[%s4515_s7 + $0x190] sm:$0xff] %v254_v50  ;;  %v260_v53 = vld [vmem:[%s4510_s6 + $0x4b8] sm:$0xff]  ;;  %257 = vst [vmem:[%s4515_s7 + $0x198] sm:$0xff] %v256_v51  ;;  %v262_v54 = vld [vmem:[%s4510_s6 + $0x4c0] sm:$0xff] }
  0x35   : > { %259 = vst [vmem:[%s4515_s7 + $0x1a0] sm:$0xff] %v258_v52  ;;  %261 = vst [vmem:[%s4515_s7 + $0x1a8] sm:$0xff] %v260_v53  ;;  %v264_v55 = vld [vmem:[%s4510_s6 + $0x4c8] sm:$0xff] }
  0x36   : > { %263 = vst [vmem:[%s4515_s7 + $0x1b0] sm:$0xff] %v262_v54  ;;  %265 = vst [vmem:[%s4515_s7 + $0x1b8] sm:$0xff] %v264_v55 }
  0x37 PF: > { %271 = sbr.rel (!%p4496_p7) target bundleno = 88 (0x58), region = 47  ;;  %s273_s8 = sand.u32 (%p4496_p7), 1, %s4410_s13  }
  0x38   : > { %s3871_s9 = smul.u32 (%p4496_p7), 56, %s4422_s16 }
  0x39   : > { %s4180_s10 = smul.u32 (%p4496_p7), 448, %s273_s8 }
  0x3a   : > { %s4633_s20 = scalar_lea.vmem (%p4496_p7), %s7435_s1, %s3871_s9 }
  0x3b   : > { %v3933_v56 = vld [vmem:[%s4633_s20 + $0x38] sm:$0xff] (%p4496_p7)  ;;  %v3934_v57 = vld [vmem:[%s4633_s20 + $0x40] sm:$0xff] (%p4496_p7)  ;;  %v3935_v58 = vld [vmem:[%s4633_s20 + $0x48] sm:$0xff] (%p4496_p7)  ;;  %s4638_s21 = scalar_lea.vmem (%p4496_p7), [#allocation3], %s4180_s10 }
  0x3c   : > { %293 = vst [vmem:[%s4638_s21] sm:$0xff] (%p4496_p7), %v3933_v56  ;;  %295 = vst [vmem:[%s4638_s21 + $0x8] sm:$0xff] (%p4496_p7), %v3934_v57  ;;  %v3936_v59 = vld [vmem:[%s4633_s20 + $0x50] sm:$0xff] (%p4496_p7)  ;;  %v3937_v60 = vld [vmem:[%s4633_s20 + $0x58] sm:$0xff] (%p4496_p7) }
  0x3d   : > { %297 = vst [vmem:[%s4638_s21 + $0x10] sm:$0xff] (%p4496_p7), %v3935_v58  ;;  %v3938_v61 = vld [vmem:[%s4633_s20 + $0x60] sm:$0xff] (%p4496_p7)  ;;  %299 = vst [vmem:[%s4638_s21 + $0x18] sm:$0xff] (%p4496_p7), %v3936_v59  ;;  %v3939_v62 = vld [vmem:[%s4633_s20 + $0x68] sm:$0xff] (%p4496_p7) }
  0x3e   : > { %301 = vst [vmem:[%s4638_s21 + $0x20] sm:$0xff] %v3937_v60  ;;  %303 = vst [vmem:[%s4638_s21 + $0x28] sm:$0xff] %v3938_v61  ;;  %v3940_v63 = vld [vmem:[%s4633_s20 + $0xe0] sm:$0xff]  ;;  %v3941_v0 = vld [vmem:[%s4633_s20 + $0xe8] sm:$0xff] }
  0x3f   : > { %305 = vst [vmem:[%s4638_s21 + $0x30] sm:$0xff] %v3939_v62  ;;  %307 = vst [vmem:[%s4638_s21 + $0x38] sm:$0xff] %v3940_v63  ;;  %v3942_v1 = vld [vmem:[%s4633_s20 + $0xf0] sm:$0xff]  ;;  %v3943_v2 = vld [vmem:[%s4633_s20 + $0xf8] sm:$0xff] }
  0x40   : > { %309 = vst [vmem:[%s4638_s21 + $0x40] sm:$0xff] %v3941_v0  ;;  %v3944_v3 = vld [vmem:[%s4633_s20 + $0x100] sm:$0xff]  ;;  %311 = vst [vmem:[%s4638_s21 + $0x48] sm:$0xff] %v3942_v1  ;;  %v3945_v4 = vld [vmem:[%s4633_s20 + $0x108] sm:$0xff] }
  0x41   : > { %313 = vst [vmem:[%s4638_s21 + $0x50] sm:$0xff] %v3943_v2  ;;  %315 = vst [vmem:[%s4638_s21 + $0x58] sm:$0xff] %v3944_v3  ;;  %v3946_v5 = vld [vmem:[%s4633_s20 + $0x110] sm:$0xff]  ;;  %v3947_v6 = vld [vmem:[%s4633_s20 + $0x188] sm:$0xff] }
  0x42   : > { %317 = vst [vmem:[%s4638_s21 + $0x60] sm:$0xff] %v3945_v4  ;;  %319 = vst [vmem:[%s4638_s21 + $0x68] sm:$0xff] %v3946_v5  ;;  %v3948_v7 = vld [vmem:[%s4633_s20 + $0x190] sm:$0xff]  ;;  %v3949_v8 = vld [vmem:[%s4633_s20 + $0x198] sm:$0xff] }
  0x43   : > { %321 = vst [vmem:[%s4638_s21 + $0x70] sm:$0xff] %v3947_v6  ;;  %v3950_v9 = vld [vmem:[%s4633_s20 + $0x1a0] sm:$0xff]  ;;  %323 = vst [vmem:[%s4638_s21 + $0x78] sm:$0xff] %v3948_v7  ;;  %v3951_v10 = vld [vmem:[%s4633_s20 + $0x1a8] sm:$0xff] }
  0x44   : > { %325 = vst [vmem:[%s4638_s21 + $0x80] sm:$0xff] %v3949_v8  ;;  %327 = vst [vmem:[%s4638_s21 + $0x88] sm:$0xff] %v3950_v9  ;;  %v3952_v11 = vld [vmem:[%s4633_s20 + $0x1b0] sm:$0xff]  ;;  %v3953_v12 = vld [vmem:[%s4633_s20 + $0x1b8] sm:$0xff] }
  0x45   : > { %329 = vst [vmem:[%s4638_s21 + $0x90] sm:$0xff] %v3951_v10  ;;  %331 = vst [vmem:[%s4638_s21 + $0x98] sm:$0xff] %v3952_v11  ;;  %v3954_v13 = vld [vmem:[%s4633_s20 + $0x230] sm:$0xff]  ;;  %v3955_v14 = vld [vmem:[%s4633_s20 + $0x238] sm:$0xff] }
  0x46   : > { %333 = vst [vmem:[%s4638_s21 + $0xa0] sm:$0xff] %v3953_v12  ;;  %v3956_v15 = vld [vmem:[%s4633_s20 + $0x240] sm:$0xff]  ;;  %335 = vst [vmem:[%s4638_s21 + $0xa8] sm:$0xff] %v3954_v13  ;;  %v3957_v16 = vld [vmem:[%s4633_s20 + $0x248] sm:$0xff] }
  0x47   : > { %337 = vst [vmem:[%s4638_s21 + $0xb0] sm:$0xff] %v3955_v14  ;;  %339 = vst [vmem:[%s4638_s21 + $0xb8] sm:$0xff] %v3956_v15  ;;  %v3958_v17 = vld [vmem:[%s4633_s20 + $0x250] sm:$0xff]  ;;  %v3959_v18 = vld [vmem:[%s4633_s20 + $0x258] sm:$0xff] }
  0x48   : > { %341 = vst [vmem:[%s4638_s21 + $0xc0] sm:$0xff] %v3957_v16  ;;  %343 = vst [vmem:[%s4638_s21 + $0xc8] sm:$0xff] %v3958_v17  ;;  %v3960_v19 = vld [vmem:[%s4633_s20 + $0x260] sm:$0xff]  ;;  %v3961_v20 = vld [vmem:[%s4633_s20 + $0x2d8] sm:$0xff] }
  0x49   : > { %345 = vst [vmem:[%s4638_s21 + $0xd0] sm:$0xff] %v3959_v18  ;;  %v3962_v21 = vld [vmem:[%s4633_s20 + $0x2e0] sm:$0xff]  ;;  %347 = vst [vmem:[%s4638_s21 + $0xd8] sm:$0xff] %v3960_v19  ;;  %v3963_v22 = vld [vmem:[%s4633_s20 + $0x2e8] sm:$0xff] }
  0x4a   : > { %349 = vst [vmem:[%s4638_s21 + $0xe0] sm:$0xff] %v3961_v20  ;;  %351 = vst [vmem:[%s4638_s21 + $0xe8] sm:$0xff] %v3962_v21  ;;  %v3964_v23 = vld [vmem:[%s4633_s20 + $0x2f0] sm:$0xff]  ;;  %v3965_v24 = vld [vmem:[%s4633_s20 + $0x2f8] sm:$0xff] }
  0x4b   : > { %353 = vst [vmem:[%s4638_s21 + $0xf0] sm:$0xff] %v3963_v22  ;;  %355 = vst [vmem:[%s4638_s21 + $0xf8] sm:$0xff] %v3964_v23  ;;  %v3966_v25 = vld [vmem:[%s4633_s20 + $0x300] sm:$0xff]  ;;  %v3967_v26 = vld [vmem:[%s4633_s20 + $0x308] sm:$0xff] }
  0x4c   : > { %357 = vst [vmem:[%s4638_s21 + $0x100] sm:$0xff] %v3965_v24  ;;  %v3968_v27 = vld [vmem:[%s4633_s20 + $0x380] sm:$0xff]  ;;  %359 = vst [vmem:[%s4638_s21 + $0x108] sm:$0xff] %v3966_v25  ;;  %v3969_v28 = vld [vmem:[%s4633_s20 + $0x388] sm:$0xff] }
  0x4d   : > { %361 = vst [vmem:[%s4638_s21 + $0x110] sm:$0xff] %v3967_v26  ;;  %363 = vst [vmem:[%s4638_s21 + $0x118] sm:$0xff] %v3968_v27  ;;  %v3970_v29 = vld [vmem:[%s4633_s20 + $0x390] sm:$0xff]  ;;  %v3971_v30 = vld [vmem:[%s4633_s20 + $0x398] sm:$0xff] }
  0x4e   : > { %365 = vst [vmem:[%s4638_s21 + $0x120] sm:$0xff] %v3969_v28  ;;  %367 = vst [vmem:[%s4638_s21 + $0x128] sm:$0xff] %v3970_v29  ;;  %v3972_v31 = vld [vmem:[%s4633_s20 + $0x3a0] sm:$0xff]  ;;  %v3973_v32 = vld [vmem:[%s4633_s20 + $0x3a8] sm:$0xff] }
  0x4f   : > { %369 = vst [vmem:[%s4638_s21 + $0x130] sm:$0xff] %v3971_v30  ;;  %v3974_v33 = vld [vmem:[%s4633_s20 + $0x3b0] sm:$0xff]  ;;  %371 = vst [vmem:[%s4638_s21 + $0x138] sm:$0xff] %v3972_v31  ;;  %v3975_v34 = vld [vmem:[%s4633_s20 + $0x428] sm:$0xff] }
  0x50   : > { %373 = vst [vmem:[%s4638_s21 + $0x140] sm:$0xff] %v3973_v32  ;;  %375 = vst [vmem:[%s4638_s21 + $0x148] sm:$0xff] %v3974_v33  ;;  %v3976_v35 = vld [vmem:[%s4633_s20 + $0x430] sm:$0xff]  ;;  %v3977_v36 = vld [vmem:[%s4633_s20 + $0x438] sm:$0xff] }
  0x51   : > { %377 = vst [vmem:[%s4638_s21 + $0x150] sm:$0xff] %v3975_v34  ;;  %379 = vst [vmem:[%s4638_s21 + $0x158] sm:$0xff] %v3976_v35  ;;  %v3978_v37 = vld [vmem:[%s4633_s20 + $0x440] sm:$0xff]  ;;  %v3979_v38 = vld [vmem:[%s4633_s20 + $0x448] sm:$0xff] }
  0x52   : > { %381 = vst [vmem:[%s4638_s21 + $0x160] sm:$0xff] %v3977_v36  ;;  %v3980_v39 = vld [vmem:[%s4633_s20 + $0x450] sm:$0xff]  ;;  %383 = vst [vmem:[%s4638_s21 + $0x168] sm:$0xff] %v3978_v37  ;;  %v3981_v40 = vld [vmem:[%s4633_s20 + $0x458] sm:$0xff] }
  0x53   : > { %385 = vst [vmem:[%s4638_s21 + $0x170] sm:$0xff] %v3979_v38  ;;  %387 = vst [vmem:[%s4638_s21 + $0x178] sm:$0xff] %v3980_v39  ;;  %v3982_v41 = vld [vmem:[%s4633_s20 + $0x4d0] sm:$0xff]  ;;  %v3983_v42 = vld [vmem:[%s4633_s20 + $0x4d8] sm:$0xff] }
  0x54   : > { %389 = vst [vmem:[%s4638_s21 + $0x180] sm:$0xff] %v3981_v40  ;;  %391 = vst [vmem:[%s4638_s21 + $0x188] sm:$0xff] %v3982_v41  ;;  %v3984_v43 = vld [vmem:[%s4633_s20 + $0x4e0] sm:$0xff]  ;;  %v3985_v44 = vld [vmem:[%s4633_s20 + $0x4e8] sm:$0xff] }
  0x55   : > { %393 = vst [vmem:[%s4638_s21 + $0x190] sm:$0xff] %v3983_v42  ;;  %v3986_v45 = vld [vmem:[%s4633_s20 + $0x4f0] sm:$0xff]  ;;  %395 = vst [vmem:[%s4638_s21 + $0x198] sm:$0xff] %v3984_v43  ;;  %v3987_v46 = vld [vmem:[%s4633_s20 + $0x4f8] sm:$0xff] }
  0x56   : > { %397 = vst [vmem:[%s4638_s21 + $0x1a0] sm:$0xff] %v3985_v44  ;;  %399 = vst [vmem:[%s4638_s21 + $0x1a8] sm:$0xff] %v3986_v45  ;;  %v3988_v47 = vld [vmem:[%s4633_s20 + $0x500] sm:$0xff] }
  0x57   : > { %401 = vst [vmem:[%s4638_s21 + $0x1b0] sm:$0xff] %v3987_v46  ;;  %403 = vst [vmem:[%s4638_s21 + $0x1b8] sm:$0xff] %v3988_v47 }
  0x58 PF: > { %p3989_p10 = scmp.ge.s32.totalorder %s4422_s16, 1  ;;  %p408_p11 = scmp.lt.s32.totalorder %s4422_s16, 3 }
  0x5a   : > { %p409_p12 = pnand %p3989_p10, %p408_p11 }
  0x5c   : > { %412 = sbr.rel (%p409_p12) target bundleno = 1032 (0x408), region = 70 }
  0x63   : > { %s415_s23 = sand.u32 1, %s4414_s14   ;;  %s4424_s28 = smov 127   ;;  %v4825_v4 = vld [vmem:[%s7436_s2 + $0x4] ss:$8 sps:$4 sm:$0xff]   ;;  %vm1463_vm0 = vcmask 523264   ;;  %vm961_vm1 = vcmask 1039360  }
  0x64   : > { %s4181_s24 = smul.u32 448, %s415_s23  ;;  %s4425_s29 = smov 126   ;;  %4078 = vmatprep.mubr.msk.bf16.mxu0 %vm1463_vm0, %v4825_v4  ;;  %4090 = vmatprep.mubr.msk.bf16.mxu1 %vm1463_vm0, %v4825_v4  ;;  %vm1210_vm2 = vcmask 1031168  }
  0x65   : > { %s422_s5 = sand.u32 1, %s4406_s12   ;;  %s4427_s9 = smov 64  }
  0x66   : > { %s4754_s26 = scalar_lea.vmem [#allocation2], %s4181_s24  ;;  %s4182_s6 = smul.u32 448, %s422_s5 }
  0x67   : > { %v4228_v48 = vld [vmem:[%s4754_s26 + $0x4] ss:$56 sps:$4 sm:$0xff]   ;;  %v4230_v49 = vld [vmem:[%s4754_s26] ss:$56 sps:$4 sm:$0xff]   ;;  %v4236_v52 = vld [vmem:[%s4754_s26 + $0x74] ss:$56 sps:$4 sm:$0xff]  }
  0x68   : > { %835 = vrot.lane.b32.xlu0 %v4228_v48, %s4424_s28  ;;  %v4231_v50 = vld [vmem:[%s4754_s26 + $0x8] ss:$56 sps:$4 sm:$0xff]   ;;  %v4233_v51 = vld [vmem:[%s4754_s26 + $0xc] ss:$56 sps:$4 sm:$0xff]   ;;  %1500 = vmatprep.subr.bf16.mxu0 %v4228_v48  ;;  %v4241_v55 = vld [vmem:[%s4754_s26 + $0x7c] ss:$56 sps:$4 sm:$0xff]  }
  0x69   : > { %833 = vrot.lane.b32.xlu1 %v4230_v49, %s4424_s28  ;;  %1501 = vmatpush1.bf16.msra.mxu0 %v4230_v49  ;;  %v4764_v53 = vld [vmem:[%s4754_s26 + $0x10] ss:$56 sps:$4 sm:$0xff]   ;;  %v4244_v57 = vld [vmem:[%s4754_s26 + $0xe4] ss:$56 sps:$4 sm:$0xff]   ;;  %v4248_v59 = vld [vmem:[%s4754_s26 + $0xe0] ss:$56 sps:$4 sm:$0xff]  }
  0x6a   : > { %1645 = vmatprep.subr.bf16.mxu1 %v4233_v51  ;;  %v4240_v54 = vld [vmem:[%s4754_s26 + $0x70] ss:$56 sps:$4 sm:$0xff]   ;;  %1502 = vmatprep.subr.bf16.mxu0 %v4236_v52  ;;  %v4249_v60 = vld [vmem:[%s4754_s26 + $0xec] ss:$56 sps:$4 sm:$0xff]   ;;  %v4782_v63 = vld [vmem:[%s4754_s26 + $0x80] ss:$56 sps:$4 sm:$0xff]  }
  0x6b   : > { %1646 = vmatpush1.bf16.msra.mxu1 %v4231_v50  ;;  %v4238_v56 = vld [vmem:[%s4754_s26 + $0x78] ss:$56 sps:$4 sm:$0xff]   ;;  %v4246_v58 = vld [vmem:[%s4754_s26 + $0xe8] ss:$56 sps:$4 sm:$0xff]   ;;  %v4252_v61 = vld [vmem:[%s4754_s26 + $0x154] ss:$56 sps:$4 sm:$0xff]  }
  0x6c   : > { %837 = vrot.lane.b32.xlu0 %v4231_v50, %s4424_s28  ;;  %1647 = vmatprep.subr.bf16.mxu1 %v4241_v55  ;;  %v4256_v62 = vld [vmem:[%s4754_s26 + $0x150] ss:$56 sps:$4 sm:$0xff]   ;;  %v4257_v0 = vld [vmem:[%s4754_s26 + $0x15c] ss:$56 sps:$4 sm:$0xff]   ;;  %v4802_v3 = vld [vmem:[%s4754_s26 + $0x160] ss:$56 sps:$4 sm:$0xff]  }
  0x6d   : > { %839 = vrot.lane.b32.xlu1 %v4233_v51, %s4424_s28  ;;  %1503 = vmatpush1.bf16.msra.mxu0 %v4240_v54  ;;  %v4254_v1 = vld [vmem:[%s4754_s26 + $0x158] ss:$56 sps:$4 sm:$0xff]   ;;  %v4840_v5 = vld [vmem:[%s4754_s26 + $0x14] ss:$56 sps:$4 sm:$0xff]   ;;  %v4861_v9 = vld [vmem:[%s4754_s26 + $0x84] ss:$56 sps:$4 sm:$0xff]  }
  0x6e   : > { %1504 = vmatprep.subr.bf16.mxu0 %v4244_v57  ;;  %v4794_v2 = vld [vmem:[%s4754_s26 + $0xf0] ss:$56 sps:$4 sm:$0xff]   ;;  %v4850_v7 = vld [vmem:[%s4754_s26 + $0x1c] ss:$56 sps:$4 sm:$0xff]   ;;  %v4855_v8 = vld [vmem:[%s4754_s26 + $0x20] ss:$56 sps:$4 sm:$0xff]  }
  0x6f   : > { %1648 = vmatpush1.bf16.msra.mxu1 %v4238_v56  ;;  %v4845_v6 = vld [vmem:[%s4754_s26 + $0x18] ss:$56 sps:$4 sm:$0xff]   ;;  %v4866_v10 = vld [vmem:[%s4754_s26 + $0x88] ss:$56 sps:$4 sm:$0xff]   ;;  %s4868_s7 = scalar_lea.vmem [#allocation3], %s4182_s6 }
  0x70   : > { %841 = vrot.lane.b32.xlu0 %v4764_v53, %s4424_s28  ;;  %1649 = vmatprep.subr.bf16.mxu1 %v4249_v60  ;;  %v4873_v11 = vld [vmem:[%s4754_s26 + $0x8c] ss:$56 sps:$4 sm:$0xff]   ;;  %v4876_v12 = vld [vmem:[%s4754_s26 + $0x90] ss:$56 sps:$4 sm:$0xff]   ;;  %v4893_v15 = vld [vmem:[%s4754_s26 + $0xfc] ss:$56 sps:$4 sm:$0xff]  }
  0x71   : > { %867 = vrot.lane.b32.xlu1 %v4236_v52, %s4424_s28  ;;  %1505 = vmatpush1.bf16.msra.mxu0 %v4248_v59  ;;  %v4883_v13 = vld [vmem:[%s4754_s26 + $0xf4] ss:$56 sps:$4 sm:$0xff]   ;;  %v4888_v14 = vld [vmem:[%s4754_s26 + $0xf8] ss:$56 sps:$4 sm:$0xff]   ;;  %v4903_v17 = vld [vmem:[%s4754_s26 + $0x164] ss:$56 sps:$4 sm:$0xff]  }
  0x72   : > { %1506 = vmatprep.subr.bf16.mxu0 %v4252_v61  ;;  %v4898_v16 = vld [vmem:[%s4754_s26 + $0x100] ss:$56 sps:$4 sm:$0xff]   ;;  %v4913_v19 = vld [vmem:[%s4754_s26 + $0x16c] ss:$56 sps:$4 sm:$0xff]   ;;  %v4918_v20 = vld [vmem:[%s4754_s26 + $0x170] ss:$56 sps:$4 sm:$0xff]  }
  0x73   : > { %1650 = vmatpush1.bf16.msra.mxu1 %v4246_v58  ;;  %v4908_v18 = vld [vmem:[%s4754_s26 + $0x168] ss:$56 sps:$4 sm:$0xff]   ;;  %v4971_v45 = vld [vmem:[%s4754_s26 + $0x24] ss:$56 sps:$4 sm:$0xff]  }
  0x74   : > { %869 = vrot.lane.b32.xlu0 %v4238_v56, %s4424_s28  ;;  %1651 = vmatprep.subr.bf16.mxu1 %v4257_v0  ;;  %v4976_v46 = vld [vmem:[%s4754_s26 + $0x28] ss:$56 sps:$4 sm:$0xff]  }
  0x75   : > { %865 = vrot.lane.b32.xlu1 %v4240_v54, %s4424_s28  ;;  %1507 = vmatpush1.bf16.msra.mxu0 %v4256_v62 }
  0x77   : > { %1652 = vmatpush1.bf16.msra.mxu1 %v4254_v1 }
  0x78   : > { %871 = vrot.lane.b32.xlu0 %v4241_v55, %s4424_s28 }
  0x79   : > { %873 = vrot.lane.b32.xlu1 %v4782_v63, %s4424_s28 }
  0x7c   : > { %899 = vrot.lane.b32.xlu0 %v4244_v57, %s4424_s28 }
  0x7d   : > { %901 = vrot.lane.b32.xlu1 %v4246_v58, %s4424_s28 }
  0x80   : > { %897 = vrot.lane.b32.xlu0 %v4248_v59, %s4424_s28 }
  0x81   : > { %903 = vrot.lane.b32.xlu1 %v4249_v60, %s4424_s28 }
  0x84   : > { %905 = vrot.lane.b32.xlu0 %v4794_v2, %s4424_s28 }
  0x85   : > { %931 = vrot.lane.b32.xlu1 %v4252_v61, %s4424_s28 }
  0x88   : > { %933 = vrot.lane.b32.xlu0 %v4254_v1, %s4424_s28 }
  0x89   : > { %929 = vrot.lane.b32.xlu1 %v4256_v62, %s4424_s28 }
  0x8c   : > { %935 = vrot.lane.b32.xlu0 %v4257_v0, %s4424_s28 }
  0x8d   : > { %937 = vrot.lane.b32.xlu1 %v4802_v3, %s4424_s28 }
  0x90   : > { %1084 = vrot.lane.b32.xlu0 %v4228_v48, %s4425_s29 }
  0x91   : > { %1086 = vrot.lane.b32.xlu1 %v4231_v50, %s4425_s29 }
  0x94   : > { %1082 = vrot.lane.b32.xlu0 %v4230_v49, %s4425_s29 }
  0x95   : > { %1088 = vrot.lane.b32.xlu1 %v4233_v51, %s4425_s29  ;;  %v4986_v51 = vld [vmem:[%s4754_s26 + $0x2c] ss:$56 sps:$4 sm:$0xff]  }
  0x98   : > { %1090 = vrot.lane.b32.xlu0 %v4764_v53, %s4425_s29 }
  0x99   : > { %1116 = vrot.lane.b32.xlu1 %v4236_v52, %s4425_s29  ;;  %v4991_v52 = vld [vmem:[%s4754_s26 + $0x30] ss:$56 sps:$4 sm:$0xff]  }
  0x9a   : > { %7455 = vst [vmem:[#allocation5_spill] sm:$0xff] %v4991_v52 }
  0x9c   : > { %1118 = vrot.lane.b32.xlu0 %v4238_v56, %s4425_s29 }
  0x9d   : > { %1114 = vrot.lane.b32.xlu1 %v4240_v54, %s4425_s29 }
  0xa0   : > { %1120 = vrot.lane.b32.xlu0 %v4241_v55, %s4425_s29 }
  0xa1   : > { %1122 = vrot.lane.b32.xlu1 %v4782_v63, %s4425_s29 }
  0xa4   : > { %1148 = vrot.lane.b32.xlu0 %v4244_v57, %s4425_s29 }
  0xa5   : > { %1150 = vrot.lane.b32.xlu1 %v4246_v58, %s4425_s29  ;;  %v4998_v58 = vld [vmem:[%s4754_s26 + $0x94] ss:$56 sps:$4 sm:$0xff]  }
  0xa8   : > { %1146 = vrot.lane.b32.xlu0 %v4248_v59, %s4425_s29  ;;  %v5003_v59 = vld [vmem:[%s4754_s26 + $0x98] ss:$56 sps:$4 sm:$0xff]  }
  0xa9   : > { %1152 = vrot.lane.b32.xlu1 %v4249_v60, %s4425_s29 }
  0xac   : > { %1154 = vrot.lane.b32.xlu0 %v4794_v2, %s4425_s29 }
  0xad   : > { %1180 = vrot.lane.b32.xlu1 %v4252_v61, %s4425_s29 }
  0xb0   : > { %1182 = vrot.lane.b32.xlu0 %v4254_v1, %s4425_s29  ;;  %v5013_v1 = vld [vmem:[%s4754_s26 + $0x9c] ss:$56 sps:$4 sm:$0xff]  }
  0xb1   : > { %1178 = vrot.lane.b32.xlu1 %v4256_v62, %s4425_s29 }
  0xb4   : > { %1184 = vrot.lane.b32.xlu0 %v4257_v0, %s4425_s29 }
  0xb5   : > { %1186 = vrot.lane.b32.xlu1 %v4802_v3, %s4425_s29 }
  0xb8   : > { %843 = vrot.lane.b32.xlu0 %v4840_v5, %s4424_s28 }
  0xb9   : > { %845 = vrot.lane.b32.xlu1 %v4845_v6, %s4424_s28 }
  0xbc   : > { %847 = vrot.lane.b32.xlu0 %v4850_v7, %s4424_s28 }
  0xbd   : > { %849 = vrot.lane.b32.xlu1 %v4855_v8, %s4424_s28 }
  0xc0   : > { %875 = vrot.lane.b32.xlu0 %v4861_v9, %s4424_s28 }
  0xc1   : > { %877 = vrot.lane.b32.xlu1 %v4866_v10, %s4424_s28 }
  0xc4   : > { %879 = vrot.lane.b32.xlu0 %v4873_v11, %s4424_s28 }
  0xc5   : > { %881 = vrot.lane.b32.xlu1 %v4876_v12, %s4424_s28 }
  0xc8   : > { %907 = vrot.lane.b32.xlu0 %v4883_v13, %s4424_s28 }
  0xc9   : > { %909 = vrot.lane.b32.xlu1 %v4888_v14, %s4424_s28 }
  0xcc   : > { %911 = vrot.lane.b32.xlu0 %v4893_v15, %s4424_s28 }
  0xcd   : > { %913 = vrot.lane.b32.xlu1 %v4898_v16, %s4424_s28 }
  0xd0   : > { %939 = vrot.lane.b32.xlu0 %v4903_v17, %s4424_s28 }
  0xd1   : > { %941 = vrot.lane.b32.xlu1 %v4908_v18, %s4424_s28 }
  0xd4   : > { %943 = vrot.lane.b32.xlu0 %v4913_v19, %s4424_s28 }
  0xd5   : > { %945 = vrot.lane.b32.xlu1 %v4918_v20, %s4424_s28 }
  0xd8   : > { %1092 = vrot.lane.b32.xlu0 %v4840_v5, %s4425_s29 }
  0xd9   : > { %1094 = vrot.lane.b32.xlu1 %v4845_v6, %s4425_s29 }
  0xda   : > { %v836_v21 = vpop.permute.xlu0 %835 }
  0xdb   : > { %v834_v22 = vpop.permute.xlu1 %833 }
  0xdc   : > { %1096 = vrot.lane.b32.xlu0 %v4850_v7, %s4425_s29  ;;  %v962_v26 = vsel %vm961_vm1, %v834_v22, %v836_v21 }
  0xdd   : > { %1098 = vrot.lane.b32.xlu1 %v4855_v8, %s4425_s29 }
  0xde   : > { %v838_v23 = vpop.permute.xlu0 %837 }
  0xdf   : > { %v840_v24 = vpop.permute.xlu1 %839  ;;  %v963_v25 = vsel %vm961_vm1, %v836_v21, %v838_v23  ;;  %v5018_v21 = vld [vmem:[%s4754_s26 + $0xa0] ss:$56 sps:$4 sm:$0xff]  }
  0xe0   : > { %1124 = vrot.lane.b32.xlu0 %v4861_v9, %s4425_s29  ;;  %1508 = vmatprep.subr.bf16.mxu0 %v963_v25  ;;  %v964_v30 = vsel %vm961_vm1, %v838_v23, %v840_v24  ;;  %7456 = vst [vmem:[#allocation6_spill] sm:$0xff] %v5018_v21  ;;  %v5024_v25 = vld [vmem:[%s4754_s26 + $0x104] ss:$56 sps:$4 sm:$0xff]  }
  0xe1   : > { %1126 = vrot.lane.b32.xlu1 %v4866_v10, %s4425_s29  ;;  %1509 = vmatpush1.bf16.msra.mxu0 %v962_v26  ;;  %v5029_v26 = vld [vmem:[%s4754_s26 + $0x108] ss:$56 sps:$4 sm:$0xff]  }
  0xe2   : > { %v4938_v27 = vpop.permute.xlu0 %841 }
  0xe3   : > { %v868_v28 = vpop.permute.xlu1 %867  ;;  %v965_v29 = vsel %vm961_vm1, %v840_v24, %v4938_v27 }
  0xe4   : > { %1128 = vrot.lane.b32.xlu0 %v4873_v11, %s4425_s29  ;;  %1653 = vmatprep.subr.bf16.mxu1 %v965_v29 }
  0xe5   : > { %1130 = vrot.lane.b32.xlu1 %v4876_v12, %s4425_s29  ;;  %1654 = vmatpush1.bf16.msra.mxu1 %v964_v30 }
  0xe6   : > { %v870_v31 = vpop.permute.xlu0 %869 }
  0xe7   : > { %v866_v32 = vpop.permute.xlu1 %865  ;;  %v978_v33 = vsel %vm961_vm1, %v868_v28, %v870_v31 }
  0xe8   : > { %1156 = vrot.lane.b32.xlu0 %v4883_v13, %s4425_s29  ;;  %1510 = vmatprep.subr.bf16.mxu0 %v978_v33  ;;  %v977_v34 = vsel %vm961_vm1, %v866_v32, %v868_v28  ;;  %v5040_v32 = vld [vmem:[%s4754_s26 + $0x110] ss:$56 sps:$4 sm:$0xff]  }
  0xe9   : > { %1158 = vrot.lane.b32.xlu1 %v4888_v14, %s4425_s29  ;;  %1511 = vmatpush1.bf16.msra.mxu0 %v977_v34  ;;  %7457 = vst [vmem:[#allocation7_spill] sm:$0xff] %v5040_v32 }
  0xea   : > { %v872_v35 = vpop.permute.xlu0 %871 }
  0xeb   : > { %v4953_v36 = vpop.permute.xlu1 %873  ;;  %v979_v37 = vsel %vm961_vm1, %v870_v31, %v872_v35  ;;  %v5035_v31 = vld [vmem:[%s4754_s26 + $0x10c] ss:$56 sps:$4 sm:$0xff]  }
  0xec   : > { %1160 = vrot.lane.b32.xlu0 %v4893_v15, %s4425_s29  ;;  %v980_v38 = vsel %vm961_vm1, %v872_v35, %v4953_v36 }
  0xed   : > { %1162 = vrot.lane.b32.xlu1 %v4898_v16, %s4425_s29  ;;  %1655 = vmatprep.subr.bf16.mxu1 %v980_v38  ;;  %v5050_v38 = vld [vmem:[%s4754_s26 + $0x174] ss:$56 sps:$4 sm:$0xff]  }
  0xee   : > { %1656 = vmatpush1.bf16.msra.mxu1 %v979_v37  ;;  %v900_v39 = vpop.permute.xlu0 %899 }
  0xef   : > { %v902_v40 = vpop.permute.xlu1 %901 }
  0xf0   : > { %1188 = vrot.lane.b32.xlu0 %v4903_v17, %s4425_s29  ;;  %v993_v41 = vsel %vm961_vm1, %v900_v39, %v902_v40 }
  0xf1   : > { %1190 = vrot.lane.b32.xlu1 %v4908_v18, %s4425_s29  ;;  %1512 = vmatprep.subr.bf16.mxu0 %v993_v41 }
  0xf2   : > { %v898_v42 = vpop.permute.xlu0 %897 }
  0xf3   : > { %v904_v43 = vpop.permute.xlu1 %903  ;;  %v992_v44 = vsel %vm961_vm1, %v898_v42, %v900_v39  ;;  %v5055_v39 = vld [vmem:[%s4754_s26 + $0x178] ss:$56 sps:$4 sm:$0xff]  }
  0xf4   : > { %1192 = vrot.lane.b32.xlu0 %v4913_v19, %s4425_s29  ;;  %1513 = vmatpush1.bf16.msra.mxu0 %v992_v44  ;;  %v994_v50 = vsel %vm961_vm1, %v902_v40, %v904_v43  ;;  %v5062_v44 = vld [vmem:[%s4754_s26 + $0x17c] ss:$56 sps:$4 sm:$0xff]  }
  0xf5   : > { %1194 = vrot.lane.b32.xlu1 %v4918_v20, %s4425_s29 }
  0xf6   : > { %v4978_v47 = vpop.permute.xlu0 %905 }
  0xf7   : > { %v932_v48 = vpop.permute.xlu1 %931  ;;  %v995_v49 = vsel %vm961_vm1, %v904_v43, %v4978_v47 }
  0xf8   : > { %851 = vrot.lane.b32.xlu0 %v4971_v45, %s4424_s28  ;;  %1657 = vmatprep.subr.bf16.mxu1 %v995_v49 }
  0xf9   : > { %1658 = vmatpush1.bf16.msra.mxu1 %v994_v50  ;;  %853 = vrot.lane.b32.xlu1 %v4976_v46, %s4424_s28 }
  0xfa   : > { %v934_v54 = vpop.permute.xlu0 %933 }
  0xfb   : > { %v930_v55 = vpop.permute.xlu1 %929  ;;  %v1008_v56 = vsel %vm961_vm1, %v932_v48, %v934_v54 }
  0xfc   : > { %855 = vrot.lane.b32.xlu0 %v4986_v51, %s4424_s28  ;;  %1514 = vmatprep.subr.bf16.mxu0 %v1008_v56  ;;  %v1007_v57 = vsel %vm961_vm1, %v930_v55, %v932_v48  ;;  %v5067_v48 = vld [vmem:[%s4754_s26 + $0x180] ss:$56 sps:$4 sm:$0xff]  }
  0xfd   : > { %1515 = vmatpush1.bf16.msra.mxu0 %v1007_v57  ;;  %857 = vrot.lane.b32.xlu1 %v4991_v52, %s4424_s28  ;;  %7458 = vst [vmem:[#allocation8_spill] sm:$0xff] %v5067_v48 }
  0xfe   : > { %v936_v60 = vpop.permute.xlu0 %935 }
  0xff   : > { %v5005_v61 = vpop.permute.xlu1 %937  ;;  %v1009_v62 = vsel %vm961_vm1, %v934_v54, %v936_v60 }
 0x100   : > { %883 = vrot.lane.b32.xlu0 %v4998_v58, %s4424_s28  ;;  %v1010_v0 = vsel %vm961_vm1, %v936_v60, %v5005_v61 }
 0x101   : > { %1659 = vmatprep.subr.bf16.mxu1 %v1010_v0  ;;  %885 = vrot.lane.b32.xlu1 %v5003_v59, %s4424_s28 }
 0x102   : > { %1660 = vmatpush1.bf16.msra.mxu1 %v1009_v62  ;;  %v1085_v22 = vpop.permute.xlu0 %1084 }
 0x103   : > { %v1087_v23 = vpop.permute.xlu1 %1086 }
 0x104   : > { %887 = vrot.lane.b32.xlu0 %v5013_v1, %s4424_s28  ;;  %v1212_v24 = vsel %vm1210_vm2, %v1085_v22, %v1087_v23 }
 0x105   : > { %1516 = vmatprep.subr.bf16.mxu0 %v1212_v24  ;;  %889 = vrot.lane.b32.xlu1 %v5018_v21, %s4424_s28 }
 0x106   : > { %v1083_v28 = vpop.permute.xlu0 %1082 }
 0x107   : > { %v1089_v29 = vpop.permute.xlu1 %1088  ;;  %v1211_v30 = vsel %vm1210_vm2, %v1083_v28, %v1085_v22 }
 0x108   : > { %915 = vrot.lane.b32.xlu0 %v5024_v25, %s4424_s28  ;;  %1517 = vmatpush1.bf16.msra.mxu0 %v1211_v30  ;;  %v1213_v37 = vsel %vm1210_vm2, %v1087_v23, %v1089_v29 }
 0x109   : > { %917 = vrot.lane.b32.xlu1 %v5029_v26, %s4424_s28 }
 0x10a   : > { %v5042_v33 = vpop.permute.xlu0 %1090 }
 0x10b   : > { %v1117_v34 = vpop.permute.xlu1 %1116  ;;  %v1214_v35 = vsel %vm1210_vm2, %v1089_v29, %v5042_v33 }
 0x10c   : > { %919 = vrot.lane.b32.xlu0 %v5035_v31, %s4424_s28  ;;  %1661 = vmatprep.subr.bf16.mxu1 %v1214_v35 }
 0x10d   : > { %1662 = vmatpush1.bf16.msra.mxu1 %v1213_v37  ;;  %921 = vrot.lane.b32.xlu1 %v5040_v32, %s4424_s28 }
 0x10e   : > { %v1119_v40 = vpop.permute.xlu0 %1118 }
 0x10f   : > { %v1115_v41 = vpop.permute.xlu1 %1114  ;;  %v1227_v42 = vsel %vm1210_vm2, %v1117_v34, %v1119_v40 }
 0x110   : > { %947 = vrot.lane.b32.xlu0 %v5050_v38, %s4424_s28  ;;  %1518 = vmatprep.subr.bf16.mxu0 %v1227_v42  ;;  %v1226_v43 = vsel %vm1210_vm2, %v1115_v41, %v1117_v34 }
 0x111   : > { %1519 = vmatpush1.bf16.msra.mxu0 %v1226_v43  ;;  %949 = vrot.lane.b32.xlu1 %v5055_v39, %s4424_s28 }
 0x112   : > { %v1121_v49 = vpop.permute.xlu0 %1120 }
 0x113   : > { %v5069_v50 = vpop.permute.xlu1 %1122  ;;  %v1228_v54 = vsel %vm1210_vm2, %v1119_v40, %v1121_v49  ;;  %v5104_v40 = vld [vmem:[%s7436_s2] ss:$8 sps:$4 sm:$0xff]  }
 0x114   : > { %951 = vrot.lane.b32.xlu0 %v5062_v44, %s4424_s28  ;;  %v1229_v55 = vsel %vm1210_vm2, %v1121_v49, %v5069_v50 }
 0x115   : > { %1663 = vmatprep.subr.bf16.mxu1 %v1229_v55  ;;  %953 = vrot.lane.b32.xlu1 %v5067_v48, %s4424_s28 }
 0x116   : > { %1664 = vmatpush1.bf16.msra.mxu1 %v1228_v54  ;;  %v1149_v56 = vpop.permute.xlu0 %1148  ;;  %v5120_v54 = vld [vmem:[%s7436_s2 + $0x14] ss:$8 sps:$4 sm:$0xff]  }
 0x117   : > { %v1151_v57 = vpop.permute.xlu1 %1150 }
 0x118   : > { %1100 = vrot.lane.b32.xlu0 %v4971_v45, %s4425_s29  ;;  %v1242_v60 = vsel %vm1210_vm2, %v1149_v56, %v1151_v57 }
 0x119   : > { %1520 = vmatprep.subr.bf16.mxu0 %v1242_v60  ;;  %1102 = vrot.lane.b32.xlu1 %v4976_v46, %s4425_s29 }
 0x11a   : > { %v1147_v62 = vpop.permute.xlu0 %1146 }
 0x11b   : > { %v1153_v0 = vpop.permute.xlu1 %1152  ;;  %v1241_v22 = vsel %vm1210_vm2, %v1147_v62, %v1149_v56  ;;  %v5206_v62 = vld [vmem:[%s4868_s7 + $0x4] ss:$56 sps:$4 sm:$0xff]  }
 0x11c   : > { %1104 = vrot.lane.b32.xlu0 %v4986_v51, %s4425_s29  ;;  %1521 = vmatpush1.bf16.msra.mxu0 %v1241_v22  ;;  %v1243_v29 = vsel %vm1210_vm2, %v1151_v57, %v1153_v0  ;;  %v5191_v57 = vld [vmem:[%s4868_s7] ss:$56 sps:$4 sm:$0xff]  }
 0x11d   : > { %1106 = vrot.lane.b32.xlu1 %v4991_v52, %s4425_s29  ;;  %7459 = vst [vmem:[#allocation9_spill] sm:$0xff] %v5191_v57 }
 0x11e   : > { %v5088_v23 = vpop.permute.xlu0 %1154 }
 0x11f   : > { %v1181_v24 = vpop.permute.xlu1 %1180  ;;  %v1244_v28 = vsel %vm1210_vm2, %v1153_v0, %v5088_v23  ;;  %v5211_v0 = vld [vmem:[%s4754_s26 + $0xa4] ss:$56 sps:$4 sm:$0xff]  }
 0x120   : > { %1132 = vrot.lane.b32.xlu0 %v4998_v58, %s4425_s29  ;;  %1665 = vmatprep.subr.bf16.mxu1 %v1244_v28  ;;  %7460 = vst [vmem:[#allocation10_spill] sm:$0xff] %v5211_v0 }
 0x121   : > { %1666 = vmatpush1.bf16.msra.mxu1 %v1243_v29  ;;  %1134 = vrot.lane.b32.xlu1 %v5003_v59, %s4425_s29  ;;  %v5227_v29 = vld [vmem:[%s4868_s7 + $0x70] ss:$56 sps:$4 sm:$0xff]  }
 0x122   : > { %v1183_v30 = vpop.permute.xlu0 %1182  ;;  %7461 = vst [vmem:[#allocation11_spill] sm:$0xff] %v5227_v29 }
 0x123   : > { %v1179_v34 = vpop.permute.xlu1 %1178  ;;  %v1257_v35 = vsel %vm1210_vm2, %v1181_v24, %v1183_v30 }
 0x124   : > { %1136 = vrot.lane.b32.xlu0 %v5013_v1, %s4425_s29  ;;  %1522 = vmatprep.subr.bf16.mxu0 %v1257_v35  ;;  %v1256_v37 = vsel %vm1210_vm2, %v1179_v34, %v1181_v24  ;;  %v5223_v24 = vld [vmem:[%s7436_s2 + $0x30] ss:$8 sps:$4 sm:$0xff]   ;;  %v5242_v34 = vld [vmem:[%s4868_s7 + $0x74] ss:$56 sps:$4 sm:$0xff]  }
 0x125   : > { %1523 = vmatpush1.bf16.msra.mxu0 %v1256_v37  ;;  %1138 = vrot.lane.b32.xlu1 %v5018_v21, %s4425_s29  ;;  %v5252_v37 = vld [vmem:[%s4754_s26 + $0x114] ss:$56 sps:$4 sm:$0xff]  }
 0x126   : > { %v1185_v41 = vpop.permute.xlu0 %1184  ;;  %1798 = vmatprep.subr.bf16.mxu0 %v4840_v5  ;;  %7462 = vst [vmem:[#allocation12_spill] sm:$0xff] %v5252_v37 }
 0x127   : > { %v5109_v42 = vpop.permute.xlu1 %1186  ;;  %v1258_v43 = vsel %vm1210_vm2, %v1183_v30, %v1185_v41 }
 0x128   : > { %1164 = vrot.lane.b32.xlu0 %v5024_v25, %s4425_s29  ;;  %1533 = vmatmul.mubr.bf16.vlgmr.msra.gmra.mrb[0].mxu0 %v5104_v40  ;;  %v1259_v49 = vsel %vm1210_vm2, %v1185_v41, %v5109_v42 }
 0x129   : > { %1667 = vmatprep.subr.bf16.mxu1 %v1259_v49  ;;  %1799 = vmatpush1.bf16.msra.mxu0 %v4764_v53  ;;  %v5136_v53 = vld [vmem:[%s7436_s2 + $0x10] ss:$8 sps:$4 sm:$0xff]  }
 0x12a   : > { %1668 = vmatpush1.bf16.msra.mxu1 %v1258_v43  ;;  %v844_v5 = vpop.permute.xlu0 %843  ;;  %1166 = vrot.lane.b32.xlu1 %v5029_v26, %s4425_s29 }
 0x12b   : > { %v5125_v55 = vpop.permute.xlu1 %845  ;;  %1800 = vmatprep.subr.bf16.mxu0 %v4861_v9  ;;  %1951 = vmatprep.subr.bf16.mxu1 %v4850_v7  ;;  %v5153_v9 = vld [vmem:[%s7436_s2 + $0x24] ss:$8 sps:$4 sm:$0xff]  }
 0x12c   : > { %1168 = vrot.lane.b32.xlu0 %v5035_v31, %s4425_s29  ;;  %4079 = vmatprep.mubr.msk.bf16.mxu0 %vm1463_vm0, %v5120_v54 }
 0x12d   : > { %1678 = vmatmul.mubr.bf16.vlgmr.msra.gmra.mrb[0].mxu1 %v5104_v40  ;;  %1801 = vmatpush1.bf16.msra.mxu0 %v4782_v63 }
 0x12e   : > { %v5140_v56 = vpop.permute.xlu0 %847  ;;  %1952 = vmatpush1.bf16.msra.mxu1 %v4845_v6  ;;  %1170 = vrot.lane.b32.xlu1 %v5040_v32, %s4425_s29 }
 0x12f   : > { %v5145_v7 = vpop.permute.xlu1 %849  ;;  %1802 = vmatprep.subr.bf16.mxu0 %v4883_v13  ;;  %4091 = vmatprep.mubr.msk.bf16.mxu1 %vm1463_vm0, %v5120_v54  ;;  %v967_v13 = vsel %vm961_vm1, %v844_v5, %v5125_v55  ;;  %v968_v35 = vsel %vm961_vm1, %v5125_v55, %v5140_v56  ;;  %v5268_v55 = vld [vmem:[%s4868_s7 + $0xe0] ss:$56 sps:$4 sm:$0xff]  }
 0x130   : > { %1196 = vrot.lane.b32.xlu0 %v5050_v38, %s4425_s29  ;;  %1543 = vmatmul.mubr.bf16.gmra.mrb[4].mxu0 %v5136_v53  ;;  %7463 = vst [vmem:[#allocation13_spill] sm:$0xff] %v5268_v55 }
 0x131   : > { %1803 = vmatpush1.bf16.msra.mxu0 %v4794_v2  ;;  %1953 = vmatprep.subr.bf16.mxu1 %v4873_v11  ;;  %v5171_v2 = vld [vmem:[%s4754_s26 + $0x34] ss:$56 sps:$4 sm:$0xff]   ;;  %v5178_v11 = vld [vmem:[%s7436_s2 + $0x20] ss:$8 sps:$4 sm:$0xff]  }
 0x132   : > { %v876_v63 = vpop.permute.xlu0 %875  ;;  %1198 = vrot.lane.b32.xlu1 %v5055_v39, %s4425_s29  ;;  %1804 = vmatprep.subr.bf16.mxu0 %v4903_v17 }
 0x133   : > { %v5163_v6 = vpop.permute.xlu1 %877  ;;  %1954 = vmatpush1.bf16.msra.mxu1 %v4866_v10  ;;  %4080 = vmatprep.mubr.msk.bf16.mxu0 %vm1463_vm0, %v5153_v9  ;;  %v5186_v10 = vld [vmem:[%s7436_s2 + $0x34] ss:$8 sps:$4 sm:$0xff]  }
 0x134   : > { %1200 = vrot.lane.b32.xlu0 %v5062_v44, %s4425_s29  ;;  %1955 = vmatprep.subr.bf16.mxu1 %v4893_v15  ;;  %v966_v15 = vsel %vm961_vm1, %v4938_v27, %v844_v5  ;;  %v981_v27 = vsel %vm961_vm1, %v4953_v36, %v876_v63  ;;  %v5237_v36 = vld [vmem:[%s7436_s2 + $0x44] ss:$8 sps:$4 sm:$0xff]  }
 0x135   : > { %1688 = vmatmul.mubr.bf16.gmra.mrb[4].mxu1 %v5136_v53  ;;  %1805 = vmatpush1.bf16.msra.mxu0 %v4802_v3  ;;  %v982_v3 = vsel %vm961_vm1, %v876_v63, %v5163_v6  ;;  %v5276_v63 = vld [vmem:[%s7436_s2 + $0x40] ss:$8 sps:$4 sm:$0xff]  }
 0x136   : > { %v880_v17 = vpop.permute.xlu0 %879  ;;  %1202 = vrot.lane.b32.xlu1 %v5067_v48, %s4425_s29  ;;  %1806 = vmatprep.subr.bf16.mxu0 %v967_v13  ;;  %v5279_v13 = vld [vmem:[%s4868_s7 + $0xe4] ss:$56 sps:$4 sm:$0xff]  }
 0x137   : > { %v5193_v60 = vpop.permute.xlu1 %881  ;;  %4092 = vmatprep.mubr.msk.bf16.mxu1 %vm1463_vm0, %v5153_v9  ;;  %1956 = vmatpush1.bf16.msra.mxu1 %v4888_v14 }
 0x138   : > { %859 = vrot.lane.b32.xlu0 %v5171_v2, %s4424_s28  ;;  %1553 = vmatmul.mubr.bf16.gmra.mrb[8].mxu0 %v5178_v11  ;;  %v984_v43 = vsel %vm961_vm1, %v880_v17, %v5193_v60 }
 0x139   : > { %1807 = vmatpush1.bf16.msra.mxu0 %v966_v15  ;;  %4081 = vmatprep.mubr.msk.bf16.mxu0 %vm1463_vm0, %v5186_v10 }
 0x13a   : > { %v908_v22 = vpop.permute.xlu0 %907  ;;  %861 = vrot.lane.b32.xlu1 %v5191_v57, %s4424_s28  ;;  %1808 = vmatprep.subr.bf16.mxu0 %v982_v3  ;;  %v983_v3 = vsel %vm961_vm1, %v5163_v6, %v880_v17  ;;  %v5304_v17 = vld [vmem:[%s4868_s7 + $0x150] ss:$56 sps:$4 sm:$0xff]  }
 0x13b   : > { %v910_v14 = vpop.permute.xlu1 %909  ;;  %1957 = vmatprep.subr.bf16.mxu1 %v4913_v19  ;;  %v969_v19 = vsel %vm961_vm1, %v5140_v56, %v5145_v7  ;;  %v996_v41 = vsel %vm961_vm1, %v4978_v47, %v908_v22  ;;  %7465 = vst [vmem:[#allocation15_spill] sm:$0xff] %v5304_v17 }
 0x13c   : > { %863 = vrot.lane.b32.xlu0 %v5206_v62, %s4424_s28  ;;  %v997_v28 = vsel %vm961_vm1, %v908_v22, %v910_v14  ;;  %1958 = vmatpush1.bf16.msra.mxu1 %v4908_v18 }
 0x13d   : > { %1698 = vmatmul.mubr.bf16.gmra.mrb[8].mxu1 %v5178_v11  ;;  %1809 = vmatpush1.bf16.msra.mxu0 %v981_v27  ;;  %v5294_v27 = vld [vmem:[%s4754_s26 + $0x184] ss:$56 sps:$4 sm:$0xff]   ;;  %s4183_s26 = smul.u32 896, %s415_s23 }
 0x13e   : > { %v912_v30 = vpop.permute.xlu0 %911  ;;  %891 = vrot.lane.b32.xlu1 %v5211_v0, %s4424_s28  ;;  %1810 = vmatprep.subr.bf16.mxu0 %v997_v28  ;;  %7464 = vst [vmem:[#allocation14_spill] sm:$0xff] %v5294_v27 }
 0x13f   : > { %v5244_v18 = vpop.permute.xlu1 %913  ;;  %4093 = vmatprep.mubr.msk.bf16.mxu1 %vm1463_vm0, %v5186_v10  ;;  %1959 = vmatprep.subr.bf16.mxu1 %v969_v19  ;;  %v998_v28 = vsel %vm961_vm1, %v910_v14, %v912_v30  ;;  %s6210_s24 = scalar_lea.vmem [#allocation4], %s4183_s26 }
 0x140   : > { %1563 = vmatmul.mubr.bf16.gmra.mrb[12].mxu0 %v5223_v24  ;;  %893 = vrot.lane.b32.xlu0 %v5227_v29, %s4424_s28  ;;  %v999_v22 = vsel %vm961_vm1, %v912_v30, %v5244_v18  ;;  %v5322_v30 = vld [vmem:[%s7436_s2 + $0x50] ss:$8 sps:$4 sm:$0xff]  }
 0x141   : > { %1811 = vmatpush1.bf16.msra.mxu0 %v996_v41  ;;  %4082 = vmatprep.mubr.msk.bf16.mxu0 %vm1463_vm0, %v5237_v36 }
 0x142   : > { %v940_v49 = vpop.permute.xlu0 %939  ;;  %895 = vrot.lane.b32.xlu1 %v5242_v34, %s4424_s28  ;;  %1960 = vmatpush1.bf16.msra.mxu1 %v968_v35 }
 0x143   : > { %v942_v5 = vpop.permute.xlu1 %941  ;;  %v1011_v47 = vsel %vm961_vm1, %v5005_v61, %v940_v49  ;;  %1961 = vmatprep.subr.bf16.mxu1 %v984_v43  ;;  %v5287_v61 = vld [vmem:[%s7436_s2 + $0x54] ss:$8 sps:$4 sm:$0xff]  }
 0x144   : > { %v1012_v56 = vsel %vm961_vm1, %v940_v49, %v942_v5  ;;  %923 = vrot.lane.b32.xlu0 %v5252_v37, %s4424_s28  ;;  %v5316_v49 = vld [vmem:[%s4868_s7 + $0x154] ss:$56 sps:$4 sm:$0xff]  }
 0x145   : > { %1708 = vmatmul.mubr.bf16.gmra.mrb[12].mxu1 %v5223_v24  ;;  %1812 = vmatprep.subr.bf16.mxu0 %v1012_v56 }
 0x146   : > { %1813 = vmatpush1.bf16.msra.mxu0 %v1011_v47  ;;  %v944_v15 = vpop.permute.xlu0 %943  ;;  %4094 = vmatprep.mubr.msk.bf16.mxu1 %vm1463_vm0, %v5237_v36 }
 0x147   : > { %v5296_v6 = vpop.permute.xlu1 %945  ;;  %925 = vrot.lane.b32.xlu1 %v5268_v55, %s4424_s28  ;;  %1962 = vmatpush1.bf16.msra.mxu1 %v983_v3  ;;  %v1013_v47 = vsel %vm961_vm1, %v942_v5, %v944_v15 }
 0x148   : > { %1573 = vmatmul.mubr.bf16.gmra.mrb[16].mxu0 %v5276_v63  ;;  %927 = vrot.lane.b32.xlu0 %v5279_v13, %s4424_s28  ;;  %v1014_v19 = vsel %vm961_vm1, %v944_v15, %v5296_v6 }
 0x149   : > { %4083 = vmatprep.mubr.msk.bf16.mxu0 %vm1463_vm0, %v5287_v61  ;;  %1963 = vmatprep.subr.bf16.mxu1 %v999_v22 }
 0x14a   : > { %v1093_v35 = vpop.permute.xlu0 %1092 }
 0x14b   : > { %v1095_v41 = vpop.permute.xlu1 %1094  ;;  %v1215_v43 = vsel %vm1210_vm2, %v5042_v33, %v1093_v35  ;;  %955 = vrot.lane.b32.xlu1 %v5294_v27, %s4424_s28  ;;  %1964 = vmatpush1.bf16.msra.mxu1 %v998_v28  ;;  %v5331_v33 = vld [vmem:[%s7436_s2 + $0x64] ss:$8 sps:$4 sm:$0xff]  }
 0x14c   : > { %v1216_v14 = vsel %vm1210_vm2, %v1093_v35, %v1095_v41  ;;  %957 = vrot.lane.b32.xlu0 %v5304_v17, %s4424_s28  ;;  %1965 = vmatprep.subr.bf16.mxu1 %v1014_v19 }
 0x14d   : > { %1718 = vmatmul.mubr.bf16.gmra.mrb[16].mxu1 %v5276_v63  ;;  %1814 = vmatprep.subr.bf16.mxu0 %v1216_v14 }
 0x14e   : > { %1815 = vmatpush1.bf16.msra.mxu0 %v1215_v43  ;;  %v1097_v56 = vpop.permute.xlu0 %1096  ;;  %4095 = vmatprep.mubr.msk.bf16.mxu1 %vm1463_vm0, %v5287_v61  ;;  %v5355_v43 = vld [vmem:[%s7436_s2 + $0x60] ss:$8 sps:$4 sm:$0xff]  }
 0x14f   : > { %v5335_v3 = vpop.permute.xlu1 %1098  ;;  %959 = vrot.lane.b32.xlu1 %v5316_v49, %s4424_s28  ;;  %1966 = vmatpush1.bf16.msra.mxu1 %v1013_v47  ;;  %v1217_v15 = vsel %vm1210_vm2, %v1095_v41, %v1097_v56 }
 0x150   : > { %1583 = vmatmul.mubr.bf16.gmra.mrb[20].mxu0 %v5322_v30  ;;  %1108 = vrot.lane.b32.xlu0 %v5171_v2, %s4425_s29  ;;  %v1218_v5 = vsel %vm1210_vm2, %v1097_v56, %v5335_v3 }
 0x151   : > { %4084 = vmatprep.mubr.msk.bf16.mxu0 %vm1463_vm0, %v5331_v33  ;;  %1967 = vmatprep.subr.bf16.mxu1 %v1218_v5 }
 0x152   : > { %v1125_v22 = vpop.permute.xlu0 %1124 }
 0x153   : > { %v1127_v28 = vpop.permute.xlu1 %1126  ;;  %v1230_v19 = vsel %vm1210_vm2, %v5069_v50, %v1125_v22  ;;  %1110 = vrot.lane.b32.xlu1 %v5191_v57, %s4425_s29  ;;  %1968 = vmatpush1.bf16.msra.mxu1 %v1217_v15  ;;  %v5363_v50 = vld [vmem:[%s7436_s2 + $0x74] ss:$8 sps:$4 sm:$0xff]  }
 0x154   : > { %v1231_v35 = vsel %vm1210_vm2, %v1125_v22, %v1127_v28  ;;  %1112 = vrot.lane.b32.xlu0 %v5206_v62, %s4425_s29 }
 0x155   : > { %1728 = vmatmul.mubr.bf16.gmra.mrb[20].mxu1 %v5322_v30  ;;  %1816 = vmatprep.subr.bf16.mxu0 %v1231_v35 }
 0x156   : > { %1817 = vmatpush1.bf16.msra.mxu0 %v1230_v19  ;;  %v1129_v41 = vpop.permute.xlu0 %1128  ;;  %4096 = vmatprep.mubr.msk.bf16.mxu1 %vm1463_vm0, %v5331_v33 }
 0x157   : > { %v5367_v14 = vpop.permute.xlu1 %1130  ;;  %1140 = vrot.lane.b32.xlu1 %v5211_v0, %s4425_s29  ;;  %v1232_v62 = vsel %vm1210_vm2, %v1127_v28, %v1129_v41  ;;  %v5387_v28 = vld [vmem:[%s7436_s2 + $0x70] ss:$8 sps:$4 sm:$0xff]  }
 0x158   : > { %1593 = vmatmul.mubr.bf16.gmra.mrb[24].mxu0 %v5355_v43  ;;  %1142 = vrot.lane.b32.xlu0 %v5227_v29, %s4425_s29  ;;  %v1233_v47 = vsel %vm1210_vm2, %v1129_v41, %v5367_v14  ;;  %v5498_v29 = vld [vmem:[%s7436_s2 + $0xb0] ss:$8 sps:$4 sm:$0xff]  }
 0x159   : > { %4085 = vmatprep.mubr.msk.bf16.mxu0 %vm1463_vm0, %v5363_v50  ;;  %1969 = vmatprep.subr.bf16.mxu1 %v1233_v47 }
 0x15a   : > { %v1157_v56 = vpop.permute.xlu0 %1156  ;;  %1970 = vmatpush1.bf16.msra.mxu1 %v1232_v62 }
 0x15b   : > { %v1159_v5 = vpop.permute.xlu1 %1158  ;;  %v1245_v15 = vsel %vm1210_vm2, %v5088_v23, %v1157_v56  ;;  %1144 = vrot.lane.b32.xlu1 %v5242_v34, %s4425_s29  ;;  %v5395_v23 = vld [vmem:[%s7436_s2 + $0x84] ss:$8 sps:$4 sm:$0xff]  }
 0x15c   : > { %v1246_v22 = vsel %vm1210_vm2, %v1157_v56, %v1159_v5  ;;  %1172 = vrot.lane.b32.xlu0 %v5252_v37, %s4425_s29 }
 0x15d   : > { %1738 = vmatmul.mubr.bf16.gmra.mrb[24].mxu1 %v5355_v43  ;;  %1818 = vmatprep.subr.bf16.mxu0 %v1246_v22 }
 0x15e   : > { %1819 = vmatpush1.bf16.msra.mxu0 %v1245_v15  ;;  %v1161_v34 = vpop.permute.xlu0 %1160  ;;  %4097 = vmatprep.mubr.msk.bf16.mxu1 %vm1463_vm0, %v5363_v50  ;;  %v5419_v15 = vld [vmem:[%s7436_s2 + $0x80] ss:$8 sps:$4 sm:$0xff]  }
 0x15f   : > { %v5399_v19 = vpop.permute.xlu1 %1162  ;;  %1174 = vrot.lane.b32.xlu1 %v5268_v55, %s4425_s29  ;;  %v1247_v35 = vsel %vm1210_vm2, %v1159_v5, %v1161_v34 }
 0x160   : > { %1603 = vmatmul.mubr.bf16.gmra.mrb[28].mxu0 %v5387_v28  ;;  %v1248_v41 = vsel %vm1210_vm2, %v1161_v34, %v5399_v19  ;;  %1176 = vrot.lane.b32.xlu0 %v5279_v13, %s4425_s29 }
 0x161   : > { %4086 = vmatprep.mubr.msk.bf16.mxu0 %vm1463_vm0, %v5395_v23  ;;  %1971 = vmatprep.subr.bf16.mxu1 %v1248_v41 }
 0x162   : > { %v1189_v62 = vpop.permute.xlu0 %1188  ;;  %1972 = vmatpush1.bf16.msra.mxu1 %v1247_v35 }
 0x163   : > { %v1191_v47 = vpop.permute.xlu1 %1190  ;;  %v1260_v56 = vsel %vm1210_vm2, %v5109_v42, %v1189_v62  ;;  %1204 = vrot.lane.b32.xlu1 %v5294_v27, %s4425_s29  ;;  %v5427_v42 = vld [vmem:[%s7436_s2 + $0x94] ss:$8 sps:$4 sm:$0xff]  }
 0x164   : > { %v1261_v5 = vsel %vm1210_vm2, %v1189_v62, %v1191_v47  ;;  %1206 = vrot.lane.b32.xlu0 %v5304_v17, %s4425_s29 }
 0x165   : > { %1748 = vmatmul.mubr.bf16.gmra.mrb[28].mxu1 %v5387_v28  ;;  %1820 = vmatprep.subr.bf16.mxu0 %v1261_v5 }
 0x166   : > { %1821 = vmatpush1.bf16.msra.mxu0 %v1260_v56  ;;  %v1193_v13 = vpop.permute.xlu0 %1192  ;;  %4098 = vmatprep.mubr.msk.bf16.mxu1 %vm1463_vm0, %v5395_v23 }
 0x167   : > { %v5431_v22 = vpop.permute.xlu1 %1194  ;;  %v1262_v34 = vsel %vm1210_vm2, %v1191_v47, %v1193_v13  ;;  %2104 = vmatprep.subr.bf16.mxu0 %v4971_v45  ;;  %1208 = vrot.lane.b32.xlu1 %v5316_v49, %s4425_s29  ;;  %v5450_v45 = vld [vmem:[%s7436_s2 + $0x90] ss:$8 sps:$4 sm:$0xff]   ;;  %v5456_v49 = vld [vmem:[%s7436_s2 + $0xa4] ss:$8 sps:$4 sm:$0xff]  }
 0x168   : > { %1613 = vmatmul.mubr.bf16.gmra.mrb[32].mxu0 %v5419_v15  ;;  %v1263_v35 = vsel %vm1210_vm2, %v1193_v13, %v5431_v22  ;;  %v5474_v13 = vld [vmem:[%s7436_s2 + $0xa0] ss:$8 sps:$4 sm:$0xff]  }
 0x169   : > { %4087 = vmatprep.mubr.msk.bf16.mxu0 %vm1463_vm0, %v5427_v42  ;;  %1973 = vmatprep.subr.bf16.mxu1 %v1263_v35 }
 0x16a   : > { %v5442_v41 = vpop.permute.xlu0 %851  ;;  %1974 = vmatpush1.bf16.msra.mxu1 %v1262_v34  ;;  %v5480_v34 = vld [vmem:[%s7436_s2 + $0xb4] ss:$8 sps:$4 sm:$0xff]  }
 0x16b   : > { %v5444_v62 = vpop.permute.xlu1 %853  ;;  %2257 = vmatprep.subr.bf16.mxu1 %v4986_v51  ;;  %7466 = vst [vmem:[#allocation16_spill] sm:$0xff] %v5480_v34 }
 0x16d   : > { %1758 = vmatmul.mubr.bf16.gmra.mrb[32].mxu1 %v5419_v15 }
 0x16e   : > { %v5458_v47 = vpop.permute.xlu0 %855  ;;  %4099 = vmatprep.mubr.msk.bf16.mxu1 %vm1463_vm0, %v5427_v42 }
 0x16f   : > { %v5462_v56 = vpop.permute.xlu1 %857 }
 0x170   : > { %1621 = vmatmul.mubr.bf16.gmra.mrb[36].mxu0 %v5450_v45 }
 0x171   : > { %4088 = vmatprep.mubr.msk.bf16.mxu0 %vm1463_vm0, %v5456_v49 }
 0x172   : > { %v5467_v51 = vpop.permute.xlu0 %883 }
 0x173   : > { %v5469_v5 = vpop.permute.xlu1 %885 }
 0x175   : > { %1768 = vmatmul.mubr.bf16.gmra.mrb[36].mxu1 %v5450_v45 }
 0x176   : > { %v5482_v35 = vpop.permute.xlu0 %887  ;;  %4100 = vmatprep.mubr.msk.bf16.mxu1 %vm1463_vm0, %v5456_v49 }
 0x177   : > { %v5486_v17 = vpop.permute.xlu1 %889 }
 0x178   : > { %1629 = vmatmul.mubr.bf16.gmra.mrb[40].mxu0 %v5474_v13 }
 0x179   : > { %4089 = vmatprep.mubr.msk.bf16.mxu0 %vm1463_vm0, %v5480_v34 }
 0x17a   : > { %v5491_v55 = vpop.permute.xlu0 %915 }
 0x17b   : > { %v5493_v48 = vpop.permute.xlu1 %917 }
 0x17d   : > { %1778 = vmatmul.mubr.bf16.gmra.mrb[40].mxu1 %v5474_v13 }
 0x17e   : > { %v5501_v27 = vpop.permute.xlu0 %919  ;;  %4101 = vmatprep.mubr.msk.bf16.mxu1 %vm1463_vm0, %v5480_v34 }
 0x17f   : > { %v5505_v32 = vpop.permute.xlu1 %921 }
 0x180   : > { %1637 = vmatmul.mubr.bf16.gmra.mrb[44].mxu0 %v5498_v29 }
 0x181   : > { %4102 = vmatprep.mubr.msk.bf16.mxu0 %vm1463_vm0, %v4825_v4 }
 0x182   : > { %v5510_v37 = vpop.permute.xlu0 %947 }
 0x183   : > { %v5512_v57 = vpop.permute.xlu1 %949 }
 0x185   : > { %1788 = vmatmul.mubr.bf16.gmra.mrb[44].mxu1 %v5498_v29 }
 0x186   : > { %v5515_v21 = vpop.permute.xlu0 %951  ;;  %4114 = vmatprep.mubr.msk.bf16.mxu1 %vm1463_vm0, %v4825_v4 }
 0x187   : > { %v5519_v0 = vpop.permute.xlu1 %953 }
 0x188   : > { %1831 = vmatmul.mubr.bf16.vlgmr.msra.gmra.mrb[48].mxu0 %v5104_v40 }
 0x189   : > { %2105 = vmatpush1.bf16.msra.mxu0 %v4855_v8  ;;  %4103 = vmatprep.mubr.msk.bf16.mxu0 %vm1463_vm0, %v5120_v54 }
 0x18a   : > { %v5525_v52 = vpop.permute.xlu0 %1100  ;;  %2106 = vmatprep.subr.bf16.mxu0 %v4998_v58 }
 0x18b   : > { %v5528_v34 = vpop.permute.xlu1 %1102 }
 0x18d   : > { %1984 = vmatmul.mubr.bf16.vlgmr.msra.gmra.mrb[48].mxu1 %v5104_v40  ;;  %2107 = vmatpush1.bf16.msra.mxu0 %v4876_v12  ;;  %v971_v12 = vsel %vm961_vm1, %v5442_v41, %v5444_v62 }
 0x18e   : > { %2258 = vmatpush1.bf16.msra.mxu1 %v4976_v46  ;;  %2108 = vmatprep.subr.bf16.mxu0 %v5024_v25  ;;  %v5537_v4 = vpop.permute.xlu0 %1104 }
 0x18f   : > { %4115 = vmatprep.mubr.msk.bf16.mxu1 %vm1463_vm0, %v5120_v54  ;;  %2259 = vmatprep.subr.bf16.mxu1 %v5013_v1  ;;  %v5540_v8 = vpop.permute.xlu1 %1106  ;;  %v1001_v1 = vsel %vm961_vm1, %v5491_v55, %v5493_v48 }
 0x190   : > { %1841 = vmatmul.mubr.bf16.gmra.mrb[52].mxu0 %v5136_v53 }
 0x191   : > { %2109 = vmatpush1.bf16.msra.mxu0 %v4898_v16  ;;  %4104 = vmatprep.mubr.msk.bf16.mxu0 %vm1463_vm0, %v5153_v9  ;;  %v986_v16 = vsel %vm961_vm1, %v5467_v51, %v5469_v5 }
 0x192   : > { %2110 = vmatprep.subr.bf16.mxu0 %v5050_v38  ;;  %2260 = vmatpush1.bf16.msra.mxu1 %v5003_v59  ;;  %v1133_v46 = vpop.permute.xlu0 %1132  ;;  %v970_v59 = vsel %vm961_vm1, %v5145_v7, %v5442_v41  ;;  %v972_v38 = vsel %vm961_vm1, %v5444_v62, %v5458_v47  ;;  %v1000_v7 = vsel %vm961_vm1, %v5244_v18, %v5491_v55 }
 0x193   : > { %2261 = vmatprep.subr.bf16.mxu1 %v5035_v31  ;;  %v5553_v58 = vpop.permute.xlu1 %1134  ;;  %v985_v31 = vsel %vm961_vm1, %v5193_v60, %v5467_v51  ;;  %v987_v60 = vsel %vm961_vm1, %v5469_v5, %v5482_v35  ;;  %v1003_v41 = vsel %vm961_vm1, %v5501_v27, %v5505_v32  ;;  %v1220_v18 = vsel %vm1210_vm2, %v5525_v52, %v5528_v34 }
 0x194   : > { %v1015_v55 = vsel %vm961_vm1, %v5296_v6, %v5510_v37  ;;  %v1002_v51 = vsel %vm961_vm1, %v5493_v48, %v5501_v27  ;;  %v1018_v5 = vsel %vm961_vm1, %v5515_v21, %v5519_v0  ;;  %v1219_v48 = vsel %vm1210_vm2, %v5335_v3, %v5525_v52 }
 0x195   : > { %1994 = vmatmul.mubr.bf16.gmra.mrb[52].mxu1 %v5136_v53  ;;  %2111 = vmatpush1.bf16.msra.mxu0 %v4918_v20  ;;  %v973_v20 = vsel %vm961_vm1, %v5458_v47, %v5462_v56  ;;  %v1017_v27 = vsel %vm961_vm1, %v5512_v57, %v5515_v21  ;;  %v1234_v52 = vsel %vm1210_vm2, %v5367_v14, %v1133_v46 }
 0x196   : > { %2112 = vmatprep.subr.bf16.mxu0 %v971_v12  ;;  %4116 = vmatprep.mubr.msk.bf16.mxu1 %vm1463_vm0, %v5153_v9  ;;  %v1137_v25 = vpop.permute.xlu0 %1136  ;;  %v1222_v12 = vsel %vm1210_vm2, %v5537_v4, %v5540_v8  ;;  %v1221_v21 = vsel %vm1210_vm2, %v5528_v34, %v5537_v4 }
 0x197   : > { %2262 = vmatpush1.bf16.msra.mxu1 %v5029_v26  ;;  %v5575_v26 = vpop.permute.xlu1 %1138  ;;  %v1236_v34 = vsel %vm1210_vm2, %v5553_v58, %v1137_v25 }
 0x198   : > { %1851 = vmatmul.mubr.bf16.gmra.mrb[56].mxu0 %v5178_v11  ;;  %2263 = vmatprep.subr.bf16.mxu1 %v5062_v44  ;;  %v988_v44 = vsel %vm961_vm1, %v5482_v35, %v5486_v17  ;;  %v1235_v35 = vsel %vm1210_vm2, %v1133_v46, %v5553_v58 }
 0x199   : > { %2113 = vmatpush1.bf16.msra.mxu0 %v970_v59  ;;  %4105 = vmatprep.mubr.msk.bf16.mxu0 %vm1463_vm0, %v5186_v10 }
 0x19a   : > { %2114 = vmatprep.subr.bf16.mxu0 %v986_v16  ;;  %v1165_v62 = vpop.permute.xlu0 %1164 }
 0x19b   : > { %2264 = vmatpush1.bf16.msra.mxu1 %v5055_v39  ;;  %v1016_v39 = vsel %vm961_vm1, %v5510_v37, %v5512_v57  ;;  %v1237_v57 = vsel %vm1210_vm2, %v1137_v25, %v5575_v26  ;;  %v1249_v14 = vsel %vm1210_vm2, %v5399_v19, %v1165_v62  ;;  %v4426_v25 = vmov 0  }
 0x19c   : > { %2265 = vmatprep.subr.bf16.mxu1 %v973_v20  ;;  %v1167_v47 = vpop.permute.xlu1 %1166 }
 0x19d   : > { %2004 = vmatmul.mubr.bf16.gmra.mrb[56].mxu1 %v5178_v11  ;;  %2115 = vmatpush1.bf16.msra.mxu0 %v985_v31  ;;  %v1250_v16 = vsel %vm1210_vm2, %v1165_v62, %v1167_v47  ;;  %v5705_v62 = vld [vmem:[%s7436_s2 + $0x4] ss:$8 sps:$4 sm:$0xff]  }
 0x19e   : > { %2116 = vmatprep.subr.bf16.mxu0 %v1001_v1  ;;  %4117 = vmatprep.mubr.msk.bf16.mxu1 %vm1463_vm0, %v5186_v10  ;;  %v1169_v37 = vpop.permute.xlu0 %1168 }
 0x19f   : > { %2266 = vmatpush1.bf16.msra.mxu1 %v972_v38  ;;  %v1251_v19 = vsel %vm1210_vm2, %v1167_v47, %v1169_v37 }
 0x1a0   : > { %1861 = vmatmul.mubr.bf16.gmra.mrb[60].mxu0 %v5223_v24  ;;  %2267 = vmatprep.subr.bf16.mxu1 %v988_v44  ;;  %v5621_v6 = vpop.permute.xlu1 %1170 }
 0x1a1   : > { %2117 = vmatpush1.bf16.msra.mxu0 %v1000_v7  ;;  %4106 = vmatprep.mubr.msk.bf16.mxu0 %vm1463_vm0, %v5237_v36  ;;  %v1252_v4 = vsel %vm1210_vm2, %v1169_v37, %v5621_v6 }
 0x1a2   : > { %2118 = vmatprep.subr.bf16.mxu0 %v1016_v39  ;;  %v1197_v3 = vpop.permute.xlu0 %1196  ;;  %v7467_v39 = vld [vmem:[#allocation16_spill] sm:$0xff] }
 0x1a3   : > { %2268 = vmatpush1.bf16.msra.mxu1 %v987_v60  ;;  %v1264_v31 = vsel %vm1210_vm2, %v5431_v22, %v1197_v3 }
 0x1a4   : > { %2269 = vmatprep.subr.bf16.mxu1 %v1003_v41  ;;  %v1199_v59 = vpop.permute.xlu1 %1198 }
 0x1a5   : > { %2014 = vmatmul.mubr.bf16.gmra.mrb[60].mxu1 %v5223_v24  ;;  %2119 = vmatpush1.bf16.msra.mxu0 %v1015_v55  ;;  %v1265_v20 = vsel %vm1210_vm2, %v1197_v3, %v1199_v59 }
 0x1a6   : > { %2120 = vmatprep.subr.bf16.mxu0 %v1220_v18  ;;  %4118 = vmatprep.mubr.msk.bf16.mxu1 %vm1463_vm0, %v5237_v36  ;;  %v1201_v46 = vpop.permute.xlu0 %1200 }
 0x1a7   : > { %2270 = vmatpush1.bf16.msra.mxu1 %v1002_v51  ;;  %v1266_v22 = vsel %vm1210_vm2, %v1199_v59, %v1201_v46  ;;  %v7468_v51 = vld [vmem:[#allocation5_spill] sm:$0xff] }
 0x1a8   : > { %1871 = vmatmul.mubr.bf16.gmra.mrb[64].mxu0 %v5276_v63  ;;  %2271 = vmatprep.subr.bf16.mxu1 %v1018_v5  ;;  %v5656_v1 = vpop.permute.xlu1 %1202  ;;  %v7469_v5 = vld [vmem:[#allocation10_spill] sm:$0xff] }
 0x1a9   : > { %2121 = vmatpush1.bf16.msra.mxu0 %v1219_v48  ;;  %4107 = vmatprep.mubr.msk.bf16.mxu0 %vm1463_vm0, %v5287_v61  ;;  %v1267_v58 = vsel %vm1210_vm2, %v1201_v46, %v5656_v1  ;;  %v7470_v48 = vld [vmem:[#allocation6_spill] sm:$0xff]  ;;  %v7478_v46 = vld [vmem:[#allocation15_spill] sm:$0xff] }
 0x1aa   : > { %2122 = vmatprep.subr.bf16.mxu0 %v1235_v35 }
 0x1ab   : > { %2272 = vmatpush1.bf16.msra.mxu1 %v1017_v27  ;;  %v7471_v27 = vld [vmem:[#allocation9_spill] sm:$0xff] }
 0x1ac   : > { %2273 = vmatprep.subr.bf16.mxu1 %v1222_v12  ;;  %v862_v44 = vpop.permute.xlu1 %861  ;;  %v7472_v12 = vld [vmem:[#allocation12_spill] sm:$0xff] }
 0x1ad   : > { %2024 = vmatmul.mubr.bf16.gmra.mrb[64].mxu1 %v5276_v63  ;;  %2123 = vmatpush1.bf16.msra.mxu0 %v1234_v52  ;;  %v7473_v52 = vld [vmem:[#allocation7_spill] sm:$0xff] }
 0x1ae   : > { %2124 = vmatprep.subr.bf16.mxu0 %v1250_v16  ;;  %4119 = vmatprep.mubr.msk.bf16.mxu1 %vm1463_vm0, %v5287_v61 }
 0x1af   : > { %2274 = vmatpush1.bf16.msra.mxu1 %v1221_v21  ;;  %v7474_v21 = vld [vmem:[#allocation14_spill] sm:$0xff] }
 0x1b0   : > { %1881 = vmatmul.mubr.bf16.gmra.mrb[68].mxu0 %v5322_v30  ;;  %2275 = vmatprep.subr.bf16.mxu1 %v1237_v57  ;;  %v892_v60 = vpop.permute.xlu1 %891  ;;  %v7475_v57 = vld [vmem:[#allocation11_spill] sm:$0xff] }
 0x1b1   : > { %2125 = vmatpush1.bf16.msra.mxu0 %v1249_v14  ;;  %4108 = vmatprep.mubr.msk.bf16.mxu0 %vm1463_vm0, %v5331_v33 }
 0x1b2   : > { %2126 = vmatprep.subr.bf16.mxu0 %v1265_v20 }
 0x1b3   : > { %2276 = vmatpush1.bf16.msra.mxu1 %v1236_v34  ;;  %v7477_v34 = vld [vmem:[#allocation13_spill] sm:$0xff] }
 0x1b4   : > { %2277 = vmatprep.subr.bf16.mxu1 %v1252_v4  ;;  %v896_v41 = vpop.permute.xlu1 %895 }
 0x1b5   : > { %2034 = vmatmul.mubr.bf16.gmra.mrb[68].mxu1 %v5322_v30  ;;  %2127 = vmatpush1.bf16.msra.mxu0 %v1264_v31 }
 0x1b6   : > { %4120 = vmatprep.mubr.msk.bf16.mxu1 %vm1463_vm0, %v5331_v33  ;;  %2410 = vmatprep.subr.bf16.mxu0 %v5171_v2  ;;  %v860_v2 = vpop.permute.xlu0 %859 }
 0x1b7   : > { %2278 = vmatpush1.bf16.msra.mxu1 %v1251_v19  ;;  %v975_v3 = vsel %vm961_vm1, %v860_v2, %v862_v44 }
 0x1b8   : > { %1891 = vmatmul.mubr.bf16.gmra.mrb[72].mxu0 %v5355_v43  ;;  %2279 = vmatprep.subr.bf16.mxu1 %v1267_v58 }
 0x1b9   : > { %4109 = vmatprep.mubr.msk.bf16.mxu0 %vm1463_vm0, %v5363_v50  ;;  %v5714_v55 = vpop.permute.xlu1 %925 }
 0x1ba   : > { %v864_v38 = vpop.permute.xlu0 %863 }
 0x1bb   : > { %2280 = vmatpush1.bf16.msra.mxu1 %v1266_v22  ;;  %v976_v31 = vsel %vm961_vm1, %v862_v44, %v864_v38 }
 0x1bc   : > { %2563 = vmatprep.subr.bf16.mxu1 %v4426_v25 }
 0x1bd   : > { %2044 = vmatmul.mubr.bf16.gmra.mrb[72].mxu1 %v5355_v43  ;;  %v5723_v37 = vpop.permute.xlu1 %955 }
 0x1be   : > { %4121 = vmatprep.mubr.msk.bf16.mxu1 %vm1463_vm0, %v5363_v50  ;;  %v5696_v7 = vpop.permute.xlu0 %893 }
 0x1bf   : > { %v990_v14 = vsel %vm961_vm1, %v892_v60, %v5696_v7 }
 0x1c0   : > { %1901 = vmatmul.mubr.bf16.gmra.mrb[76].mxu0 %v5387_v28 }
 0x1c1   : > { %4110 = vmatprep.mubr.msk.bf16.mxu0 %vm1463_vm0, %v5395_v23  ;;  %v5733_v16 = vpop.permute.xlu1 %959 }
 0x1c2   : > { %v924_v47 = vpop.permute.xlu0 %923 }
 0x1c3   : > { %v1005_v4 = vsel %vm961_vm1, %v924_v47, %v5714_v55 }
 0x1c5   : > { %2054 = vmatmul.mubr.bf16.gmra.mrb[76].mxu1 %v5387_v28  ;;  %v5750_v20 = vpop.permute.xlu1 %1110 }
 0x1c6   : > { %4122 = vmatprep.mubr.msk.bf16.mxu1 %vm1463_vm0, %v5395_v23  ;;  %v5710_v18 = vpop.permute.xlu0 %927 }
 0x1c8   : > { %1911 = vmatmul.mubr.bf16.gmra.mrb[80].mxu0 %v5419_v15 }
 0x1c9   : > { %4111 = vmatprep.mubr.msk.bf16.mxu0 %vm1463_vm0, %v5427_v42  ;;  %v1141_v22 = vpop.permute.xlu1 %1140 }
 0x1ca   : > { %v5721_v35 = vpop.permute.xlu0 %957 }
 0x1cb   : > { %v1020_v38 = vsel %vm961_vm1, %v5723_v37, %v5721_v35 }
 0x1cd   : > { %2064 = vmatmul.mubr.bf16.gmra.mrb[80].mxu1 %v5419_v15 }
 0x1ce   : > { %4123 = vmatprep.mubr.msk.bf16.mxu1 %vm1463_vm0, %v5427_v42 }
 0x1d0   : > { %1921 = vmatmul.mubr.bf16.gmra.mrb[84].mxu0 %v5450_v45 }
 0x1d1   : > { %4112 = vmatprep.mubr.msk.bf16.mxu0 %vm1463_vm0, %v5456_v49 }
 0x1d5   : > { %2074 = vmatmul.mubr.bf16.gmra.mrb[84].mxu1 %v5450_v45 }
 0x1d6   : > { %4124 = vmatprep.mubr.msk.bf16.mxu1 %vm1463_vm0, %v5456_v49 }
 0x1d8   : > { %1931 = vmatmul.mubr.bf16.gmra.mrb[88].mxu0 %v5474_v13 }
 0x1d9   : > { %4113 = vmatprep.mubr.msk.bf16.mxu0 %vm1463_vm0, %v7467_v39 }
 0x1dd   : > { %2084 = vmatmul.mubr.bf16.gmra.mrb[88].mxu1 %v5474_v13 }
 0x1de   : > { %4125 = vmatprep.mubr.msk.bf16.mxu1 %vm1463_vm0, %v7467_v39 }
 0x1e0   : > { %1941 = vmatmul.mubr.bf16.gmra.mrb[92].mxu0 %v5498_v29 }
 0x1e1   : > { %4126 = vmatprep.mubr.msk.bf16.mxu0 %vm1463_vm0, %v5705_v62 }
 0x1e5   : > { %2094 = vmatmul.mubr.bf16.gmra.mrb[92].mxu1 %v5498_v29 }
 0x1e6   : > { %4138 = vmatprep.mubr.msk.bf16.mxu1 %vm1463_vm0, %v5705_v62 }
 0x1e8   : > { %2137 = vmatmul.mubr.bf16.vlgmr.msra.gmra.mrb[96].mxu0 %v5104_v40 }
 0x1e9   : > { %2411 = vmatpush1.bf16.msra.mxu0 %v7468_v51  ;;  %4127 = vmatprep.mubr.msk.bf16.mxu0 %vm1463_vm0, %v5120_v54 }
 0x1ea   : > { %2412 = vmatprep.subr.bf16.mxu0 %v7469_v5 }
 0x1ed   : > { %2290 = vmatmul.mubr.bf16.vlgmr.msra.gmra.mrb[96].mxu1 %v5104_v40  ;;  %2413 = vmatpush1.bf16.msra.mxu0 %v7470_v48  ;;  %v5738_v40 = vpop.permute.xlu0 %1108 }
 0x1ee   : > { %2564 = vmatpush1.bf16.msra.mxu1 %v7471_v27  ;;  %2414 = vmatprep.subr.bf16.mxu0 %v7472_v12  ;;  %v1019_v12 = vsel %vm961_vm1, %v5519_v0, %v5723_v37  ;;  %v1021_v0 = vsel %vm961_vm1, %v5721_v35, %v5733_v16 }
 0x1ef   : > { %4139 = vmatprep.mubr.msk.bf16.mxu1 %vm1463_vm0, %v5120_v54  ;;  %2565 = vmatprep.subr.bf16.mxu1 %v4426_v25  ;;  %v7476_v54 = vld [vmem:[#allocation8_spill] sm:$0xff] }
 0x1f0   : > { %2147 = vmatmul.mubr.bf16.gmra.mrb[100].mxu0 %v5136_v53 }
 0x1f1   : > { %2415 = vmatpush1.bf16.msra.mxu0 %v7473_v52  ;;  %4128 = vmatprep.mubr.msk.bf16.mxu0 %vm1463_vm0, %v5153_v9  ;;  %v5746_v59 = vpop.permute.xlu0 %1112 }
 0x1f2   : > { %2416 = vmatprep.subr.bf16.mxu0 %v7474_v21  ;;  %2566 = vmatpush1.bf16.msra.mxu1 %v7475_v57  ;;  %v1223_v57 = vsel %vm1210_vm2, %v5540_v8, %v5738_v40  ;;  %v1225_v8 = vsel %vm1210_vm2, %v5750_v20, %v5746_v59 }
 0x1f3   : > { %2567 = vmatprep.subr.bf16.mxu1 %v4426_v25 }
 0x1f5   : > { %2300 = vmatmul.mubr.bf16.gmra.mrb[100].mxu1 %v5136_v53  ;;  %2417 = vmatpush1.bf16.msra.mxu0 %v7476_v54  ;;  %v974_v53 = vsel %vm961_vm1, %v5462_v56, %v860_v2  ;;  %v5767_v19 = vpop.permute.xlu0 %1142  ;;  %v989_v56 = vsel %vm961_vm1, %v5486_v17, %v892_v60  ;;  %v991_v17 = vsel %vm961_vm1, %v5696_v7, %v896_v41  ;;  %v1145_v60 = vpop.permute.xlu1 %1144 }
 0x1f6   : > { %2418 = vmatprep.subr.bf16.mxu0 %v975_v3  ;;  %4140 = vmatprep.mubr.msk.bf16.mxu1 %vm1463_vm0, %v5153_v9 }
 0x1f7   : > { %2568 = vmatpush1.bf16.msra.mxu1 %v7477_v34 }
 0x1f8   : > { %2157 = vmatmul.mubr.bf16.gmra.mrb[104].mxu0 %v5178_v11  ;;  %2569 = vmatprep.subr.bf16.mxu1 %v4426_v25 }
 0x1f9   : > { %2419 = vmatpush1.bf16.msra.mxu0 %v974_v53  ;;  %4129 = vmatprep.mubr.msk.bf16.mxu0 %vm1463_vm0, %v5186_v10  ;;  %v1175_v37 = vpop.permute.xlu1 %1174 }
 0x1fa   : > { %2420 = vmatprep.subr.bf16.mxu0 %v990_v14  ;;  %v1238_v14 = vsel %vm1210_vm2, %v5575_v26, %v1141_v22  ;;  %v1240_v26 = vsel %vm1210_vm2, %v5767_v19, %v1145_v60 }
 0x1fb   : > { %v5761_v9 = vpop.f32.mrb[0].mxu0  ;;  %2570 = vmatpush1.bf16.msra.mxu1 %v7478_v46 }
 0x1fc   : > { %v5769_v58 = vpop.f32.mrb[1].mxu0  ;;  %2571 = vmatprep.subr.bf16.mxu1 %v4426_v25 }
 0x1fd   : > { %2310 = vmatmul.mubr.bf16.gmra.mrb[104].mxu1 %v5178_v11  ;;  %2421 = vmatpush1.bf16.msra.mxu0 %v989_v56  ;;  %v5775_v2 = vpop.f32.mrb[2].mxu0  ;;  %v1004_v11 = vsel %vm961_vm1, %v5505_v32, %v924_v47  ;;  %v1224_v32 = vsel %vm1210_vm2, %v5738_v40, %v5750_v20  ;;  %v1006_v47 = vsel %vm961_vm1, %v5714_v55, %v5710_v18 }
 0x1fe   : > { %v5777_v51 = vpop.f32.mrb[3].mxu0  ;;  %2422 = vmatprep.subr.bf16.mxu0 %v1005_v4  ;;  %4141 = vmatprep.mubr.msk.bf16.mxu1 %vm1463_vm0, %v5186_v10  ;;  %v1173_v10 = vpop.permute.xlu0 %1172  ;;  %v1239_v55 = vsel %vm1210_vm2, %v1141_v22, %v5767_v19 }
 0x1ff   : > { %2572 = vmatpush1.bf16.msra.mxu1 %v976_v31  ;;  %v1254_v54 = vsel %vm1210_vm2, %v1173_v10, %v1175_v37  ;;  %v1205_v4 = vpop.permute.xlu1 %1204 }
 0x200   : > { %v5786_v44 = vpop.f32.mrb[0].mxu1  ;;  %2167 = vmatmul.mubr.bf16.gmra.mrb[108].mxu0 %v5223_v24  ;;  %2573 = vmatprep.subr.bf16.mxu1 %v4426_v25 }
 0x201   : > { %v5792_v5 = vpop.f32.mrb[1].mxu1  ;;  %2423 = vmatpush1.bf16.msra.mxu0 %v1004_v11  ;;  %4130 = vmatprep.mubr.msk.bf16.mxu0 %vm1463_vm0, %v5237_v36 }
 0x202   : > { %7479 = vst [vmem:[#allocation16_spill] sm:$0xff] %v5792_v5  ;;  %v5796_v48 = vpop.f32.mrb[2].mxu1  ;;  %2424 = vmatprep.subr.bf16.mxu0 %v1020_v38  ;;  %v1177_v18 = vpop.permute.xlu0 %1176 }
 0x203   : > { %v5798_v7 = vpop.f32.mrb[3].mxu1  ;;  %v5800_v41 = vpop.f32.mrb[4].mxu0  ;;  %2574 = vmatpush1.bf16.msra.mxu1 %v991_v17  ;;  %v1255_v22 = vsel %vm1210_vm2, %v1175_v37, %v1177_v18 }
 0x204   : > { %7480 = vst [vmem:[#allocation5_spill] sm:$0xff] %v5798_v7  ;;  %v5808_v27 = vpop.f32.mrb[5].mxu0  ;;  %2575 = vmatprep.subr.bf16.mxu1 %v4426_v25  ;;  %v1209_v11 = vpop.permute.xlu1 %1208 }
 0x205   : > { %2320 = vmatmul.mubr.bf16.gmra.mrb[108].mxu1 %v5223_v24  ;;  %2425 = vmatpush1.bf16.msra.mxu0 %v1019_v12  ;;  %v5815_v52 = vpop.f32.mrb[6].mxu0 }
 0x206   : > { %v5817_v21 = vpop.f32.mrb[7].mxu0  ;;  %2426 = vmatprep.subr.bf16.mxu0 %v1224_v32  ;;  %4142 = vmatprep.mubr.msk.bf16.mxu1 %vm1463_vm0, %v5237_v36  ;;  %v1207_v34 = vpop.permute.xlu0 %1206 }
 0x207   : > { %2576 = vmatpush1.bf16.msra.mxu1 %v1006_v47  ;;  %v1269_v59 = vsel %vm1210_vm2, %v1205_v4, %v1207_v34 }
 0x208   : > { %v5826_v24 = vpop.f32.mrb[4].mxu1  ;;  %2177 = vmatmul.mubr.bf16.gmra.mrb[112].mxu0 %v5276_v63  ;;  %2577 = vmatprep.subr.bf16.mxu1 %v4426_v25 }
 0x209   : > { %v5833_v36 = vpop.f32.mrb[5].mxu1  ;;  %2427 = vmatpush1.bf16.msra.mxu0 %v1223_v57  ;;  %4131 = vmatprep.mubr.msk.bf16.mxu0 %vm1463_vm0, %v5287_v61 }
 0x20a   : > { %7481 = vst [vmem:[#allocation10_spill] sm:$0xff] %v5833_v36  ;;  %v5837_v3 = vpop.f32.mrb[6].mxu1  ;;  %2428 = vmatprep.subr.bf16.mxu0 %v1239_v55 }
 0x20b   : > { %v5839_v35 = vpop.f32.mrb[7].mxu1  ;;  %v5841_v16 = vpop.f32.mrb[8].mxu0  ;;  %2578 = vmatpush1.bf16.msra.mxu1 %v1021_v0 }
 0x20c   : > { %7482 = vst [vmem:[#allocation6_spill] sm:$0xff] %v5839_v35  ;;  %v5847_v40 = vpop.f32.mrb[9].mxu0  ;;  %2579 = vmatprep.subr.bf16.mxu1 %v4426_v25 }
 0x20d   : > { %2330 = vmatmul.mubr.bf16.gmra.mrb[112].mxu1 %v5276_v63  ;;  %2429 = vmatpush1.bf16.msra.mxu0 %v1238_v14  ;;  %v5853_v53 = vpop.f32.mrb[10].mxu0  ;;  %v1253_v63 = vsel %vm1210_vm2, %v5621_v6, %v1173_v10  ;;  %v1268_v6 = vsel %vm1210_vm2, %v5656_v1, %v1205_v4  ;;  %v1270_v1 = vsel %vm1210_vm2, %v1207_v34, %v1209_v11 }
 0x20e   : > { %v5855_v46 = vpop.f32.mrb[11].mxu0  ;;  %2430 = vmatprep.subr.bf16.mxu0 %v1254_v54  ;;  %4143 = vmatprep.mubr.msk.bf16.mxu1 %vm1463_vm0, %v5287_v61 }
 0x20f   : > { %2580 = vmatpush1.bf16.msra.mxu1 %v1225_v8 }
 0x210   : > { %v5862_v20 = vpop.f32.mrb[8].mxu1  ;;  %2187 = vmatmul.mubr.bf16.gmra.mrb[116].mxu0 %v5322_v30  ;;  %2581 = vmatprep.subr.bf16.mxu1 %v4426_v25 }
 0x211   : > { %v5868_v31 = vpop.f32.mrb[9].mxu1  ;;  %2431 = vmatpush1.bf16.msra.mxu0 %v1253_v63  ;;  %4132 = vmatprep.mubr.msk.bf16.mxu0 %vm1463_vm0, %v5331_v33 }
 0x212   : > { %7483 = vst [vmem:[#allocation9_spill] sm:$0xff] %v5868_v31  ;;  %v5872_v61 = vpop.f32.mrb[10].mxu1  ;;  %2432 = vmatprep.subr.bf16.mxu0 %v1269_v59 }
 0x213   : > { %v5874_v56 = vpop.f32.mrb[11].mxu1  ;;  %v5876_v19 = vpop.f32.mrb[12].mxu0  ;;  %2582 = vmatpush1.bf16.msra.mxu1 %v1240_v26 }
 0x214   : > { %7484 = vst [vmem:[#allocation12_spill] sm:$0xff] %v5874_v56  ;;  %v5879_v38 = vpop.f32.mrb[13].mxu0  ;;  %2583 = vmatprep.subr.bf16.mxu1 %v4426_v25 }
 0x215   : > { %2340 = vmatmul.mubr.bf16.gmra.mrb[116].mxu1 %v5322_v30  ;;  %2433 = vmatpush1.bf16.msra.mxu0 %v1268_v6  ;;  %v5885_v17 = vpop.f32.mrb[14].mxu0 }
 0x216   : > { %7485 = vst [vmem:[#allocation7_spill] sm:$0xff] %v5885_v17  ;;  %v5887_v60 = vpop.f32.mrb[15].mxu0  ;;  %4144 = vmatprep.mubr.msk.bf16.mxu1 %vm1463_vm0, %v5331_v33 }
 0x217   : > { %7486 = vst [vmem:[#allocation14_spill] sm:$0xff] %v5887_v60  ;;  %2584 = vmatpush1.bf16.msra.mxu1 %v1255_v22 }
 0x218   : > { %v5891_v10 = vpop.f32.mrb[12].mxu1  ;;  %2197 = vmatmul.mubr.bf16.gmra.mrb[120].mxu0 %v5355_v43  ;;  %2585 = vmatprep.subr.bf16.mxu1 %v4426_v25 }
 0x219   : > { %v5896_v32 = vpop.f32.mrb[13].mxu1  ;;  %4133 = vmatprep.mubr.msk.bf16.mxu0 %vm1463_vm0, %v5363_v50 }
 0x21a   : > { %7487 = vst [vmem:[#allocation11_spill] sm:$0xff] %v5896_v32  ;;  %v5900_v30 = vpop.f32.mrb[14].mxu1  ;;  %v4368_v32 = vld [vmem:[%s7436_s2 + $0x44] ss:$8 sps:$4 sm:$0xff]  }
 0x21b   : > { %7488 = vst [vmem:[#allocation8_spill] sm:$0xff] %v5900_v30  ;;  %v5902_v47 = vpop.f32.mrb[15].mxu1  ;;  %v1574_v12 = vpop.f32.mrb[16].mxu0  ;;  %2586 = vmatpush1.bf16.msra.mxu1 %v1270_v1 }
 0x21c   : > { %7489 = vst [vmem:[#allocation13_spill] sm:$0xff] %v5902_v47  ;;  %2804 = vrot.lane.b32.xlu0 %v1574_v12, %s4427_s9  ;;  %v1576_v33 = vpop.f32.mrb[17].mxu0  ;;  %v4367_v47 = vld [vmem:[%s7436_s2 + $0x30] ss:$8 sps:$4 sm:$0xff]  }
 0x21d   : > { %2350 = vmatmul.mubr.bf16.gmra.mrb[120].mxu1 %v5355_v43  ;;  %2806 = vrot.lane.b32.xlu1 %v1576_v33, %s4427_s9  ;;  %v1578_v25 = vpop.f32.mrb[18].mxu0 }
 0x21e   : > { %v1580_v18 = vpop.f32.mrb[19].mxu0  ;;  %4145 = vmatprep.mubr.msk.bf16.mxu1 %vm1463_vm0, %v5363_v50 }
 0x220   : > { %v1719_v55 = vpop.f32.mrb[16].mxu1  ;;  %2207 = vmatmul.mubr.bf16.gmra.mrb[124].mxu0 %v5387_v28 }
 0x221   : > { %v1721_v0 = vpop.f32.mrb[17].mxu1  ;;  %2808 = vrot.lane.b32.xlu0 %v1719_v55, %s4427_s9  ;;  %4134 = vmatprep.mubr.msk.bf16.mxu0 %vm1463_vm0, %v5395_v23 }
 0x222   : > { %v1723_v37 = vpop.f32.mrb[18].mxu1  ;;  %2810 = vrot.lane.b32.xlu1 %v1721_v0, %s4427_s9 }
 0x223   : > { %v1725_v43 = vpop.f32.mrb[19].mxu1  ;;  %v1584_v57 = vpop.f32.mrb[20].mxu0 }
 0x224   : > { %v1586_v54 = vpop.f32.mrb[21].mxu0 }
 0x225   : > { %2360 = vmatmul.mubr.bf16.gmra.mrb[124].mxu1 %v5387_v28  ;;  %2836 = vrot.lane.b32.xlu0 %v1580_v18, %s4427_s9  ;;  %v1588_v50 = vpop.f32.mrb[22].mxu0 }
 0x226   : > { %2834 = vrot.lane.b32.xlu1 %v1578_v25, %s4427_s9  ;;  %v1590_v8 = vpop.f32.mrb[23].mxu0  ;;  %4146 = vmatprep.mubr.msk.bf16.mxu1 %vm1463_vm0, %v5395_v23 }
 0x228   : > { %v1729_v14 = vpop.f32.mrb[20].mxu1  ;;  %2217 = vmatmul.mubr.bf16.gmra.mrb[128].mxu0 %v5419_v15 }
 0x229   : > { %v1731_v34 = vpop.f32.mrb[21].mxu1  ;;  %2840 = vrot.lane.b32.xlu0 %v1725_v43, %s4427_s9  ;;  %4135 = vmatprep.mubr.msk.bf16.mxu0 %vm1463_vm0, %v5427_v42 }
 0x22a   : > { %v1733_v4 = vpop.f32.mrb[22].mxu1  ;;  %2838 = vrot.lane.b32.xlu1 %v1723_v37, %s4427_s9 }
 0x22b   : > { %v1735_v28 = vpop.f32.mrb[23].mxu1  ;;  %v1594_v59 = vpop.f32.mrb[24].mxu0 }
 0x22c   : > { %v1596_v26 = vpop.f32.mrb[25].mxu0 }
 0x22d   : > { %2370 = vmatmul.mubr.bf16.gmra.mrb[128].mxu1 %v5419_v15  ;;  %2864 = vrot.lane.b32.xlu0 %v1584_v57, %s4427_s9  ;;  %v1598_v23 = vpop.f32.mrb[26].mxu0 }
 0x22e   : > { %2866 = vrot.lane.b32.xlu1 %v1586_v54, %s4427_s9  ;;  %v1600_v63 = vpop.f32.mrb[27].mxu0  ;;  %4147 = vmatprep.mubr.msk.bf16.mxu1 %vm1463_vm0, %v5427_v42 }
 0x230   : > { %v1739_v22 = vpop.f32.mrb[24].mxu1  ;;  %2227 = vmatmul.mubr.bf16.gmra.mrb[132].mxu0 %v5450_v45 }
 0x231   : > { %v1741_v6 = vpop.f32.mrb[25].mxu1  ;;  %2868 = vrot.lane.b32.xlu0 %v1729_v14, %s4427_s9  ;;  %4136 = vmatprep.mubr.msk.bf16.mxu0 %vm1463_vm0, %v5456_v49 }
 0x232   : > { %v1743_v11 = vpop.f32.mrb[26].mxu1  ;;  %2870 = vrot.lane.b32.xlu1 %v1731_v34, %s4427_s9 }
 0x233   : > { %v1745_v15 = vpop.f32.mrb[27].mxu1  ;;  %v1604_v1 = vpop.f32.mrb[28].mxu0 }
 0x234   : > { %v1606_v12 = vpop.f32.mrb[29].mxu0 }
 0x235   : > { %2380 = vmatmul.mubr.bf16.gmra.mrb[132].mxu1 %v5450_v45  ;;  %2896 = vrot.lane.b32.xlu0 %v1590_v8, %s4427_s9  ;;  %v5936_v42 = vpop.f32.mrb[30].mxu0 }
 0x236   : > { %2894 = vrot.lane.b32.xlu1 %v1588_v50, %s4427_s9  ;;  %v5939_v33 = vpop.f32.mrb[31].mxu0  ;;  %4148 = vmatprep.mubr.msk.bf16.mxu1 %vm1463_vm0, %v5456_v49 }
 0x238   : > { %v1749_v25 = vpop.f32.mrb[28].mxu1  ;;  %2237 = vmatmul.mubr.bf16.gmra.mrb[136].mxu0 %v5474_v13 }
 0x239   : > { %v1751_v18 = vpop.f32.mrb[29].mxu1  ;;  %2900 = vrot.lane.b32.xlu0 %v1735_v28, %s4427_s9  ;;  %4137 = vmatprep.mubr.msk.bf16.mxu0 %vm1463_vm0, %v7467_v39  ;;  %v4361_v28 = vld [vmem:[%s7436_s2] ss:$8 sps:$4 sm:$0xff]  }
 0x23a   : > { %v5947_v45 = vpop.f32.mrb[30].mxu1  ;;  %2898 = vrot.lane.b32.xlu1 %v1733_v4, %s4427_s9 }
 0x23b   : > { %v5950_v55 = vpop.f32.mrb[31].mxu1  ;;  %v1614_v0 = vpop.f32.mrb[32].mxu0 }
 0x23c   : > { %v5952_v37 = vpop.f32.mrb[33].mxu0 }
 0x23d   : > { %2390 = vmatmul.mubr.bf16.gmra.mrb[136].mxu1 %v5474_v13  ;;  %2924 = vrot.lane.b32.xlu0 %v1594_v59, %s4427_s9  ;;  %v1617_v49 = vpop.f32.mrb[34].mxu0 }
 0x23e   : > { %2926 = vrot.lane.b32.xlu1 %v1596_v26, %s4427_s9  ;;  %v5957_v43 = vpop.f32.mrb[35].mxu0  ;;  %4149 = vmatprep.mubr.msk.bf16.mxu1 %vm1463_vm0, %v7467_v39 }
 0x240   : > { %v5961_v57 = vpop.f32.mrb[32].mxu1  ;;  %2247 = vmatmul.mubr.bf16.gmra.mrb[140].mxu0 %v5498_v29 }
 0x241   : > { %v5964_v54 = vpop.f32.mrb[33].mxu1  ;;  %2928 = vrot.lane.b32.xlu0 %v1739_v22, %s4427_s9  ;;  %4150 = vmatprep.mubr.msk.bf16.mxu0 %vm1463_vm0, %v5705_v62 }
 0x242   : > { %v5969_v13 = vpop.f32.mrb[34].mxu1  ;;  %2930 = vrot.lane.b32.xlu1 %v1741_v6, %s4427_s9 }
 0x243   : > { %v5972_v50 = vpop.f32.mrb[35].mxu1  ;;  %v1622_v8 = vpop.f32.mrb[36].mxu0 }
 0x244   : > { %v5974_v14 = vpop.f32.mrb[37].mxu0 }
 0x245   : > { %2400 = vmatmul.mubr.bf16.gmra.mrb[140].mxu1 %v5498_v29  ;;  %2956 = vrot.lane.b32.xlu0 %v1600_v63, %s4427_s9  ;;  %v1625_v39 = vpop.f32.mrb[38].mxu0  ;;  %v4362_v29 = vld [vmem:[%s7436_s2 + $0x14] ss:$8 sps:$4 sm:$0xff]  }
 0x246   : > { %2954 = vrot.lane.b32.xlu1 %v1598_v23, %s4427_s9  ;;  %v5979_v34 = vpop.f32.mrb[39].mxu0  ;;  %4162 = vmatprep.mubr.msk.bf16.mxu1 %vm1463_vm0, %v5705_v62 }
 0x248   : > { %v5983_v4 = vpop.f32.mrb[36].mxu1  ;;  %2443 = vmatmul.mubr.bf16.vlgmr.msra.gmra.mrb[144].mxu0 %v4361_v28 }
 0x249   : > { %v5988_v59 = vpop.f32.mrb[37].mxu1  ;;  %2960 = vrot.lane.b32.xlu0 %v1745_v15, %s4427_s9  ;;  %4151 = vmatprep.mubr.msk.bf16.mxu0 %vm1463_vm0, %v4362_v29 }
 0x24a   : > { %v5995_v26 = vpop.f32.mrb[38].mxu1  ;;  %2958 = vrot.lane.b32.xlu1 %v1743_v11, %s4427_s9  ;;  %v4363_v11 = vld [vmem:[%s7436_s2 + $0x10] ss:$8 sps:$4 sm:$0xff]  }
 0x24b   : > { %v5998_v62 = vpop.f32.mrb[39].mxu1  ;;  %v1630_v23 = vpop.f32.mrb[40].mxu0 }
 0x24c   : > { %v6000_v63 = vpop.f32.mrb[41].mxu0 }
 0x24d   : > { %2596 = vmatmul.mubr.bf16.vlgmr.msra.gmra.mrb[144].mxu1 %v4361_v28  ;;  %2984 = vrot.lane.b32.xlu0 %v1604_v1, %s4427_s9  ;;  %v1633_v22 = vpop.f32.mrb[42].mxu0  ;;  %v4364_v1 = vld [vmem:[%s7436_s2 + $0x24] ss:$8 sps:$4 sm:$0xff]  }
 0x24e   : > { %2986 = vrot.lane.b32.xlu1 %v1606_v12, %s4427_s9  ;;  %v6004_v6 = vpop.f32.mrb[43].mxu0  ;;  %4163 = vmatprep.mubr.msk.bf16.mxu1 %vm1463_vm0, %v4362_v29 }
 0x250   : > { %v6007_v15 = vpop.f32.mrb[40].mxu1  ;;  %2453 = vmatmul.mubr.bf16.gmra.mrb[148].mxu0 %v4363_v11 }
 0x251   : > { %v6012_v0 = vpop.f32.mrb[41].mxu1  ;;  %2988 = vrot.lane.b32.xlu0 %v1749_v25, %s4427_s9  ;;  %4152 = vmatprep.mubr.msk.bf16.mxu0 %vm1463_vm0, %v4364_v1 }
 0x252   : > { %v6019_v12 = vpop.f32.mrb[42].mxu1  ;;  %2990 = vrot.lane.b32.xlu1 %v1751_v18, %s4427_s9  ;;  %v4365_v18 = vld [vmem:[%s7436_s2 + $0x20] ss:$8 sps:$4 sm:$0xff]  }
 0x253   : > { %v6022_v49 = vpop.f32.mrb[43].mxu1  ;;  %v1638_v8 = vpop.f32.mrb[44].mxu0 }
 0x254   : > { %v6024_v39 = vpop.f32.mrb[45].mxu0 }
 0x255   : > { %2602 = vmatmul.mubr.bf16.gmra.mrb[148].mxu1 %v4363_v11  ;;  %3016 = vrot.lane.b32.xlu0 %v5939_v33, %s4427_s9  ;;  %v1641_v25 = vpop.f32.mrb[46].mxu0 }
 0x256   : > { %3014 = vrot.lane.b32.xlu1 %v5936_v42, %s4427_s9  ;;  %v6030_v28 = vpop.f32.mrb[47].mxu0  ;;  %4164 = vmatprep.mubr.msk.bf16.mxu1 %vm1463_vm0, %v4364_v1  ;;  %v4366_v42 = vld [vmem:[%s7436_s2 + $0x34] ss:$8 sps:$4 sm:$0xff]  }
 0x257   : > { %7490 = vst [vmem:[#allocation15_spill] sm:$0xff] %v6030_v28 }
 0x258   : > { %v6033_v29 = vpop.f32.mrb[44].mxu1  ;;  %2463 = vmatmul.mubr.bf16.gmra.mrb[152].mxu0 %v4365_v18 }
 0x259   : > { %v6038_v23 = vpop.f32.mrb[45].mxu1  ;;  %3020 = vrot.lane.b32.xlu0 %v5950_v55, %s4427_s9  ;;  %4153 = vmatprep.mubr.msk.bf16.mxu0 %vm1463_vm0, %v4366_v42 }
 0x25a   : > { %v6046_v33 = vpop.f32.mrb[46].mxu1  ;;  %3018 = vrot.lane.b32.xlu1 %v5947_v45, %s4427_s9 }
 0x25b   : > { %7491 = vst [vmem:[#allocation17_spill] sm:$0xff] %v6046_v33  ;;  %v6050_v22 = vpop.f32.mrb[47].mxu1  ;;  %v6052_v11 = vpop.f32.mrb[48].mxu0 }
 0x25c   : > { %7492 = vst [vmem:[#allocation18_spill] sm:$0xff] %v6050_v22  ;;  %7493 = vst [vmem:[#allocation19_spill] sm:$0xff] %v6052_v11  ;;  %v6054_v1 = vpop.f32.mrb[49].mxu0 }
 0x25d   : > { %7494 = vst [vmem:[#allocation20_spill] sm:$0xff] %v6054_v1  ;;  %2608 = vmatmul.mubr.bf16.gmra.mrb[152].mxu1 %v4365_v18  ;;  %v6056_v8 = vpop.f32.mrb[50].mxu0 }
 0x25e   : > { %7495 = vst [vmem:[#allocation21_spill] sm:$0xff] %v6056_v8  ;;  %v6058_v55 = vpop.f32.mrb[51].mxu0  ;;  %4165 = vmatprep.mubr.msk.bf16.mxu1 %vm1463_vm0, %v4366_v42 }
 0x25f   : > { %7496 = vst [vmem:[#allocation22_spill] sm:$0xff] %v6058_v55  ;;  %v4369_v55 = vld [vmem:[%s7436_s2 + $0x40] ss:$8 sps:$4 sm:$0xff]  }
 0x260   : > { %v6061_v25 = vpop.f32.mrb[48].mxu1  ;;  %2473 = vmatmul.mubr.bf16.gmra.mrb[156].mxu0 %v4367_v47 }
 0x261   : > { %7497 = vst [vmem:[#allocation23_spill] sm:$0xff] %v6061_v25  ;;  %v6066_v45 = vpop.f32.mrb[49].mxu1  ;;  %4154 = vmatprep.mubr.msk.bf16.mxu0 %vm1463_vm0, %v4368_v32  ;;  %v4377_v25 = vld [vmem:[%s7436_s2 + $0x80] ss:$8 sps:$4 sm:$0xff]  }
 0x262   : > { %7498 = vst [vmem:[#allocation24_spill] sm:$0xff] %v6066_v45  ;;  %v6072_v18 = vpop.f32.mrb[50].mxu1 }
 0x263   : > { %7499 = vst [vmem:[#allocation25_spill] sm:$0xff] %v6072_v18  ;;  %v6074_v56 = vpop.f32.mrb[51].mxu1  ;;  %v6076_v42 = vpop.f32.mrb[52].mxu0 }
 0x264   : > { %7500 = vst [vmem:[#allocation26_spill] sm:$0xff] %v6074_v56  ;;  %7501 = vst [vmem:[#allocation27_spill] sm:$0xff] %v6076_v42  ;;  %v6078_v31 = vpop.f32.mrb[53].mxu0  ;;  %v4370_v56 = vld [vmem:[%s7436_s2 + $0x54] ss:$8 sps:$4 sm:$0xff]  }
 0x265   : > { %7502 = vst [vmem:[#allocation28_spill] sm:$0xff] %v6078_v31  ;;  %2614 = vmatmul.mubr.bf16.gmra.mrb[156].mxu1 %v4367_v47  ;;  %v6080_v35 = vpop.f32.mrb[54].mxu0  ;;  %v4371_v42 = vld [vmem:[%s7436_s2 + $0x50] ss:$8 sps:$4 sm:$0xff]  }
 0x266   : > { %7503 = vst [vmem:[#allocation29_spill] sm:$0xff] %v6080_v35  ;;  %v6082_v36 = vpop.f32.mrb[55].mxu0  ;;  %4166 = vmatprep.mubr.msk.bf16.mxu1 %vm1463_vm0, %v4368_v32 }
 0x267   : > { %7504 = vst [vmem:[#allocation30_spill] sm:$0xff] %v6082_v36 }
 0x268   : > { %v6085_v45 = vpop.f32.mrb[52].mxu1  ;;  %2483 = vmatmul.mubr.bf16.gmra.mrb[160].mxu0 %v4369_v55 }
 0x269   : > { %7505 = vst [vmem:[#allocation31_spill] sm:$0xff] %v6085_v45  ;;  %v6090_v18 = vpop.f32.mrb[53].mxu1  ;;  %4155 = vmatprep.mubr.msk.bf16.mxu0 %vm1463_vm0, %v4370_v56 }
 0x26a   : > { %7506 = vst [vmem:[#allocation32_spill] sm:$0xff] %v6090_v18  ;;  %v6096_v47 = vpop.f32.mrb[54].mxu1 }
 0x26b   : > { %7507 = vst [vmem:[#allocation33_spill] sm:$0xff] %v6096_v47  ;;  %v6098_v36 = vpop.f32.mrb[55].mxu1  ;;  %v6100_v32 = vpop.f32.mrb[56].mxu0 }
 0x26c   : > { %7508 = vst [vmem:[#allocation34_spill] sm:$0xff] %v6098_v36  ;;  %7509 = vst [vmem:[#allocation35_spill] sm:$0xff] %v6100_v32  ;;  %v6102_v35 = vpop.f32.mrb[57].mxu0  ;;  %v4372_v36 = vld [vmem:[%s7436_s2 + $0x64] ss:$8 sps:$4 sm:$0xff]  }
 0x26d   : > { %7510 = vst [vmem:[#allocation36_spill] sm:$0xff] %v6102_v35  ;;  %2620 = vmatmul.mubr.bf16.gmra.mrb[160].mxu1 %v4369_v55  ;;  %v6104_v45 = vpop.f32.mrb[58].mxu0  ;;  %v4373_v32 = vld [vmem:[%s7436_s2 + $0x60] ss:$8 sps:$4 sm:$0xff]  }
 0x26e   : > { %7511 = vst [vmem:[#allocation37_spill] sm:$0xff] %v6104_v45  ;;  %v6106_v31 = vpop.f32.mrb[59].mxu0  ;;  %4167 = vmatprep.mubr.msk.bf16.mxu1 %vm1463_vm0, %v4370_v56 }
 0x26f   : > { %7512 = vst [vmem:[#allocation38_spill] sm:$0xff] %v6106_v31 }
 0x270   : > { %v6109_v18 = vpop.f32.mrb[56].mxu1  ;;  %2493 = vmatmul.mubr.bf16.gmra.mrb[164].mxu0 %v4371_v42 }
 0x271   : > { %7513 = vst [vmem:[#allocation39_spill] sm:$0xff] %v6109_v18  ;;  %v6114_v47 = vpop.f32.mrb[57].mxu1  ;;  %4156 = vmatprep.mubr.msk.bf16.mxu0 %vm1463_vm0, %v4372_v36 }
 0x272   : > { %7514 = vst [vmem:[#allocation40_spill] sm:$0xff] %v6114_v47  ;;  %v6120_v55 = vpop.f32.mrb[58].mxu1 }
 0x273   : > { %7515 = vst [vmem:[#allocation41_spill] sm:$0xff] %v6120_v55  ;;  %v6122_v31 = vpop.f32.mrb[59].mxu1  ;;  %v6124_v56 = vpop.f32.mrb[60].mxu0 }
 0x274   : > { %7516 = vst [vmem:[#allocation42_spill] sm:$0xff] %v6122_v31  ;;  %7517 = vst [vmem:[#allocation43_spill] sm:$0xff] %v6124_v56  ;;  %v6126_v45 = vpop.f32.mrb[61].mxu0  ;;  %v4374_v31 = vld [vmem:[%s7436_s2 + $0x74] ss:$8 sps:$4 sm:$0xff]  }
 0x275   : > { %7518 = vst [vmem:[#allocation44_spill] sm:$0xff] %v6126_v45  ;;  %v6128_v18 = vpop.f32.mrb[62].mxu0  ;;  %2628 = vmatmul.mubr.bf16.gmra.mrb[164].mxu1 %v4371_v42  ;;  %v4375_v56 = vld [vmem:[%s7436_s2 + $0x70] ss:$8 sps:$4 sm:$0xff]  }
 0x276   : > { %7519 = vst [vmem:[#allocation45_spill] sm:$0xff] %v6128_v18  ;;  %v6130_v35 = vpop.f32.mrb[63].mxu0  ;;  %4168 = vmatprep.mubr.msk.bf16.mxu1 %vm1463_vm0, %v4372_v36 }
 0x277   : > { %7520 = vst [vmem:[#allocation46_spill] sm:$0xff] %v6130_v35 }
 0x278   : > { %v6133_v47 = vpop.f32.mrb[60].mxu1  ;;  %2503 = vmatmul.mubr.bf16.gmra.mrb[168].mxu0 %v4373_v32 }
 0x279   : > { %7521 = vst [vmem:[#allocation47_spill] sm:$0xff] %v6133_v47  ;;  %v6138_v55 = vpop.f32.mrb[61].mxu1  ;;  %4157 = vmatprep.mubr.msk.bf16.mxu0 %vm1463_vm0, %v4374_v31 }
 0x27a   : > { %7522 = vst [vmem:[#allocation48_spill] sm:$0xff] %v6138_v55  ;;  %v6144_v42 = vpop.f32.mrb[62].mxu1 }
 0x27b   : > { %7523 = vst [vmem:[#allocation49_spill] sm:$0xff] %v6144_v42  ;;  %v6146_v35 = vpop.f32.mrb[63].mxu1  ;;  %v1872_v36 = vpop.f32.mrb[64].mxu0 }
 0x27c   : > { %7524 = vst [vmem:[#allocation50_spill] sm:$0xff] %v6146_v35  ;;  %2812 = vrot.lane.b32.xlu0 %v1872_v36, %s4427_s9  ;;  %v1874_v18 = vpop.f32.mrb[65].mxu0  ;;  %v4376_v36 = vld [vmem:[%s7436_s2 + $0x84] ss:$8 sps:$4 sm:$0xff]  }
 0x27d   : > { %2814 = vrot.lane.b32.xlu1 %v1874_v18, %s4427_s9  ;;  %v1876_v47 = vpop.f32.mrb[66].mxu0  ;;  %2636 = vmatmul.mubr.bf16.gmra.mrb[168].mxu1 %v4373_v32 }
 0x27e   : > { %v1878_v45 = vpop.f32.mrb[67].mxu0  ;;  %4169 = vmatprep.mubr.msk.bf16.mxu1 %vm1463_vm0, %v4374_v31 }
 0x280   : > { %v2025_v55 = vpop.f32.mrb[64].mxu1  ;;  %2513 = vmatmul.mubr.bf16.gmra.mrb[172].mxu0 %v4375_v56 }
 0x281   : > { %v2027_v42 = vpop.f32.mrb[65].mxu1  ;;  %2816 = vrot.lane.b32.xlu0 %v2025_v55, %s4427_s9  ;;  %4158 = vmatprep.mubr.msk.bf16.mxu0 %vm1463_vm0, %v4376_v36 }
 0x282   : > { %v2029_v18 = vpop.f32.mrb[66].mxu1  ;;  %2818 = vrot.lane.b32.xlu1 %v2027_v42, %s4427_s9 }
 0x283   : > { %v2031_v32 = vpop.f32.mrb[67].mxu1  ;;  %v1882_v31 = vpop.f32.mrb[68].mxu0 }
 0x284   : > { %v1884_v35 = vpop.f32.mrb[69].mxu0 }
 0x285   : > { %2844 = vrot.lane.b32.xlu0 %v1878_v45, %s4427_s9  ;;  %v1886_v8 = vpop.f32.mrb[70].mxu0  ;;  %2644 = vmatmul.mubr.bf16.gmra.mrb[172].mxu1 %v4375_v56  ;;  %v4378_v45 = vld [vmem:[%s7436_s2 + $0x94] ss:$8 sps:$4 sm:$0xff]  }
 0x286   : > { %2842 = vrot.lane.b32.xlu1 %v1876_v47, %s4427_s9  ;;  %v1888_v7 = vpop.f32.mrb[71].mxu0  ;;  %4170 = vmatprep.mubr.msk.bf16.mxu1 %vm1463_vm0, %v4376_v36 }
 0x288   : > { %v2035_v55 = vpop.f32.mrb[68].mxu1  ;;  %2523 = vmatmul.mubr.bf16.gmra.mrb[176].mxu0 %v4377_v25 }
 0x289   : > { %v2037_v42 = vpop.f32.mrb[69].mxu1  ;;  %2848 = vrot.lane.b32.xlu0 %v2031_v32, %s4427_s9  ;;  %4159 = vmatprep.mubr.msk.bf16.mxu0 %vm1463_vm0, %v4378_v45 }
 0x28a   : > { %v2039_v47 = vpop.f32.mrb[70].mxu1  ;;  %2846 = vrot.lane.b32.xlu1 %v2029_v18, %s4427_s9 }
 0x28b   : > { %v2041_v56 = vpop.f32.mrb[71].mxu1  ;;  %v6172_v36 = vpop.f32.mrb[72].mxu0 }
 0x28c   : > { %v6174_v1 = vpop.f32.mrb[73].mxu0 }
 0x28d   : > { %2872 = vrot.lane.b32.xlu0 %v1882_v31, %s4427_s9  ;;  %v6177_v11 = vpop.f32.mrb[74].mxu0  ;;  %2652 = vmatmul.mubr.bf16.gmra.mrb[176].mxu1 %v4377_v25  ;;  %v4379_v31 = vld [vmem:[%s7436_s2 + $0x90] ss:$8 sps:$4 sm:$0xff]  }
 0x28e   : > { %2874 = vrot.lane.b32.xlu1 %v1884_v35, %s4427_s9  ;;  %v2805_v32 = vpop.permute.xlu0 %2804  ;;  %v6182_v5 = vpop.f32.mrb[75].mxu0  ;;  %4171 = vmatprep.mubr.msk.bf16.mxu1 %vm1463_vm0, %v4378_v45  ;;  %v4380_v35 = vld [vmem:[%s7436_s2 + $0xa4] ss:$8 sps:$4 sm:$0xff]  }
 0x28f   : > { %v2807_v18 = vpop.permute.xlu1 %2806 }
 0x290   : > { %v6185_v22 = vpop.f32.mrb[72].mxu1  ;;  %v3044_v33 = vsel %vm1463_vm0, %v2805_v32, %v2807_v18  ;;  %2533 = vmatmul.mubr.bf16.gmra.mrb[180].mxu0 %v4379_v31 }
 0x291   : > { %v3268_v25 = vadd.f32 %v3044_v33, %v5761_v9  ;;  %v6192_v30 = vpop.f32.mrb[73].mxu1  ;;  %2876 = vrot.lane.b32.xlu0 %v2035_v55, %s4427_s9  ;;  %4160 = vmatprep.mubr.msk.bf16.mxu0 %vm1463_vm0, %v4380_v35 }
 0x292   : > { %v6199_v45 = vpop.f32.mrb[74].mxu1  ;;  %2878 = vrot.lane.b32.xlu1 %v2037_v42, %s4427_s9 }
 0x293   : > { %v3380_v32 = vadd.f32 %v3268_v25, %v5952_v37  ;;  %v6203_v60 = vpop.f32.mrb[75].mxu1  ;;  %v2809_v28 = vpop.permute.xlu0 %2808 }
 0x294   : > { %v3045_v9 = vsel %vm1463_vm0, %v2807_v18, %v2809_v28  ;;  %v6206_v33 = vpop.permute.xlu1 %2810  ;;  %v6208_v55 = vpop.f32.mrb[76].mxu0 }
 0x295   : > { %7525 = vst [vmem:[#allocation51_spill] sm:$0xff] %v6206_v33  ;;  %3492 = vst [vmem:[%s6210_s24] sm:$0xff] %v3380_v32  ;;  %v3269_v17 = vadd.f32 %v3045_v9, %v5769_v58  ;;  %v3046_v42 = vsel %vm1463_vm0, %v2809_v28, %v6206_v33  ;;  %2904 = vrot.lane.b32.xlu0 %v1888_v7, %s4427_s9  ;;  %v6217_v37 = vpop.f32.mrb[77].mxu0  ;;  %2660 = vmatmul.mubr.bf16.gmra.mrb[180].mxu1 %v4379_v31 }
 0x296   : > { %v3270_v18 = vadd.f32 %v3046_v42, %v5786_v44  ;;  %2902 = vrot.lane.b32.xlu1 %v1886_v8, %s4427_s9  ;;  %v6221_v25 = vpop.f32.mrb[78].mxu0  ;;  %4172 = vmatprep.mubr.msk.bf16.mxu1 %vm1463_vm0, %v4380_v35  ;;  %v4381_v44 = vld [vmem:[%s7436_s2 + $0xa0] ss:$8 sps:$4 sm:$0xff]  }
 0x297   : > { %v3381_v58 = vadd.f32 %v3269_v17, %v5961_v57  ;;  %v2837_v32 = vpop.permute.xlu0 %2836  ;;  %v6225_v9 = vpop.f32.mrb[79].mxu0  ;;  %v4382_v17 = vld [vmem:[%s7436_s2 + $0xb4] ss:$8 sps:$4 sm:$0xff]  }
 0x298   : > { %v3382_v28 = vadd.f32 %v3270_v18, %v5964_v54  ;;  %v6228_v7 = vpop.f32.mrb[76].mxu1  ;;  %v2835_v33 = vpop.permute.xlu1 %2834  ;;  %2543 = vmatmul.mubr.bf16.gmra.mrb[184].mxu0 %v4381_v44 }
 0x299   : > { %3493 = vst [vmem:[%s6210_s24 + $0x8] sm:$0xff] %v3381_v58  ;;  %v3058_v8 = vsel %vm1463_vm0, %v2835_v33, %v2837_v32  ;;  %v6235_v31 = vpop.f32.mrb[77].mxu1  ;;  %2908 = vrot.lane.b32.xlu0 %v2041_v56, %s4427_s9  ;;  %4161 = vmatprep.mubr.msk.bf16.mxu0 %vm1463_vm0, %v4382_v17 }
 0x29a   : > { %3494 = vst [vmem:[%s6210_s24 + $0x10] sm:$0xff] %v3382_v28  ;;  %v3282_v57 = vadd.f32 %v3058_v8, %v5775_v2  ;;  %v6244_v54 = vpop.f32.mrb[78].mxu1  ;;  %2906 = vrot.lane.b32.xlu1 %v2039_v47, %s4427_s9 }
 0x29b   : > { %v6247_v35 = vpop.f32.mrb[79].mxu1  ;;  %v6249_v33 = vpop.permute.xlu0 %2840 }
 0x29c   : > { %v3394_v56 = vadd.f32 %v3282_v57, %v5957_v43  ;;  %v2839_v42 = vpop.permute.xlu1 %2838  ;;  %v6252_v18 = vpop.f32.mrb[80].mxu0 }
 0x29d   : > { %v3059_v58 = vsel %vm1463_vm0, %v2837_v32, %v2839_v42  ;;  %v3060_v28 = vsel %vm1463_vm0, %v2839_v42, %v6249_v33  ;;  %2932 = vrot.lane.b32.xlu0 %v6172_v36, %s4427_s9  ;;  %v6259_v2 = vpop.f32.mrb[81].mxu0  ;;  %2668 = vmatmul.mubr.bf16.gmra.mrb[184].mxu1 %v4381_v44 }
 0x29e   : > { %3506 = vst [vmem:[%s6210_s24 + $0x70] sm:$0xff] %v3394_v56  ;;  %v3283_v47 = vadd.f32 %v3059_v58, %v5777_v51  ;;  %v3284_v43 = vadd.f32 %v3060_v28, %v5796_v48  ;;  %2934 = vrot.lane.b32.xlu1 %v6174_v1, %s4427_s9  ;;  %v6266_v32 = vpop.f32.mrb[82].mxu0  ;;  %4173 = vmatprep.mubr.msk.bf16.mxu1 %vm1463_vm0, %v4382_v17  ;;  %v4383_v48 = vld [vmem:[%s7436_s2 + $0xb0] ss:$8 sps:$4 sm:$0xff]  }
 0x29f   : > { %v2865_v8 = vpop.permute.xlu0 %2864  ;;  %v6269_v57 = vpop.f32.mrb[83].mxu0 }
 0x2a0   : > { %v3395_v36 = vadd.f32 %v3283_v47, %v5969_v13  ;;  %v3396_v44 = vadd.f32 %v3284_v43, %v5972_v50  ;;  %v6273_v56 = vpop.f32.mrb[80].mxu1  ;;  %v2867_v51 = vpop.permute.xlu1 %2866  ;;  %2553 = vmatmul.mubr.bf16.gmra.mrb[188].mxu0 %v4383_v48 }
 0x2a1   : > { %v3072_v1 = vsel %vm1463_vm0, %v2865_v8, %v2867_v51  ;;  %v6279_v42 = vpop.f32.mrb[81].mxu1  ;;  %2936 = vrot.lane.b32.xlu0 %v6185_v22, %s4427_s9 }
 0x2a2   : > { %3507 = vst [vmem:[%s6210_s24 + $0x78] sm:$0xff] %v3395_v36  ;;  %3508 = vst [vmem:[%s6210_s24 + $0x80] sm:$0xff] %v3396_v44  ;;  %v3296_v13 = vadd.f32 %v3072_v1, %v5800_v41  ;;  %v6286_v50 = vpop.f32.mrb[82].mxu1  ;;  %2938 = vrot.lane.b32.xlu1 %v6192_v30, %s4427_s9 }
 0x2a3   : > { %v6290_v17 = vpop.f32.mrb[83].mxu1  ;;  %v2869_v58 = vpop.permute.xlu0 %2868 }
 0x2a4   : > { %v3408_v28 = vadd.f32 %v3296_v13, %v5974_v14  ;;  %v3073_v47 = vsel %vm1463_vm0, %v2867_v51, %v2869_v58  ;;  %v6294_v43 = vpop.permute.xlu1 %2870  ;;  %v6296_v22 = vpop.f32.mrb[84].mxu0 }
 0x2a5   : > { %v3297_v8 = vadd.f32 %v3073_v47, %v5808_v27  ;;  %v3074_v41 = vsel %vm1463_vm0, %v2869_v58, %v6294_v43  ;;  %2964 = vrot.lane.b32.xlu0 %v6182_v5, %s4427_s9  ;;  %v6303_v30 = vpop.f32.mrb[85].mxu0  ;;  %2676 = vmatmul.mubr.bf16.gmra.mrb[188].mxu1 %v4383_v48 }
 0x2a6   : > { %3520 = vst [vmem:[%s6210_s24 + $0xe0] sm:$0xff] %v3408_v28  ;;  %v3298_v14 = vadd.f32 %v3074_v41, %v5826_v24  ;;  %2962 = vrot.lane.b32.xlu1 %v6177_v11, %s4427_s9  ;;  %v6309_v36 = vpop.f32.mrb[86].mxu0 }
 0x2a7   : > { %v3409_v27 = vadd.f32 %v3297_v8, %v5983_v4  ;;  %v2897_v44 = vpop.permute.xlu0 %2896  ;;  %v6312_v51 = vpop.f32.mrb[87].mxu0 }
 0x2a8   : > { %v3410_v1 = vadd.f32 %v3298_v14, %v5988_v59  ;;  %v6315_v5 = vpop.f32.mrb[84].mxu1  ;;  %v2895_v13 = vpop.permute.xlu1 %2894 }
 0x2a9   : > { %3521 = vst [vmem:[%s6210_s24 + $0xe8] sm:$0xff] %v3409_v27  ;;  %v3086_v48 = vsel %vm1463_vm0, %v2895_v13, %v2897_v44  ;;  %v6319_v24 = vpop.f32.mrb[85].mxu1  ;;  %2968 = vrot.lane.b32.xlu0 %v6203_v60, %s4427_s9 }
 0x2aa   : > { %3522 = vst [vmem:[%s6210_s24 + $0xf0] sm:$0xff] %v3410_v1  ;;  %v3310_v4 = vadd.f32 %v3086_v48, %v5815_v52  ;;  %v6325_v11 = vpop.f32.mrb[86].mxu1  ;;  %2966 = vrot.lane.b32.xlu1 %v6199_v45, %s4427_s9 }
 0x2ab   : > { %v6329_v59 = vpop.f32.mrb[87].mxu1  ;;  %v6331_v58 = vpop.permute.xlu0 %2900 }
 0x2ac   : > { %v3422_v28 = vadd.f32 %v3310_v4, %v5979_v34  ;;  %v2899_v47 = vpop.permute.xlu1 %2898  ;;  %v6334_v8 = vpop.f32.mrb[88].mxu0 }
 0x2ad   : > { %v3087_v41 = vsel %vm1463_vm0, %v2897_v44, %v2899_v47  ;;  %v3088_v60 = vsel %vm1463_vm0, %v2899_v47, %v6331_v58  ;;  %2992 = vrot.lane.b32.xlu0 %v6208_v55, %s4427_s9  ;;  %v6341_v52 = vpop.f32.mrb[89].mxu0 }
 0x2ae   : > { %3534 = vst [vmem:[%s6210_s24 + $0x150] sm:$0xff] %v3422_v28  ;;  %v3311_v45 = vadd.f32 %v3087_v41, %v5817_v21  ;;  %v3312_v34 = vadd.f32 %v3088_v60, %v5837_v3  ;;  %2994 = vrot.lane.b32.xlu1 %v6217_v37, %s4427_s9  ;;  %v6348_v14 = vpop.f32.mrb[90].mxu0 }
 0x2af   : > { %v2925_v27 = vpop.permute.xlu0 %2924  ;;  %v6350_v44 = vpop.f32.mrb[91].mxu0 }
 0x2b0   : > { %v3423_v1 = vadd.f32 %v3311_v45, %v5995_v26  ;;  %v3424_v55 = vadd.f32 %v3312_v34, %v5998_v62  ;;  %v6354_v13 = vpop.f32.mrb[88].mxu1  ;;  %v2927_v48 = vpop.permute.xlu1 %2926 }
 0x2b1   : > { %v3100_v4 = vsel %vm1463_vm0, %v2925_v27, %v2927_v48  ;;  %v6357_v21 = vpop.f32.mrb[89].mxu1  ;;  %2996 = vrot.lane.b32.xlu0 %v6228_v7, %s4427_s9 }
 0x2b2   : > { %3535 = vst [vmem:[%s6210_s24 + $0x158] sm:$0xff] %v3423_v1  ;;  %3536 = vst [vmem:[%s6210_s24 + $0x160] sm:$0xff] %v3424_v55  ;;  %v3324_v3 = vadd.f32 %v3100_v4, %v5841_v16  ;;  %v6364_v37 = vpop.f32.mrb[90].mxu1  ;;  %2998 = vrot.lane.b32.xlu1 %v6235_v31, %s4427_s9 }
 0x2b3   : > { %v6368_v26 = vpop.f32.mrb[91].mxu1  ;;  %v2929_v62 = vpop.permute.xlu0 %2928 }
 0x2b4   : > { %v3436_v28 = vadd.f32 %v3324_v3, %v6000_v63  ;;  %v3101_v47 = vsel %vm1463_vm0, %v2927_v48, %v2929_v62  ;;  %v6372_v41 = vpop.permute.xlu1 %2930  ;;  %v6374_v7 = vpop.f32.mrb[92].mxu0 }
 0x2b5   : > { %v3325_v60 = vadd.f32 %v3101_v47, %v5847_v40  ;;  %v3102_v16 = vsel %vm1463_vm0, %v2929_v62, %v6372_v41  ;;  %3024 = vrot.lane.b32.xlu0 %v6225_v9, %s4427_s9  ;;  %v6381_v31 = vpop.f32.mrb[93].mxu0 }
 0x2b6   : > { %3548 = vst [vmem:[%s6210_s24 + $0x1c0] sm:$0xff] %v3436_v28  ;;  %v3326_v63 = vadd.f32 %v3102_v16, %v5862_v20  ;;  %3022 = vrot.lane.b32.xlu1 %v6221_v25, %s4427_s9  ;;  %v6387_v45 = vpop.f32.mrb[94].mxu0 }
 0x2b7   : > { %v3437_v34 = vadd.f32 %v3325_v60, %v6007_v15  ;;  %v2957_v40 = vpop.permute.xlu0 %2956  ;;  %v6390_v27 = vpop.f32.mrb[95].mxu0 }
 0x2b8   : > { %v3438_v1 = vadd.f32 %v3326_v63, %v6012_v0  ;;  %v6393_v55 = vpop.f32.mrb[92].mxu1  ;;  %v2955_v9 = vpop.permute.xlu1 %2954 }
 0x2b9   : > { %3549 = vst [vmem:[%s6210_s24 + $0x1c8] sm:$0xff] %v3437_v34  ;;  %v3114_v48 = vsel %vm1463_vm0, %v2955_v9, %v2957_v40  ;;  %v6397_v20 = vpop.f32.mrb[93].mxu1  ;;  %3028 = vrot.lane.b32.xlu0 %v6247_v35, %s4427_s9 }
 0x2ba   : > { %3550 = vst [vmem:[%s6210_s24 + $0x1d0] sm:$0xff] %v3438_v1  ;;  %v3338_v15 = vadd.f32 %v3114_v48, %v5853_v53  ;;  %v6403_v25 = vpop.f32.mrb[94].mxu1  ;;  %3026 = vrot.lane.b32.xlu1 %v6244_v54, %s4427_s9 }
 0x2bb   : > { %v6407_v0 = vpop.f32.mrb[95].mxu1  ;;  %v6409_v4 = vpop.permute.xlu0 %2960 }
 0x2bc   : > { %v3450_v3 = vadd.f32 %v3338_v15, %v6004_v6  ;;  %v2959_v62 = vpop.permute.xlu1 %2958  ;;  %v6412_v28 = vpop.f32.mrb[96].mxu0 }
 0x2bd   : > { %7526 = vst [vmem:[#allocation52_spill] sm:$0xff] %v6412_v28  ;;  %v3115_v35 = vsel %vm1463_vm0, %v2957_v40, %v2959_v62  ;;  %v3116_v53 = vsel %vm1463_vm0, %v2959_v62, %v6409_v4  ;;  %v6417_v47 = vpop.f32.mrb[97].mxu0 }
 0x2be   : > { %7527 = vst [vmem:[#allocation53_spill] sm:$0xff] %v6417_v47  ;;  %3562 = vst [vmem:[%s6210_s24 + $0x230] sm:$0xff] %v3450_v3  ;;  %v3339_v54 = vadd.f32 %v3115_v35, %v5855_v46  ;;  %v3340_v60 = vadd.f32 %v3116_v53, %v5872_v61  ;;  %v6422_v16 = vpop.f32.mrb[98].mxu0 }
 0x2bf   : > { %7528 = vst [vmem:[#allocation54_spill] sm:$0xff] %v6422_v16  ;;  %v2985_v6 = vpop.permute.xlu0 %2984  ;;  %v6424_v63 = vpop.f32.mrb[99].mxu0 }
 0x2c0   : > { %7529 = vst [vmem:[#allocation55_spill] sm:$0xff] %v6424_v63  ;;  %v3451_v34 = vadd.f32 %v3339_v54, %v6019_v12  ;;  %v3452_v40 = vadd.f32 %v3340_v60, %v6022_v49  ;;  %v6428_v1 = vpop.f32.mrb[96].mxu1  ;;  %v2987_v9 = vpop.permute.xlu1 %2986 }
 0x2c1   : > { %7530 = vst [vmem:[#allocation56_spill] sm:$0xff] %v6428_v1  ;;  %v3128_v48 = vsel %vm1463_vm0, %v2985_v6, %v2987_v9  ;;  %v6431_v15 = vpop.f32.mrb[97].mxu1 }
 0x2c2   : > { %7531 = vst [vmem:[#allocation57_spill] sm:$0xff] %v6431_v15  ;;  %3563 = vst [vmem:[%s6210_s24 + $0x238] sm:$0xff] %v3451_v34  ;;  %v3352_v46 = vadd.f32 %v3128_v48, %v5876_v19  ;;  %v6436_v61 = vpop.f32.mrb[98].mxu1 }
 0x2c3   : > { %3564 = vst [vmem:[%s6210_s24 + $0x240] sm:$0xff] %v3452_v40  ;;  %7532 = vst [vmem:[#allocation58_spill] sm:$0xff] %v6436_v61  ;;  %v6438_v3 = vpop.f32.mrb[99].mxu1  ;;  %v2989_v62 = vpop.permute.xlu0 %2988 }
 0x2c4   : > { %7533 = vst [vmem:[#allocation59_spill] sm:$0xff] %v6438_v3  ;;  %v3464_v12 = vadd.f32 %v3352_v46, %v6024_v39  ;;  %v3129_v49 = vsel %vm1463_vm0, %v2987_v9, %v2989_v62  ;;  %v6442_v35 = vpop.permute.xlu1 %2990  ;;  %v6444_v53 = vpop.f32.mrb[100].mxu0  ;;  %v7543_v3 = vld [vmem:[#allocation15_spill] sm:$0xff] }
 0x2c5   : > { %7534 = vst [vmem:[#allocation60_spill] sm:$0xff] %v6444_v53  ;;  %v3353_v54 = vadd.f32 %v3129_v49, %v5879_v38  ;;  %v3130_v19 = vsel %vm1463_vm0, %v2989_v62, %v6442_v35  ;;  %v6449_v60 = vpop.f32.mrb[101].mxu0 }
 0x2c6   : > { %7535 = vst [vmem:[#allocation61_spill] sm:$0xff] %v6449_v60  ;;  %3576 = vst [vmem:[%s6210_s24 + $0x2a0] sm:$0xff] %v3464_v12  ;;  %v3354_v6 = vadd.f32 %v3130_v19, %v5891_v10  ;;  %v6453_v34 = vpop.f32.mrb[102].mxu0  ;;  %v7540_v10 = vld [vmem:[#allocation7_spill] sm:$0xff]  ;;  %v7565_v60 = vld [vmem:[#allocation16_spill] sm:$0xff] }
 0x2c7   : > { %7536 = vst [vmem:[#allocation62_spill] sm:$0xff] %v6453_v34  ;;  %v3465_v39 = vadd.f32 %v3353_v54, %v6033_v29  ;;  %v3017_v40 = vpop.permute.xlu0 %3016  ;;  %v6456_v9 = vpop.f32.mrb[103].mxu0  ;;  %v7551_v34 = vld [vmem:[#allocation18_spill] sm:$0xff] }
 0x2c8   : > { %7537 = vst [vmem:[#allocation63_spill] sm:$0xff] %v6456_v9  ;;  %v3466_v48 = vadd.f32 %v3354_v6, %v6038_v23  ;;  %v6459_v46 = vpop.f32.mrb[100].mxu1  ;;  %v3015_v38 = vpop.permute.xlu1 %3014 }
 0x2c9   : > { %7538 = vst [vmem:[#allocation64_spill] sm:$0xff] %v6459_v46  ;;  %3577 = vst [vmem:[%s6210_s24 + $0x2a8] sm:$0xff] %v3465_v39  ;;  %v3142_v62 = vsel %vm1463_vm0, %v3015_v38, %v3017_v40  ;;  %v6463_v49 = vpop.f32.mrb[101].mxu1 }
 0x2ca   : > { %7539 = vst [vmem:[#allocation65_spill] sm:$0xff] %v6463_v49  ;;  %3578 = vst [vmem:[%s6210_s24 + $0x2b0] sm:$0xff] %v3466_v48  ;;  %v3366_v12 = vadd.f32 %v3142_v62, %v7540_v10  ;;  %v6467_v19 = vpop.f32.mrb[102].mxu1  ;;  %v7546_v62 = vld [vmem:[#allocation14_spill] sm:$0xff] }
 0x2cb   : > { %7541 = vst [vmem:[#allocation7_spill] sm:$0xff] %v6467_v19  ;;  %v6469_v29 = vpop.f32.mrb[103].mxu1  ;;  %v6471_v54 = vpop.permute.xlu0 %3020 }
 0x2cc   : > { %7542 = vst [vmem:[#allocation66_spill] sm:$0xff] %v6469_v29  ;;  %v3478_v23 = vadd.f32 %v3366_v12, %v7543_v3  ;;  %v3019_v6 = vpop.permute.xlu1 %3018  ;;  %v6474_v15 = vpop.f32.mrb[104].mxu0  ;;  %v7547_v29 = vld [vmem:[#allocation8_spill] sm:$0xff]  ;;  %v7550_v3 = vld [vmem:[#allocation17_spill] sm:$0xff] }
 0x2cd   : > { %7544 = vst [vmem:[#allocation15_spill] sm:$0xff] %v6474_v15  ;;  %v3143_v39 = vsel %vm1463_vm0, %v3017_v40, %v3019_v6  ;;  %v3144_v48 = vsel %vm1463_vm0, %v3019_v6, %v6471_v54  ;;  %v6479_v38 = vpop.f32.mrb[105].mxu0 }
 0x2ce   : > { %7545 = vst [vmem:[#allocation67_spill] sm:$0xff] %v6479_v38  ;;  %3590 = vst [vmem:[%s6210_s24 + $0x310] sm:$0xff] %v3478_v23  ;;  %v3367_v10 = vadd.f32 %v3143_v39, %v7546_v62  ;;  %v3368_v49 = vadd.f32 %v3144_v48, %v7547_v29  ;;  %v6484_v19 = vpop.f32.mrb[106].mxu0 }
 0x2cf   : > { %7548 = vst [vmem:[#allocation14_spill] sm:$0xff] %v6484_v19  ;;  %v6486_v9 = vpop.f32.mrb[107].mxu0 }
 0x2d0   : > { %7549 = vst [vmem:[#allocation8_spill] sm:$0xff] %v6486_v9  ;;  %v3479_v12 = vadd.f32 %v3367_v10, %v7550_v3  ;;  %v3480_v15 = vadd.f32 %v3368_v49, %v7551_v34  ;;  %v6490_v46 = vpop.f32.mrb[104].mxu1 }
 0x2d1   : > { %7552 = vst [vmem:[#allocation17_spill] sm:$0xff] %v6490_v46  ;;  %v6492_v40 = vpop.f32.mrb[105].mxu1  ;;  %v7564_v46 = vld [vmem:[#allocation51_spill] sm:$0xff] }
 0x2d2   : > { %7553 = vst [vmem:[#allocation18_spill] sm:$0xff] %v6492_v40  ;;  %3591 = vst [vmem:[%s6210_s24 + $0x318] sm:$0xff] %v3479_v12  ;;  %v6496_v6 = vpop.f32.mrb[106].mxu1 }
 0x2d3   : > { %3592 = vst [vmem:[%s6210_s24 + $0x320] sm:$0xff] %v3480_v15  ;;  %7554 = vst [vmem:[#allocation68_spill] sm:$0xff] %v6496_v6  ;;  %v6498_v23 = vpop.f32.mrb[107].mxu1  ;;  %v6500_v39 = vpop.f32.mrb[108].mxu0 }
 0x2d4   : > { %7555 = vst [vmem:[#allocation69_spill] sm:$0xff] %v6498_v23  ;;  %7556 = vst [vmem:[#allocation70_spill] sm:$0xff] %v6500_v39  ;;  %v6502_v29 = vpop.f32.mrb[109].mxu0 }
 0x2d5   : > { %7557 = vst [vmem:[#allocation71_spill] sm:$0xff] %v6502_v29  ;;  %v6504_v48 = vpop.f32.mrb[110].mxu0 }
 0x2d6   : > { %7558 = vst [vmem:[#allocation72_spill] sm:$0xff] %v6504_v48  ;;  %v6506_v62 = vpop.f32.mrb[111].mxu0 }
 0x2d7   : > { %7559 = vst [vmem:[#allocation73_spill] sm:$0xff] %v6506_v62 }
 0x2d8   : > { %v6508_v10 = vpop.f32.mrb[108].mxu1 }
 0x2d9   : > { %7560 = vst [vmem:[#allocation74_spill] sm:$0xff] %v6508_v10  ;;  %v6510_v34 = vpop.f32.mrb[109].mxu1 }
 0x2da   : > { %7561 = vst [vmem:[#allocation75_spill] sm:$0xff] %v6510_v34  ;;  %v6512_v49 = vpop.f32.mrb[110].mxu1 }
 0x2db   : > { %7562 = vst [vmem:[#allocation76_spill] sm:$0xff] %v6512_v49  ;;  %v6514_v3 = vpop.f32.mrb[111].mxu1  ;;  %v2178_v15 = vpop.f32.mrb[112].mxu0 }
 0x2dc   : > { %7563 = vst [vmem:[#allocation77_spill] sm:$0xff] %v6514_v3  ;;  %2820 = vrot.lane.b32.xlu0 %v2178_v15, %s4427_s9  ;;  %v2180_v12 = vpop.f32.mrb[113].mxu0 }
 0x2dd   : > { %2822 = vrot.lane.b32.xlu1 %v2180_v12, %s4427_s9  ;;  %v2182_v23 = vpop.f32.mrb[114].mxu0 }
 0x2de   : > { %v2184_v40 = vpop.f32.mrb[115].mxu0 }
 0x2e0   : > { %v2331_v29 = vpop.f32.mrb[112].mxu1 }
 0x2e1   : > { %v2333_v48 = vpop.f32.mrb[113].mxu1  ;;  %2824 = vrot.lane.b32.xlu0 %v2331_v29, %s4427_s9 }
 0x2e2   : > { %v2335_v62 = vpop.f32.mrb[114].mxu1  ;;  %2826 = vrot.lane.b32.xlu1 %v2333_v48, %s4427_s9 }
 0x2e3   : > { %v2337_v34 = vpop.f32.mrb[115].mxu1  ;;  %v2188_v10 = vpop.f32.mrb[116].mxu0 }
 0x2e4   : > { %v2190_v49 = vpop.f32.mrb[117].mxu0 }
 0x2e5   : > { %2852 = vrot.lane.b32.xlu0 %v2184_v40, %s4427_s9  ;;  %v2192_v3 = vpop.f32.mrb[118].mxu0 }
 0x2e6   : > { %2850 = vrot.lane.b32.xlu1 %v2182_v23, %s4427_s9  ;;  %v2194_v15 = vpop.f32.mrb[119].mxu0 }
 0x2e8   : > { %v2341_v39 = vpop.f32.mrb[116].mxu1 }
 0x2e9   : > { %v2343_v12 = vpop.f32.mrb[117].mxu1  ;;  %2856 = vrot.lane.b32.xlu0 %v2337_v34, %s4427_s9 }
 0x2ea   : > { %v2345_v6 = vpop.f32.mrb[118].mxu1  ;;  %2854 = vrot.lane.b32.xlu1 %v2335_v62, %s4427_s9 }
 0x2eb   : > { %v2347_v29 = vpop.f32.mrb[119].mxu1  ;;  %v2198_v9 = vpop.f32.mrb[120].mxu0 }
 0x2ec   : > { %v2200_v19 = vpop.f32.mrb[121].mxu0 }
 0x2ed   : > { %2880 = vrot.lane.b32.xlu0 %v2188_v10, %s4427_s9  ;;  %v6525_v48 = vpop.f32.mrb[122].mxu0  ;;  %v7566_v10 = vld [vmem:[#allocation19_spill] sm:$0xff] }
 0x2ee   : > { %2882 = vrot.lane.b32.xlu1 %v2190_v49, %s4427_s9  ;;  %v2813_v40 = vpop.permute.xlu0 %2812  ;;  %v6528_v23 = vpop.f32.mrb[123].mxu0 }
 0x2ef   : > { %v3047_v38 = vsel %vm1463_vm0, %v7564_v46, %v2813_v40  ;;  %v2815_v34 = vpop.permute.xlu1 %2814 }
 0x2f0   : > { %v3271_v53 = vadd.f32 %v3047_v38, %v7565_v60  ;;  %v6533_v62 = vpop.f32.mrb[120].mxu1  ;;  %v3048_v61 = vsel %vm1463_vm0, %v2813_v40, %v2815_v34 }
 0x2f1   : > { %v3272_v63 = vadd.f32 %v3048_v61, %v7566_v10  ;;  %v6537_v16 = vpop.f32.mrb[121].mxu1  ;;  %2884 = vrot.lane.b32.xlu0 %v2341_v39, %s4427_s9  ;;  %v7568_v39 = vld [vmem:[#allocation20_spill] sm:$0xff] }
 0x2f2   : > { %v3383_v49 = vadd.f32 %v3271_v53, %v6252_v18  ;;  %v6541_v1 = vpop.f32.mrb[122].mxu1  ;;  %2886 = vrot.lane.b32.xlu1 %v2343_v12, %s4427_s9 }
 0x2f3   : > { %v3384_v46 = vadd.f32 %v3272_v63, %v6259_v2  ;;  %v6545_v60 = vpop.f32.mrb[123].mxu1  ;;  %v2817_v38 = vpop.permute.xlu0 %2816  ;;  %v7569_v63 = vld [vmem:[#allocation23_spill] sm:$0xff] }
 0x2f4   : > { %3495 = vst [vmem:[%s6210_s24 + $0x18] sm:$0xff] %v3383_v49  ;;  %v3049_v40 = vsel %vm1463_vm0, %v2815_v34, %v2817_v38  ;;  %v6549_v47 = vpop.permute.xlu1 %2818  ;;  %v6551_v61 = vpop.f32.mrb[124].mxu0 }
 0x2f5   : > { %7567 = vst [vmem:[#allocation51_spill] sm:$0xff] %v6549_v47  ;;  %3496 = vst [vmem:[%s6210_s24 + $0x20] sm:$0xff] %v3384_v46  ;;  %v3273_v18 = vadd.f32 %v3049_v40, %v7568_v39  ;;  %v3050_v53 = vsel %vm1463_vm0, %v2817_v38, %v6549_v47  ;;  %2912 = vrot.lane.b32.xlu0 %v2194_v15, %s4427_s9  ;;  %v6558_v2 = vpop.f32.mrb[125].mxu0 }
 0x2f6   : > { %v3274_v12 = vadd.f32 %v3050_v53, %v7569_v63  ;;  %2910 = vrot.lane.b32.xlu1 %v2192_v3, %s4427_s9  ;;  %v6562_v34 = vpop.f32.mrb[126].mxu0 }
 0x2f7   : > { %v3385_v10 = vadd.f32 %v3273_v18, %v6273_v56  ;;  %v2845_v49 = vpop.permute.xlu0 %2844  ;;  %v6565_v46 = vpop.f32.mrb[127].mxu0  ;;  %v7570_v56 = vld [vmem:[#allocation5_spill] sm:$0xff] }
 0x2f8   : > { %v3386_v40 = vadd.f32 %v3274_v12, %v6279_v42  ;;  %v6568_v39 = vpop.f32.mrb[124].mxu1  ;;  %v2843_v38 = vpop.permute.xlu1 %2842  ;;  %v7571_v18 = vld [vmem:[#allocation21_spill] sm:$0xff] }
 0x2f9   : > { %3497 = vst [vmem:[%s6210_s24 + $0x28] sm:$0xff] %v3385_v10  ;;  %v3061_v15 = vsel %vm1463_vm0, %v6249_v33, %v2843_v38  ;;  %v3062_v53 = vsel %vm1463_vm0, %v2843_v38, %v2845_v49  ;;  %v6574_v63 = vpop.f32.mrb[125].mxu1  ;;  %2916 = vrot.lane.b32.xlu0 %v2347_v29, %s4427_s9 }
 0x2fa   : > { %3498 = vst [vmem:[%s6210_s24 + $0x30] sm:$0xff] %v3386_v40  ;;  %v3285_v3 = vadd.f32 %v3061_v15, %v7570_v56  ;;  %v3286_v42 = vadd.f32 %v3062_v53, %v7571_v18  ;;  %v6580_v12 = vpop.f32.mrb[126].mxu1  ;;  %2914 = vrot.lane.b32.xlu1 %v2345_v6, %s4427_s9  ;;  %v7572_v6 = vld [vmem:[#allocation22_spill] sm:$0xff] }
 0x2fb   : > { %v6583_v10 = vpop.f32.mrb[127].mxu1  ;;  %v6585_v33 = vpop.permute.xlu0 %2848 }
 0x2fc   : > { %v3397_v38 = vadd.f32 %v3285_v3, %v6266_v32  ;;  %v3398_v28 = vadd.f32 %v3286_v42, %v6269_v57  ;;  %v2847_v29 = vpop.permute.xlu1 %2846  ;;  %v6589_v47 = vpop.f32.mrb[128].mxu0  ;;  %v7573_v32 = vld [vmem:[#allocation25_spill] sm:$0xff] }
 0x2fd   : > { %v3063_v40 = vsel %vm1463_vm0, %v2845_v49, %v2847_v29  ;;  %v3064_v15 = vsel %vm1463_vm0, %v2847_v29, %v6585_v33  ;;  %2940 = vrot.lane.b32.xlu0 %v2198_v9, %s4427_s9  ;;  %v6595_v53 = vpop.f32.mrb[129].mxu0 }
 0x2fe   : > { %3509 = vst [vmem:[%s6210_s24 + $0x88] sm:$0xff] %v3397_v38  ;;  %3510 = vst [vmem:[%s6210_s24 + $0x90] sm:$0xff] %v3398_v28  ;;  %v3287_v56 = vadd.f32 %v3063_v40, %v7572_v6  ;;  %v3288_v57 = vadd.f32 %v3064_v15, %v7573_v32  ;;  %2942 = vrot.lane.b32.xlu1 %v2200_v19, %s4427_s9  ;;  %v6602_v3 = vpop.f32.mrb[130].mxu0  ;;  %v7574_v40 = vld [vmem:[#allocation10_spill] sm:$0xff] }
 0x2ff   : > { %v2873_v49 = vpop.permute.xlu0 %2872  ;;  %v6604_v18 = vpop.f32.mrb[131].mxu0 }
 0x300   : > { %v3399_v42 = vadd.f32 %v3287_v56, %v6286_v50  ;;  %v3400_v9 = vadd.f32 %v3288_v57, %v6290_v17  ;;  %v3075_v28 = vsel %vm1463_vm0, %v6294_v43, %v2873_v49  ;;  %v6610_v38 = vpop.f32.mrb[128].mxu1  ;;  %v2875_v29 = vpop.permute.xlu1 %2874  ;;  %v7575_v50 = vld [vmem:[#allocation27_spill] sm:$0xff] }
 0x301   : > { %v3299_v6 = vadd.f32 %v3075_v28, %v7574_v40  ;;  %v3076_v19 = vsel %vm1463_vm0, %v2873_v49, %v2875_v29  ;;  %v6614_v15 = vpop.f32.mrb[129].mxu1  ;;  %2944 = vrot.lane.b32.xlu0 %v6533_v62, %s4427_s9 }
 0x302   : > { %3511 = vst [vmem:[%s6210_s24 + $0x98] sm:$0xff] %v3399_v42  ;;  %3512 = vst [vmem:[%s6210_s24 + $0xa0] sm:$0xff] %v3400_v9  ;;  %v3300_v17 = vadd.f32 %v3076_v19, %v7575_v50  ;;  %v6621_v56 = vpop.f32.mrb[130].mxu1  ;;  %2946 = vrot.lane.b32.xlu1 %v6537_v16, %s4427_s9  ;;  %v7576_v9 = vld [vmem:[#allocation28_spill] sm:$0xff] }
 0x303   : > { %v3411_v43 = vadd.f32 %v3299_v6, %v6296_v22  ;;  %v6626_v32 = vpop.f32.mrb[131].mxu1  ;;  %v2877_v57 = vpop.permute.xlu0 %2876 }
 0x304   : > { %v3412_v49 = vadd.f32 %v3300_v17, %v6303_v30  ;;  %v3077_v28 = vsel %vm1463_vm0, %v2875_v29, %v2877_v57  ;;  %v6630_v62 = vpop.permute.xlu1 %2878  ;;  %v6632_v42 = vpop.f32.mrb[132].mxu0  ;;  %v7577_v30 = vld [vmem:[#allocation31_spill] sm:$0xff] }
 0x305   : > { %3523 = vst [vmem:[%s6210_s24 + $0xf8] sm:$0xff] %v3411_v43  ;;  %v3301_v40 = vadd.f32 %v3077_v28, %v7576_v9  ;;  %v3078_v16 = vsel %vm1463_vm0, %v2877_v57, %v6630_v62  ;;  %2972 = vrot.lane.b32.xlu0 %v6528_v23, %s4427_s9  ;;  %v6640_v22 = vpop.f32.mrb[133].mxu0 }
 0x306   : > { %3524 = vst [vmem:[%s6210_s24 + $0x100] sm:$0xff] %v3412_v49  ;;  %v3302_v29 = vadd.f32 %v3078_v16, %v7577_v30  ;;  %2970 = vrot.lane.b32.xlu1 %v6525_v48, %s4427_s9  ;;  %v6646_v6 = vpop.f32.mrb[134].mxu0 }
 0x307   : > { %v3413_v19 = vadd.f32 %v3301_v40, %v6315_v5  ;;  %v2905_v50 = vpop.permute.xlu0 %2904  ;;  %v6649_v17 = vpop.f32.mrb[135].mxu0  ;;  %v7578_v5 = vld [vmem:[#allocation6_spill] sm:$0xff] }
 0x308   : > { %v3414_v43 = vadd.f32 %v3302_v29, %v6319_v24  ;;  %v6652_v57 = vpop.f32.mrb[132].mxu1  ;;  %v2903_v23 = vpop.permute.xlu1 %2902  ;;  %v7579_v24 = vld [vmem:[#allocation29_spill] sm:$0xff] }
 0x309   : > { %3525 = vst [vmem:[%s6210_s24 + $0x108] sm:$0xff] %v3413_v19  ;;  %v3089_v49 = vsel %vm1463_vm0, %v6331_v58, %v2903_v23  ;;  %v3090_v28 = vsel %vm1463_vm0, %v2903_v23, %v2905_v50  ;;  %v6658_v9 = vpop.f32.mrb[133].mxu1  ;;  %2976 = vrot.lane.b32.xlu0 %v6545_v60, %s4427_s9 }
 0x30a   : > { %3526 = vst [vmem:[%s6210_s24 + $0x110] sm:$0xff] %v3414_v43  ;;  %v3313_v48 = vadd.f32 %v3089_v49, %v7578_v5  ;;  %v3314_v40 = vadd.f32 %v3090_v28, %v7579_v24  ;;  %v6665_v16 = vpop.f32.mrb[134].mxu1  ;;  %2974 = vrot.lane.b32.xlu1 %v6541_v1, %s4427_s9  ;;  %v7580_v28 = vld [vmem:[#allocation30_spill] sm:$0xff]  ;;  %v7581_v5 = vld [vmem:[#allocation33_spill] sm:$0xff] }
 0x30b   : > { %v6669_v58 = vpop.f32.mrb[135].mxu1  ;;  %v6671_v30 = vpop.permute.xlu0 %2908 }
 0x30c   : > { %v3425_v29 = vadd.f32 %v3313_v48, %v6309_v36  ;;  %v3426_v60 = vadd.f32 %v3314_v40, %v6312_v51  ;;  %v2907_v19 = vpop.permute.xlu1 %2906  ;;  %v6675_v43 = vpop.f32.mrb[136].mxu0 }
 0x30d   : > { %v3091_v23 = vsel %vm1463_vm0, %v2905_v50, %v2907_v19  ;;  %v3092_v49 = vsel %vm1463_vm0, %v2907_v19, %v6671_v30  ;;  %3000 = vrot.lane.b32.xlu0 %v6551_v61, %s4427_s9  ;;  %v6682_v1 = vpop.f32.mrb[137].mxu0 }
 0x30e   : > { %3537 = vst [vmem:[%s6210_s24 + $0x168] sm:$0xff] %v3425_v29  ;;  %3538 = vst [vmem:[%s6210_s24 + $0x170] sm:$0xff] %v3426_v60  ;;  %v3315_v36 = vadd.f32 %v3091_v23, %v7580_v28  ;;  %v3316_v51 = vadd.f32 %v3092_v49, %v7581_v5  ;;  %3002 = vrot.lane.b32.xlu1 %v6558_v2, %s4427_s9  ;;  %v6690_v50 = vpop.f32.mrb[138].mxu0  ;;  %v7582_v23 = vld [vmem:[#allocation9_spill] sm:$0xff] }
 0x30f   : > { %v2933_v48 = vpop.permute.xlu0 %2932  ;;  %v6692_v24 = vpop.f32.mrb[139].mxu0 }
 0x310   : > { %v3427_v61 = vadd.f32 %v3315_v36, %v6325_v11  ;;  %v3428_v40 = vadd.f32 %v3316_v51, %v6329_v59  ;;  %v3103_v29 = vsel %vm1463_vm0, %v6372_v41, %v2933_v48  ;;  %v6698_v60 = vpop.f32.mrb[136].mxu1  ;;  %v2935_v19 = vpop.permute.xlu1 %2934  ;;  %v7583_v11 = vld [vmem:[#allocation35_spill] sm:$0xff] }
 0x311   : > { %v3327_v49 = vadd.f32 %v3103_v29, %v7582_v23  ;;  %v3104_v2 = vsel %vm1463_vm0, %v2933_v48, %v2935_v19  ;;  %v6702_v28 = vpop.f32.mrb[137].mxu1  ;;  %3004 = vrot.lane.b32.xlu0 %v6568_v39, %s4427_s9 }
 0x312   : > { %3539 = vst [vmem:[%s6210_s24 + $0x178] sm:$0xff] %v3427_v61  ;;  %3540 = vst [vmem:[%s6210_s24 + $0x180] sm:$0xff] %v3428_v40  ;;  %v3328_v59 = vadd.f32 %v3104_v2, %v7583_v11  ;;  %v6709_v36 = vpop.f32.mrb[138].mxu1  ;;  %3006 = vrot.lane.b32.xlu1 %v6574_v63, %s4427_s9  ;;  %v7584_v40 = vld [vmem:[#allocation36_spill] sm:$0xff] }
 0x313   : > { %v3439_v41 = vadd.f32 %v3327_v49, %v6334_v8  ;;  %v6714_v5 = vpop.f32.mrb[139].mxu1  ;;  %v2937_v51 = vpop.permute.xlu0 %2936 }
 0x314   : > { %v3440_v48 = vadd.f32 %v3328_v59, %v6341_v52  ;;  %v3105_v29 = vsel %vm1463_vm0, %v2935_v19, %v2937_v51  ;;  %v6718_v39 = vpop.permute.xlu1 %2938  ;;  %v6720_v61 = vpop.f32.mrb[140].mxu0  ;;  %v7585_v52 = vld [vmem:[#allocation39_spill] sm:$0xff] }
 0x315   : > { %3551 = vst [vmem:[%s6210_s24 + $0x1d8] sm:$0xff] %v3439_v41  ;;  %v3329_v23 = vadd.f32 %v3105_v29, %v7584_v40  ;;  %v3106_v63 = vsel %vm1463_vm0, %v2937_v51, %v6718_v39  ;;  %3032 = vrot.lane.b32.xlu0 %v6565_v46, %s4427_s9  ;;  %v6728_v8 = vpop.f32.mrb[141].mxu0 }
 0x316   : > { %3552 = vst [vmem:[%s6210_s24 + $0x1e0] sm:$0xff] %v3440_v48  ;;  %v3330_v19 = vadd.f32 %v3106_v63, %v7585_v52  ;;  %3030 = vrot.lane.b32.xlu1 %v6562_v34, %s4427_s9  ;;  %v6734_v49 = vpop.f32.mrb[142].mxu0 }
 0x317   : > { %v3441_v2 = vadd.f32 %v3329_v23, %v6354_v13  ;;  %v2965_v11 = vpop.permute.xlu0 %2964  ;;  %v6737_v59 = vpop.f32.mrb[143].mxu0  ;;  %v7586_v13 = vld [vmem:[#allocation12_spill] sm:$0xff] }
 0x318   : > { %v3442_v41 = vadd.f32 %v3330_v19, %v6357_v21  ;;  %v6740_v51 = vpop.f32.mrb[140].mxu1  ;;  %v2963_v46 = vpop.permute.xlu1 %2962  ;;  %v7587_v21 = vld [vmem:[#allocation37_spill] sm:$0xff] }
 0x319   : > { %3553 = vst [vmem:[%s6210_s24 + $0x1e8] sm:$0xff] %v3441_v2  ;;  %v3117_v48 = vsel %vm1463_vm0, %v6409_v4, %v2963_v46  ;;  %v3118_v29 = vsel %vm1463_vm0, %v2963_v46, %v2965_v11  ;;  %v6746_v40 = vpop.f32.mrb[141].mxu1  ;;  %3036 = vrot.lane.b32.xlu0 %v6583_v10, %s4427_s9 }
 0x31a   : > { %3554 = vst [vmem:[%s6210_s24 + $0x1f0] sm:$0xff] %v3442_v41  ;;  %v3341_v34 = vadd.f32 %v3117_v48, %v7586_v13  ;;  %v3342_v23 = vadd.f32 %v3118_v29, %v7587_v21  ;;  %v6753_v63 = vpop.f32.mrb[142].mxu1  ;;  %3034 = vrot.lane.b32.xlu1 %v6580_v12, %s4427_s9  ;;  %v7591_v12 = vld [vmem:[#allocation38_spill] sm:$0xff]  ;;  %v7592_v21 = vld [vmem:[#allocation41_spill] sm:$0xff] }
 0x31b   : > { %v6757_v4 = vpop.f32.mrb[143].mxu1  ;;  %v6759_v52 = vpop.permute.xlu0 %2968 }
 0x31c   : > { %7588 = vst [vmem:[#allocation16_spill] sm:$0xff] %v6757_v4  ;;  %v3453_v19 = vadd.f32 %v3341_v34, %v6348_v14  ;;  %v3454_v2 = vadd.f32 %v3342_v23, %v6350_v44  ;;  %v2967_v10 = vpop.permute.xlu1 %2966  ;;  %v6763_v46 = vpop.f32.mrb[144].mxu0 }
 0x31d   : > { %7589 = vst [vmem:[#allocation19_spill] sm:$0xff] %v6763_v46  ;;  %v3119_v41 = vsel %vm1463_vm0, %v2965_v11, %v2967_v10  ;;  %v3120_v48 = vsel %vm1463_vm0, %v2967_v10, %v6759_v52  ;;  %v6768_v29 = vpop.f32.mrb[145].mxu0 }
 0x31e   : > { %7590 = vst [vmem:[#allocation20_spill] sm:$0xff] %v6768_v29  ;;  %3565 = vst [vmem:[%s6210_s24 + $0x248] sm:$0xff] %v3453_v19  ;;  %v3343_v13 = vadd.f32 %v3119_v41, %v7591_v12  ;;  %v3344_v14 = vadd.f32 %v3120_v48, %v7592_v21  ;;  %v6774_v34 = vpop.f32.mrb[146].mxu0  ;;  %v7595_v12 = vld [vmem:[#allocation43_spill] sm:$0xff] }
 0x31f   : > { %3566 = vst [vmem:[%s6210_s24 + $0x250] sm:$0xff] %v3454_v2  ;;  %v2993_v44 = vpop.permute.xlu0 %2992  ;;  %v6776_v23 = vpop.f32.mrb[147].mxu0  ;;  %v7594_v2 = vld [vmem:[#allocation11_spill] sm:$0xff] }
 0x320   : > { %7593 = vst [vmem:[#allocation23_spill] sm:$0xff] %v6776_v23  ;;  %v3455_v11 = vadd.f32 %v3343_v13, %v6364_v37  ;;  %v3456_v46 = vadd.f32 %v3344_v14, %v6368_v26  ;;  %v3131_v10 = vsel %vm1463_vm0, %v6442_v35, %v2993_v44  ;;  %v2597_v29 = vpop.f32.mrb[144].mxu1  ;;  %v2995_v19 = vpop.permute.xlu1 %2994 }
 0x321   : > { %v3355_v4 = vadd.f32 %v3131_v10, %v7594_v2  ;;  %v3132_v41 = vsel %vm1463_vm0, %v2993_v44, %v2995_v19  ;;  %v2598_v48 = vpop.f32.mrb[145].mxu1  ;;  %v7596_v44 = vld [vmem:[#allocation44_spill] sm:$0xff] }
 0x322   : > { %3567 = vst [vmem:[%s6210_s24 + $0x258] sm:$0xff] %v3455_v11  ;;  %3568 = vst [vmem:[%s6210_s24 + $0x260] sm:$0xff] %v3456_v46  ;;  %v3356_v21 = vadd.f32 %v3132_v41, %v7595_v12  ;;  %v2599_v23 = vpop.f32.mrb[146].mxu1 }
 0x323   : > { %v3467_v37 = vadd.f32 %v3355_v4, %v6374_v7  ;;  %v2600_v26 = vpop.f32.mrb[147].mxu1  ;;  %v2997_v13 = vpop.permute.xlu0 %2996  ;;  %v7597_v7 = vld [vmem:[#allocation47_spill] sm:$0xff] }
 0x324   : > { %v3468_v35 = vadd.f32 %v3356_v21, %v6381_v31  ;;  %v3133_v29 = vsel %vm1463_vm0, %v2995_v19, %v2997_v13  ;;  %v6790_v14 = vpop.permute.xlu1 %2998  ;;  %v6792_v10 = vpop.f32.mrb[148].mxu0 }
 0x325   : > { %3579 = vst [vmem:[%s6210_s24 + $0x2b8] sm:$0xff] %v3467_v37  ;;  %v3357_v11 = vadd.f32 %v3133_v29, %v7596_v44  ;;  %v3134_v46 = vsel %vm1463_vm0, %v2997_v13, %v6790_v14  ;;  %v6798_v23 = vpop.f32.mrb[149].mxu0 }
 0x326   : > { %3580 = vst [vmem:[%s6210_s24 + $0x2c0] sm:$0xff] %v3468_v35  ;;  %v3358_v4 = vadd.f32 %v3134_v46, %v7597_v7  ;;  %v6802_v31 = vpop.f32.mrb[150].mxu0  ;;  %v7598_v35 = vld [vmem:[#allocation13_spill] sm:$0xff] }
 0x327   : > { %v3469_v19 = vadd.f32 %v3357_v11, %v6393_v55  ;;  %v3025_v2 = vpop.permute.xlu0 %3024  ;;  %v6805_v41 = vpop.f32.mrb[151].mxu0  ;;  %v7599_v55 = vld [vmem:[#allocation45_spill] sm:$0xff] }
 0x328   : > { %v3470_v48 = vadd.f32 %v3358_v4, %v6397_v20  ;;  %v2603_v12 = vpop.f32.mrb[148].mxu1  ;;  %v3023_v21 = vpop.permute.xlu1 %3022 }
 0x329   : > { %3581 = vst [vmem:[%s6210_s24 + $0x2c8] sm:$0xff] %v3469_v19  ;;  %v3145_v37 = vsel %vm1463_vm0, %v6471_v54, %v3023_v21  ;;  %v3146_v26 = vsel %vm1463_vm0, %v3023_v21, %v3025_v2  ;;  %v2604_v13 = vpop.f32.mrb[149].mxu1 }
 0x32a   : > { %3582 = vst [vmem:[%s6210_s24 + $0x2d0] sm:$0xff] %v3470_v48  ;;  %v3369_v29 = vadd.f32 %v3145_v37, %v7598_v35  ;;  %v3370_v44 = vadd.f32 %v3146_v26, %v7599_v55  ;;  %v2605_v11 = vpop.f32.mrb[150].mxu1  ;;  %v7602_v37 = vld [vmem:[#allocation46_spill] sm:$0xff]  ;;  %v7603_v13 = vld [vmem:[#allocation49_spill] sm:$0xff] }
 0x32b   : > { %v2606_v46 = vpop.f32.mrb[151].mxu1  ;;  %v6815_v7 = vpop.permute.xlu0 %3028 }
 0x32c   : > { %v3481_v20 = vadd.f32 %v3369_v29, %v6387_v45  ;;  %v3482_v4 = vadd.f32 %v3370_v44, %v6390_v27  ;;  %v3027_v54 = vpop.permute.xlu1 %3026  ;;  %v6819_v19 = vpop.f32.mrb[152].mxu0 }
 0x32d   : > { %7600 = vst [vmem:[#allocation5_spill] sm:$0xff] %v6819_v19  ;;  %v3147_v12 = vsel %vm1463_vm0, %v3025_v2, %v3027_v54  ;;  %v3148_v48 = vsel %vm1463_vm0, %v3027_v54, %v6815_v7  ;;  %v6824_v21 = vpop.f32.mrb[153].mxu0 }
 0x32e   : > { %7601 = vst [vmem:[#allocation21_spill] sm:$0xff] %v6824_v21  ;;  %3593 = vst [vmem:[%s6210_s24 + $0x328] sm:$0xff] %v3481_v20  ;;  %v3371_v26 = vadd.f32 %v3147_v12, %v7602_v37  ;;  %v3372_v45 = vadd.f32 %v3148_v48, %v7603_v13  ;;  %v6830_v35 = vpop.f32.mrb[154].mxu0 }
 0x32f   : > { %3594 = vst [vmem:[%s6210_s24 + $0x330] sm:$0xff] %v3482_v4  ;;  %7604 = vst [vmem:[#allocation22_spill] sm:$0xff] %v6830_v35  ;;  %v6832_v27 = vpop.f32.mrb[155].mxu0 }
 0x330   : > { %7605 = vst [vmem:[#allocation25_spill] sm:$0xff] %v6832_v27  ;;  %v3483_v29 = vadd.f32 %v3371_v26, %v6403_v25  ;;  %v3484_v55 = vadd.f32 %v3372_v45, %v6407_v0  ;;  %v2609_v2 = vpop.f32.mrb[152].mxu1 }
 0x331   : > { %v2610_v44 = vpop.f32.mrb[153].mxu1 }
 0x332   : > { %3595 = vst [vmem:[%s6210_s24 + $0x338] sm:$0xff] %v3483_v29  ;;  %3596 = vst [vmem:[%s6210_s24 + $0x340] sm:$0xff] %v3484_v55  ;;  %v2611_v11 = vpop.f32.mrb[154].mxu1 }
 0x333   : > { %v2612_v46 = vpop.f32.mrb[155].mxu1  ;;  %v6838_v20 = vpop.f32.mrb[156].mxu0 }
 0x334   : > { %7606 = vst [vmem:[#allocation10_spill] sm:$0xff] %v6838_v20  ;;  %v6840_v4 = vpop.f32.mrb[157].mxu0 }
 0x335   : > { %7607 = vst [vmem:[#allocation27_spill] sm:$0xff] %v6840_v4  ;;  %v6842_v54 = vpop.f32.mrb[158].mxu0 }
 0x336   : > { %7608 = vst [vmem:[#allocation28_spill] sm:$0xff] %v6842_v54  ;;  %v6844_v12 = vpop.f32.mrb[159].mxu0 }
 0x337   : > { %7609 = vst [vmem:[#allocation31_spill] sm:$0xff] %v6844_v12  ;;  %v7610_v12 = vld [vmem:[#allocation51_spill] sm:$0xff] }
 0x338   : > { %v2615_v48 = vpop.f32.mrb[156].mxu1 }
 0x339   : > { %v2616_v37 = vpop.f32.mrb[157].mxu1 }
 0x33a   : > { %v2617_v13 = vpop.f32.mrb[158].mxu1 }
 0x33b   : > { %v2618_v25 = vpop.f32.mrb[159].mxu1  ;;  %v2484_v26 = vpop.f32.mrb[160].mxu0 }
 0x33c   : > { %2828 = vrot.lane.b32.xlu0 %v2484_v26, %s4427_s9  ;;  %v2486_v0 = vpop.f32.mrb[161].mxu0 }
 0x33d   : > { %2830 = vrot.lane.b32.xlu1 %v2486_v0, %s4427_s9  ;;  %v2488_v45 = vpop.f32.mrb[162].mxu0 }
 0x33e   : > { %v2490_v29 = vpop.f32.mrb[163].mxu0 }
 0x340   : > { %v2621_v55 = vpop.f32.mrb[160].mxu1 }
 0x341   : > { %v2623_v2 = vpop.f32.mrb[161].mxu1  ;;  %2832 = vrot.lane.b32.xlu0 %v2621_v55, %s4427_s9  ;;  %2858 = vrot.lane.b32.xlu1 %v2488_v45, %s4427_s9 }
 0x342   : > { %v2624_v44 = vpop.f32.mrb[162].mxu1 }
 0x343   : > { %v2626_v11 = vpop.f32.mrb[163].mxu1  ;;  %v2494_v46 = vpop.f32.mrb[164].mxu0 }
 0x344   : > { %v2496_v48 = vpop.f32.mrb[165].mxu0 }
 0x345   : > { %2860 = vrot.lane.b32.xlu0 %v2490_v29, %s4427_s9  ;;  %2862 = vrot.lane.b32.xlu1 %v2624_v44, %s4427_s9  ;;  %v2498_v37 = vpop.f32.mrb[166].mxu0 }
 0x346   : > { %v2500_v13 = vpop.f32.mrb[167].mxu0 }
 0x348   : > { %v2629_v25 = vpop.f32.mrb[164].mxu1 }
 0x349   : > { %2888 = vrot.lane.b32.xlu0 %v2494_v46, %s4427_s9  ;;  %2890 = vrot.lane.b32.xlu1 %v2496_v48, %s4427_s9  ;;  %v2631_v26 = vpop.f32.mrb[165].mxu1  ;;  %v7611_v46 = vld [vmem:[#allocation24_spill] sm:$0xff] }
 0x34a   : > { %v2632_v0 = vpop.f32.mrb[166].mxu1 }
 0x34b   : > { %v2634_v55 = vpop.f32.mrb[167].mxu1  ;;  %v2504_v2 = vpop.f32.mrb[168].mxu0 }
 0x34c   : > { %v2506_v45 = vpop.f32.mrb[169].mxu0  ;;  %v7612_v55 = vld [vmem:[#allocation52_spill] sm:$0xff] }
 0x34d   : > { %2892 = vrot.lane.b32.xlu0 %v2629_v25, %s4427_s9  ;;  %2918 = vrot.lane.b32.xlu1 %v2498_v37, %s4427_s9  ;;  %v2508_v11 = vpop.f32.mrb[170].mxu0 }
 0x34e   : > { %v2821_v29 = vpop.permute.xlu0 %2820  ;;  %v2510_v44 = vpop.f32.mrb[171].mxu0 }
 0x34f   : > { %v3051_v54 = vsel %vm1463_vm0, %v7610_v12, %v2821_v29  ;;  %v2823_v4 = vpop.permute.xlu1 %2822 }
 0x350   : > { %v3275_v20 = vadd.f32 %v3051_v54, %v7611_v46  ;;  %v3052_v48 = vsel %vm1463_vm0, %v2821_v29, %v2823_v4  ;;  %v2637_v26 = vpop.f32.mrb[168].mxu1 }
 0x351   : > { %v3276_v27 = vadd.f32 %v3052_v48, %v7612_v55  ;;  %2920 = vrot.lane.b32.xlu0 %v2500_v13, %s4427_s9  ;;  %2922 = vrot.lane.b32.xlu1 %v2632_v0, %s4427_s9  ;;  %v2639_v37 = vpop.f32.mrb[169].mxu1  ;;  %v7613_v48 = vld [vmem:[#allocation53_spill] sm:$0xff] }
 0x352   : > { %v3387_v25 = vadd.f32 %v3275_v20, %v6589_v47  ;;  %v2640_v35 = vpop.f32.mrb[170].mxu1 }
 0x353   : > { %v3388_v21 = vadd.f32 %v3276_v27, %v6595_v53  ;;  %v2825_v12 = vpop.permute.xlu0 %2824  ;;  %v2642_v19 = vpop.f32.mrb[171].mxu1  ;;  %v7614_v53 = vld [vmem:[#allocation56_spill] sm:$0xff] }
 0x354   : > { %3499 = vst [vmem:[%s6210_s24 + $0x38] sm:$0xff] %v3387_v25  ;;  %v3053_v54 = vsel %vm1463_vm0, %v2823_v4, %v2825_v12  ;;  %v6867_v46 = vpop.permute.xlu1 %2826  ;;  %v2514_v29 = vpop.f32.mrb[172].mxu0 }
 0x355   : > { %3500 = vst [vmem:[%s6210_s24 + $0x40] sm:$0xff] %v3388_v21  ;;  %v3277_v13 = vadd.f32 %v3053_v54, %v7613_v48  ;;  %v3054_v0 = vsel %vm1463_vm0, %v2825_v12, %v6867_v46  ;;  %2948 = vrot.lane.b32.xlu0 %v2504_v2, %s4427_s9  ;;  %2950 = vrot.lane.b32.xlu1 %v2506_v45, %s4427_s9  ;;  %v2516_v47 = vpop.f32.mrb[173].mxu0  ;;  %v7616_v48 = vld [vmem:[#allocation54_spill] sm:$0xff] }
 0x356   : > { %v3278_v19 = vadd.f32 %v3054_v0, %v7614_v53  ;;  %v2518_v27 = vpop.f32.mrb[174].mxu0 }
 0x357   : > { %v3389_v20 = vadd.f32 %v3277_v13, %v6610_v38  ;;  %v2853_v4 = vpop.permute.xlu0 %2852  ;;  %v6877_v55 = vpop.f32.mrb[175].mxu0  ;;  %v7615_v38 = vld [vmem:[#allocation26_spill] sm:$0xff] }
 0x358   : > { %v3390_v21 = vadd.f32 %v3278_v19, %v6614_v15  ;;  %v2851_v37 = vpop.permute.xlu1 %2850  ;;  %v2645_v25 = vpop.f32.mrb[172].mxu1 }
 0x359   : > { %3501 = vst [vmem:[%s6210_s24 + $0x48] sm:$0xff] %v3389_v20  ;;  %v3065_v2 = vsel %vm1463_vm0, %v6585_v33, %v2851_v37  ;;  %v3066_v45 = vsel %vm1463_vm0, %v2851_v37, %v2853_v4  ;;  %2952 = vrot.lane.b32.xlu0 %v2637_v26, %s4427_s9  ;;  %2978 = vrot.lane.b32.xlu1 %v2508_v11, %s4427_s9  ;;  %v2647_v12 = vpop.f32.mrb[173].mxu1 }
 0x35a   : > { %3502 = vst [vmem:[%s6210_s24 + $0x50] sm:$0xff] %v3390_v21  ;;  %v3289_v54 = vadd.f32 %v3065_v2, %v7615_v38  ;;  %v3290_v15 = vadd.f32 %v3066_v45, %v7616_v48  ;;  %v2648_v13 = vpop.f32.mrb[174].mxu1  ;;  %v7617_v2 = vld [vmem:[#allocation55_spill] sm:$0xff] }
 0x35b   : > { %v6889_v0 = vpop.permute.xlu0 %2856  ;;  %v2650_v53 = vpop.f32.mrb[175].mxu1 }
 0x35c   : > { %v3401_v33 = vadd.f32 %v3289_v54, %v6602_v3  ;;  %v3402_v19 = vadd.f32 %v3290_v15, %v6604_v18  ;;  %v2855_v20 = vpop.permute.xlu1 %2854  ;;  %v6893_v26 = vpop.f32.mrb[176].mxu0  ;;  %v7618_v18 = vld [vmem:[#allocation58_spill] sm:$0xff]  ;;  %v7619_v53 = vld [vmem:[#allocation32_spill] sm:$0xff] }
 0x35d   : > { %v3067_v11 = vsel %vm1463_vm0, %v2853_v4, %v2855_v20  ;;  %v3068_v21 = vsel %vm1463_vm0, %v2855_v20, %v6889_v0  ;;  %2980 = vrot.lane.b32.xlu0 %v2510_v44, %s4427_s9  ;;  %2982 = vrot.lane.b32.xlu1 %v2640_v35, %s4427_s9  ;;  %v6900_v37 = vpop.f32.mrb[177].mxu0 }
 0x35e   : > { %3513 = vst [vmem:[%s6210_s24 + $0xa8] sm:$0xff] %v3401_v33  ;;  %3514 = vst [vmem:[%s6210_s24 + $0xb0] sm:$0xff] %v3402_v19  ;;  %v3291_v3 = vadd.f32 %v3067_v11, %v7617_v2  ;;  %v3292_v45 = vadd.f32 %v3068_v21, %v7618_v18  ;;  %v6906_v12 = vpop.f32.mrb[178].mxu0 }
 0x35f   : > { %v2881_v4 = vpop.permute.xlu0 %2880  ;;  %v6908_v38 = vpop.f32.mrb[179].mxu0 }
 0x360   : > { %v3403_v54 = vadd.f32 %v3291_v3, %v6621_v56  ;;  %v3404_v44 = vadd.f32 %v3292_v45, %v6626_v32  ;;  %v3079_v35 = vsel %vm1463_vm0, %v6630_v62, %v2881_v4  ;;  %v2883_v48 = vpop.permute.xlu1 %2882  ;;  %v6914_v15 = vpop.f32.mrb[176].mxu1  ;;  %v7620_v56 = vld [vmem:[#allocation60_spill] sm:$0xff]  ;;  %v7621_v45 = vld [vmem:[#allocation61_spill] sm:$0xff] }
 0x361   : > { %v3303_v33 = vadd.f32 %v3079_v35, %v7619_v53  ;;  %v3080_v19 = vsel %vm1463_vm0, %v2881_v4, %v2883_v48  ;;  %3008 = vrot.lane.b32.xlu0 %v2514_v29, %s4427_s9  ;;  %3010 = vrot.lane.b32.xlu1 %v2516_v47, %s4427_s9  ;;  %v2655_v20 = vpop.f32.mrb[177].mxu1 }
 0x362   : > { %3515 = vst [vmem:[%s6210_s24 + $0xb8] sm:$0xff] %v3403_v54  ;;  %3516 = vst [vmem:[%s6210_s24 + $0xc0] sm:$0xff] %v3404_v44  ;;  %v3304_v32 = vadd.f32 %v3080_v19, %v7620_v56  ;;  %v6923_v11 = vpop.f32.mrb[178].mxu1  ;;  %v7622_v44 = vld [vmem:[#allocation64_spill] sm:$0xff] }
 0x363   : > { %v3415_v62 = vadd.f32 %v3303_v33, %v6632_v42  ;;  %v2885_v21 = vpop.permute.xlu0 %2884  ;;  %v6926_v2 = vpop.f32.mrb[180].mxu0 }
 0x364   : > { %v3416_v3 = vadd.f32 %v3304_v32, %v6640_v22  ;;  %v3081_v18 = vsel %vm1463_vm0, %v2883_v48, %v2885_v21  ;;  %v6930_v29 = vpop.permute.xlu1 %2886  ;;  %v6932_v47 = vpop.f32.mrb[181].mxu0 }
 0x365   : > { %3527 = vst [vmem:[%s6210_s24 + $0x118] sm:$0xff] %v3415_v62  ;;  %v3305_v4 = vadd.f32 %v3081_v18, %v7621_v45  ;;  %v3082_v54 = vsel %vm1463_vm0, %v2885_v21, %v6930_v29  ;;  %3012 = vrot.lane.b32.xlu0 %v2645_v25, %s4427_s9  ;;  %3038 = vrot.lane.b32.xlu1 %v2518_v27, %s4427_s9  ;;  %v2658_v42 = vpop.f32.mrb[179].mxu1  ;;  %v6940_v22 = vpop.f32.mrb[182].mxu0  ;;  %v7624_v62 = vld [vmem:[#allocation62_spill] sm:$0xff] }
 0x366   : > { %3528 = vst [vmem:[%s6210_s24 + $0x120] sm:$0xff] %v3416_v3  ;;  %v3306_v35 = vadd.f32 %v3082_v54, %v7622_v44  ;;  %v6944_v48 = vpop.f32.mrb[183].mxu0 }
 0x367   : > { %v3417_v53 = vadd.f32 %v3305_v4, %v6652_v57  ;;  %v2913_v33 = vpop.permute.xlu0 %2912  ;;  %v7623_v57 = vld [vmem:[#allocation34_spill] sm:$0xff] }
 0x368   : > { %v3418_v19 = vadd.f32 %v3306_v35, %v6658_v9  ;;  %v2911_v20 = vpop.permute.xlu1 %2910  ;;  %v6948_v56 = vpop.f32.mrb[180].mxu1 }
 0x369   : > { %3529 = vst [vmem:[%s6210_s24 + $0x128] sm:$0xff] %v3417_v53  ;;  %v3093_v27 = vsel %vm1463_vm0, %v6671_v30, %v2911_v20  ;;  %v3094_v25 = vsel %vm1463_vm0, %v2911_v20, %v2913_v33  ;;  %3040 = vrot.lane.b32.xlu0 %v6877_v55, %s4427_s9  ;;  %3042 = vrot.lane.b32.xlu1 %v2648_v13, %s4427_s9  ;;  %v2663_v32 = vpop.f32.mrb[181].mxu1  ;;  %v7625_v53 = vld [vmem:[#allocation63_spill] sm:$0xff]  ;;  %s4178_s9 = smul.u32 (%p4500_p8), 112, %s3928_s17 }
 0x36a   : > { %3530 = vst [vmem:[%s6210_s24 + $0x130] sm:$0xff] %v3418_v19  ;;  %v3317_v9 = vadd.f32 %v3093_v27, %v7623_v57  ;;  %v3318_v21 = vadd.f32 %v3094_v25, %v7624_v62  ;;  %v6960_v3 = vpop.f32.mrb[182].mxu1  ;;  %v7627_v62 = vld [vmem:[#allocation40_spill] sm:$0xff] }
 0x36b   : > { %v6962_v18 = vpop.permute.xlu0 %2916  ;;  %v6964_v30 = vpop.f32.mrb[184].mxu0  ;;  %s7198_s12 = scalar_lea.vmem (%p4500_p8), %s7437_s3, %s4178_s9 }
 0x36c   : > { %v3429_v45 = vadd.f32 %v3317_v9, %v6646_v6  ;;  %v3430_v55 = vadd.f32 %v3318_v21, %v6649_v17  ;;  %v2915_v4 = vpop.permute.xlu1 %2914  ;;  %v6968_v13 = vpop.f32.mrb[185].mxu0  ;;  %v7626_v6 = vld [vmem:[#allocation7_spill] sm:$0xff] }
 0x36d   : > { %v3095_v54 = vsel %vm1463_vm0, %v2913_v33, %v2915_v4  ;;  %v3096_v42 = vsel %vm1463_vm0, %v2915_v4, %v6962_v18  ;;  %v2666_v44 = vpop.f32.mrb[183].mxu1  ;;  %v6973_v35 = vpop.f32.mrb[186].mxu0  ;;  %v7628_v4 = vld [vmem:[#allocation15_spill] sm:$0xff] }
 0x36e   : > { %3541 = vst [vmem:[%s6210_s24 + $0x188] sm:$0xff] %v3429_v45  ;;  %3542 = vst [vmem:[%s6210_s24 + $0x190] sm:$0xff] %v3430_v55  ;;  %v3319_v19 = vadd.f32 %v3095_v54, %v7625_v53  ;;  %v3320_v20 = vadd.f32 %v3096_v42, %v7626_v6  ;;  %v6979_v17 = vpop.f32.mrb[187].mxu0 }
 0x36f   : > { %v2941_v27 = vpop.permute.xlu0 %2940 }
 0x370   : > { %v3431_v25 = vadd.f32 %v3319_v19, %v6665_v16  ;;  %v3432_v33 = vadd.f32 %v3320_v20, %v6669_v58  ;;  %v3107_v32 = vsel %vm1463_vm0, %v6718_v39, %v2941_v27  ;;  %v2943_v57 = vpop.permute.xlu1 %2942  ;;  %v6985_v9 = vpop.f32.mrb[184].mxu1  ;;  %v7629_v20 = vld [vmem:[#allocation67_spill] sm:$0xff] }
 0x371   : > { %v3331_v21 = vadd.f32 %v3107_v32, %v7627_v62  ;;  %v3108_v45 = vsel %vm1463_vm0, %v2941_v27, %v2943_v57  ;;  %v2671_v55 = vpop.f32.mrb[185].mxu1 }
 0x372   : > { %3543 = vst [vmem:[%s6210_s24 + $0x198] sm:$0xff] %v3431_v25  ;;  %3544 = vst [vmem:[%s6210_s24 + $0x1a0] sm:$0xff] %v3432_v33  ;;  %v3332_v54 = vadd.f32 %v3108_v45, %v7628_v4  ;;  %v6992_v16 = vpop.f32.mrb[186].mxu1 }
 0x373   : > { %v3443_v58 = vadd.f32 %v3331_v21, %v6675_v43  ;;  %v2945_v42 = vpop.permute.xlu0 %2944  ;;  %v6995_v39 = vpop.f32.mrb[188].mxu0  ;;  %v7630_v43 = vld [vmem:[#allocation17_spill] sm:$0xff] }
 0x374   : > { %v3444_v44 = vadd.f32 %v3332_v54, %v6682_v1  ;;  %v3109_v53 = vsel %vm1463_vm0, %v2943_v57, %v2945_v42  ;;  %v6999_v19 = vpop.permute.xlu1 %2946  ;;  %v2674_v6 = vpop.f32.mrb[187].mxu1 }
 0x375   : > { %3555 = vst [vmem:[%s6210_s24 + $0x1f8] sm:$0xff] %v3443_v58  ;;  %v3333_v27 = vadd.f32 %v3109_v53, %v7629_v20  ;;  %v3110_v25 = vsel %vm1463_vm0, %v2945_v42, %v6999_v19  ;;  %v7005_v33 = vpop.f32.mrb[189].mxu0  ;;  %v7632_v53 = vld [vmem:[#allocation14_spill] sm:$0xff] }
 0x376   : > { %3556 = vst [vmem:[%s6210_s24 + $0x200] sm:$0xff] %v3444_v44  ;;  %v3334_v32 = vadd.f32 %v3110_v25, %v7630_v43  ;;  %v7009_v62 = vpop.f32.mrb[190].mxu0  ;;  %v7631_v44 = vld [vmem:[#allocation42_spill] sm:$0xff] }
 0x377   : > { %v3445_v1 = vadd.f32 %v3333_v27, %v6698_v60  ;;  %v2973_v57 = vpop.permute.xlu0 %2972  ;;  %v7012_v21 = vpop.f32.mrb[191].mxu0 }
 0x378   : > { %v3446_v45 = vadd.f32 %v3334_v32, %v6702_v28  ;;  %v2971_v55 = vpop.permute.xlu1 %2970  ;;  %v7015_v4 = vpop.f32.mrb[188].mxu1 }
 0x379   : > { %3557 = vst [vmem:[%s6210_s24 + $0x208] sm:$0xff] %v3445_v1  ;;  %v3121_v54 = vsel %vm1463_vm0, %v6759_v52, %v2971_v55  ;;  %v3122_v58 = vsel %vm1463_vm0, %v2971_v55, %v2973_v57  ;;  %v2679_v42 = vpop.f32.mrb[189].mxu1 }
 0x37a   : > { %3558 = vst [vmem:[%s6210_s24 + $0x210] sm:$0xff] %v3446_v45  ;;  %v3345_v60 = vadd.f32 %v3121_v54, %v7631_v44  ;;  %v3346_v6 = vadd.f32 %v3122_v58, %v7632_v53  ;;  %v7024_v20 = vpop.f32.mrb[190].mxu1  ;;  %v7633_v45 = vld [vmem:[#allocation8_spill] sm:$0xff] }
 0x37b   : > { %v7026_v28 = vpop.permute.xlu0 %2976  ;;  %v2682_v27 = vpop.f32.mrb[191].mxu1  ;;  %v7634_v54 = vld [vmem:[#allocation68_spill] sm:$0xff] }
 0x37c   : > { %v3457_v25 = vadd.f32 %v3345_v60, %v6690_v50  ;;  %v3458_v43 = vadd.f32 %v3346_v6, %v6692_v24  ;;  %v2975_v52 = vpop.permute.xlu1 %2974  ;;  %v7635_v60 = vld [vmem:[#allocation48_spill] sm:$0xff]  ;;  %v7636_v27 = vld [vmem:[#allocation70_spill] sm:$0xff] }
 0x37d   : > { %v3123_v32 = vsel %vm1463_vm0, %v2973_v57, %v2975_v52  ;;  %v3124_v1 = vsel %vm1463_vm0, %v2975_v52, %v7026_v28 }
 0x37e   : > { %3569 = vst [vmem:[%s6210_s24 + $0x268] sm:$0xff] %v3457_v25  ;;  %3570 = vst [vmem:[%s6210_s24 + $0x270] sm:$0xff] %v3458_v43  ;;  %v3347_v55 = vadd.f32 %v3123_v32, %v7633_v45  ;;  %v3348_v58 = vadd.f32 %v3124_v1, %v7634_v54 }
 0x37f   : > { %v3001_v42 = vpop.permute.xlu0 %3000 }
 0x380   : > { %v3459_v50 = vadd.f32 %v3347_v55, %v6709_v36  ;;  %v3460_v44 = vadd.f32 %v3348_v58, %v6714_v5  ;;  %v3135_v24 = vsel %vm1463_vm0, %v6790_v14, %v3001_v42  ;;  %v3003_v57 = vpop.permute.xlu1 %3002  ;;  %v7637_v14 = vld [vmem:[#allocation71_spill] sm:$0xff]  ;;  %v7638_v55 = vld [vmem:[#allocation74_spill] sm:$0xff] }
 0x381   : > { %v3359_v53 = vadd.f32 %v3135_v24, %v7635_v60  ;;  %v3136_v6 = vsel %vm1463_vm0, %v3001_v42, %v3003_v57  ;;  %v7639_v24 = vld [vmem:[#allocation50_spill] sm:$0xff]  ;;  %v7640_v60 = vld [vmem:[#allocation72_spill] sm:$0xff] }
 0x382   : > { %3571 = vst [vmem:[%s6210_s24 + $0x278] sm:$0xff] %v3459_v50  ;;  %3572 = vst [vmem:[%s6210_s24 + $0x280] sm:$0xff] %v3460_v44  ;;  %v3360_v25 = vadd.f32 %v3136_v6, %v7636_v27 }
 0x383   : > { %v3471_v43 = vadd.f32 %v3359_v53, %v6720_v61  ;;  %v3005_v52 = vpop.permute.xlu0 %3004 }
 0x384   : > { %v3472_v36 = vadd.f32 %v3360_v25, %v6728_v8  ;;  %v3137_v5 = vsel %vm1463_vm0, %v3003_v57, %v3005_v52  ;;  %v7049_v32 = vpop.permute.xlu1 %3006 }
 0x385   : > { %3583 = vst [vmem:[%s6210_s24 + $0x2d8] sm:$0xff] %v3471_v43  ;;  %v3361_v1 = vadd.f32 %v3137_v5, %v7637_v14  ;;  %v3138_v45 = vsel %vm1463_vm0, %v3005_v52, %v7049_v32  ;;  %v7641_v43 = vld [vmem:[#allocation73_spill] sm:$0xff] }
 0x386   : > { %3584 = vst [vmem:[%s6210_s24 + $0x2e0] sm:$0xff] %v3472_v36  ;;  %v3362_v54 = vadd.f32 %v3138_v45, %v7638_v55  ;;  %v7642_v36 = vld [vmem:[#allocation76_spill] sm:$0xff] }
 0x387   : > { %v3473_v58 = vadd.f32 %v3361_v1, %v6740_v51  ;;  %v3033_v61 = vpop.permute.xlu0 %3032  ;;  %v7643_v1 = vld [vmem:[#allocation16_spill] sm:$0xff] }
 0x388   : > { %v3474_v8 = vadd.f32 %v3362_v54, %v6746_v40  ;;  %v3031_v42 = vpop.permute.xlu1 %3030 }
 0x389   : > { %3585 = vst [vmem:[%s6210_s24 + $0x2e8] sm:$0xff] %v3473_v58  ;;  %v3149_v50 = vsel %vm1463_vm0, %v6815_v7, %v3031_v42  ;;  %v3150_v44 = vsel %vm1463_vm0, %v3031_v42, %v3033_v61  ;;  %v7644_v58 = vld [vmem:[#allocation57_spill] sm:$0xff] }
 0x38a   : > { %3586 = vst [vmem:[%s6210_s24 + $0x2f0] sm:$0xff] %v3474_v8  ;;  %v3373_v57 = vadd.f32 %v3149_v50, %v7639_v24  ;;  %v3374_v53 = vadd.f32 %v3150_v44, %v7640_v60  ;;  %v7645_v8 = vld [vmem:[#allocation19_spill] sm:$0xff]  ;;  %v7646_v60 = vld [vmem:[#allocation20_spill] sm:$0xff] }
 0x38b   : > { %v7066_v51 = vpop.permute.xlu0 %3036 }
 0x38c   : > { %v3485_v6 = vadd.f32 %v3373_v57, %v6734_v49  ;;  %v3486_v40 = vadd.f32 %v3374_v53, %v6737_v59  ;;  %v3035_v27 = vpop.permute.xlu1 %3034 }
 0x38d   : > { %v3151_v25 = vsel %vm1463_vm0, %v3033_v61, %v3035_v27  ;;  %v3152_v7 = vsel %vm1463_vm0, %v3035_v27, %v7066_v51 }
 0x38e   : > { %3597 = vst [vmem:[%s6210_s24 + $0x348] sm:$0xff] %v3485_v6  ;;  %3598 = vst [vmem:[%s6210_s24 + $0x350] sm:$0xff] %v3486_v40  ;;  %v3375_v52 = vadd.f32 %v3151_v25, %v7641_v43  ;;  %v3376_v5 = vadd.f32 %v3152_v7, %v7642_v36  ;;  %v7647_v6 = vld [vmem:[#allocation59_spill] sm:$0xff] }
 0x390   : > { %v3487_v14 = vadd.f32 %v3375_v52, %v6753_v63  ;;  %v3488_v45 = vadd.f32 %v3376_v5, %v7643_v1  ;;  %v7648_v52 = vld [vmem:[#allocation23_spill] sm:$0xff] }
 0x392   : > { %3599 = vst [vmem:[%s6210_s24 + $0x358] sm:$0xff] %v3487_v14  ;;  %3600 = vst [vmem:[%s6210_s24 + $0x360] sm:$0xff] %v3488_v45 }
 0x3ae   : > { %v2829_v49 = vpop.permute.xlu0 %2828 }
 0x3af   : > { %v3055_v59 = vsel %vm1463_vm0, %v6867_v46, %v2829_v49  ;;  %v2831_v55 = vpop.permute.xlu1 %2830 }
 0x3b0   : > { %v3056_v54 = vsel %vm1463_vm0, %v2829_v49, %v2831_v55  ;;  %v3279_v61 = vadd.f32 %v3055_v59, %v7644_v58  ;;  %v7649_v49 = vld [vmem:[#allocation65_spill] sm:$0xff] }
 0x3b1   : > { %v3280_v42 = vadd.f32 %v3056_v54, %v7645_v8  ;;  %v7650_v8 = vld [vmem:[#allocation66_spill] sm:$0xff] }
 0x3b2   : > { %v3391_v50 = vadd.f32 %v3279_v61, %v6893_v26 }
 0x3b3   : > { %v2833_v63 = vpop.permute.xlu0 %2832  ;;  %v3392_v44 = vadd.f32 %v3280_v42, %v6900_v37  ;;  %v2859_v24 = vpop.permute.xlu1 %2858 }
 0x3b4   : > { %3503 = vst [vmem:[%s6210_s24 + $0x58] sm:$0xff] %v3391_v50  ;;  %v3057_v57 = vsel %vm1463_vm0, %v2831_v55, %v2833_v63  ;;  %v3069_v46 = vsel %vm1463_vm0, %v6889_v0, %v2859_v24 }
 0x3b5   : > { %3504 = vst [vmem:[%s6210_s24 + $0x60] sm:$0xff] %v3392_v44  ;;  %v3281_v53 = vadd.f32 %v3057_v57, %v7646_v60  ;;  %v3293_v40 = vadd.f32 %v3069_v46, %v7647_v6 }
 0x3b7   : > { %v3393_v27 = vadd.f32 %v3281_v53, %v6914_v15  ;;  %v2861_v26 = vpop.permute.xlu0 %2860  ;;  %v3405_v25 = vadd.f32 %v3293_v40, %v6906_v12  ;;  %v2863_v37 = vpop.permute.xlu1 %2862  ;;  %v7651_v53 = vld [vmem:[#allocation18_spill] sm:$0xff] }
 0x3b8   : > { %v3070_v7 = vsel %vm1463_vm0, %v2859_v24, %v2861_v26  ;;  %v3071_v43 = vsel %vm1463_vm0, %v2861_v26, %v2863_v37 }
 0x3b9   : > { %3505 = vst [vmem:[%s6210_s24 + $0x68] sm:$0xff] %v3393_v27  ;;  %3517 = vst [vmem:[%s6210_s24 + $0xc8] sm:$0xff] %v3405_v25  ;;  %v3294_v0 = vadd.f32 %v3070_v7, %v6774_v34  ;;  %v3295_v36 = vadd.f32 %v3071_v43, %v7648_v52  ;;  %v7653_v25 = vld [vmem:[#allocation21_spill] sm:$0xff] }
 0x3ba   : > { %v7654_v7 = vld [vmem:[#allocation69_spill] sm:$0xff] }
 0x3bb   : > { %v3406_v5 = vadd.f32 %v3294_v0, %v6908_v38  ;;  %v3407_v15 = vadd.f32 %v3295_v36, %v6923_v11  ;;  %v2889_v14 = vpop.permute.xlu0 %2888  ;;  %v2891_v1 = vpop.permute.xlu1 %2890 }
 0x3bc   : > { %v3083_v12 = vsel %vm1463_vm0, %v6930_v29, %v2889_v14  ;;  %v3084_v45 = vsel %vm1463_vm0, %v2889_v14, %v2891_v1  ;;  %v7656_v14 = vld [vmem:[#allocation25_spill] sm:$0xff] }
 0x3bd   : > { %3518 = vst [vmem:[%s6210_s24 + $0xd0] sm:$0xff] %v3406_v5  ;;  %3519 = vst [vmem:[%s6210_s24 + $0xd8] sm:$0xff] %v3407_v15  ;;  %v3307_v59 = vadd.f32 %v3083_v12, %v7649_v49  ;;  %v3308_v34 = vadd.f32 %v3084_v45, %v6792_v10 }
 0x3bf   : > { %v3419_v55 = vadd.f32 %v3307_v59, %v6926_v2  ;;  %v2893_v38 = vpop.permute.xlu0 %2892  ;;  %v3420_v11 = vadd.f32 %v3308_v34, %v6932_v47  ;;  %v2919_v54 = vpop.permute.xlu1 %2918  ;;  %v7657_v34 = vld [vmem:[#allocation75_spill] sm:$0xff] }
 0x3c0   : > { %v3085_v58 = vsel %vm1463_vm0, %v2891_v1, %v2893_v38  ;;  %v3097_v29 = vsel %vm1463_vm0, %v6962_v18, %v2919_v54  ;;  %v7658_v38 = vld [vmem:[#allocation10_spill] sm:$0xff] }
 0x3c1   : > { %3531 = vst [vmem:[%s6210_s24 + $0x138] sm:$0xff] %v3419_v55  ;;  %3532 = vst [vmem:[%s6210_s24 + $0x140] sm:$0xff] %v3420_v11  ;;  %v3309_v61 = vadd.f32 %v3085_v58, %v6798_v23  ;;  %v3321_v42 = vadd.f32 %v3097_v29, %v7650_v8 }
 0x3c3   : > { %v3421_v10 = vadd.f32 %v3309_v61, %v6948_v56  ;;  %v2921_v2 = vpop.permute.xlu0 %2920  ;;  %v3433_v50 = vadd.f32 %v3321_v42, %v6940_v22  ;;  %v2923_v47 = vpop.permute.xlu1 %2922  ;;  %v7659_v61 = vld [vmem:[#allocation27_spill] sm:$0xff]  ;;  %v7660_v42 = vld [vmem:[#allocation77_spill] sm:$0xff] }
 0x3c4   : > { %v3098_v63 = vsel %vm1463_vm0, %v2919_v54, %v2921_v2  ;;  %v3099_v44 = vsel %vm1463_vm0, %v2921_v2, %v2923_v47 }
 0x3c5   : > { %3533 = vst [vmem:[%s6210_s24 + $0x148] sm:$0xff] %v3421_v10  ;;  %3545 = vst [vmem:[%s6210_s24 + $0x1a8] sm:$0xff] %v3433_v50  ;;  %v3322_v18 = vadd.f32 %v3098_v63, %v6802_v31  ;;  %v3323_v23 = vadd.f32 %v3099_v44, %v6805_v41  ;;  %v7652_v31 = vld [vmem:[#allocation5_spill] sm:$0xff] }
 0x3c7   : > { %v3434_v24 = vadd.f32 %v3322_v18, %v6944_v48  ;;  %v3435_v56 = vadd.f32 %v3323_v23, %v6960_v3  ;;  %v2949_v57 = vpop.permute.xlu0 %2948  ;;  %v2951_v46 = vpop.permute.xlu1 %2950  ;;  %v7662_v18 = vld [vmem:[#allocation31_spill] sm:$0xff] }
 0x3c8   : > { %v3111_v22 = vsel %vm1463_vm0, %v6999_v19, %v2949_v57  ;;  %v3112_v60 = vsel %vm1463_vm0, %v2949_v57, %v2951_v46  ;;  %v3634_v57 = vld [vmem:[%s6210_s24 + $0x20] sm:$0xff] (%p4500_p8) }
 0x3c9   : > { %3546 = vst [vmem:[%s6210_s24 + $0x1b0] sm:$0xff] %v3434_v24  ;;  %3547 = vst [vmem:[%s6210_s24 + $0x1b8] sm:$0xff] %v3435_v56  ;;  %v3335_v6 = vadd.f32 %v3111_v22, %v7651_v53  ;;  %v3336_v40 = vadd.f32 %v3112_v60, %v7652_v31  ;;  %v3638_v22 = vld [vmem:[%s6210_s24 + $0x30] sm:$0xff] (%p4500_p8)  ;;  %v3640_v60 = vld [vmem:[%s6210_s24 + $0x38] sm:$0xff] (%p4500_p8) }
 0x3ca   : > { %v3642_v53 = vld [vmem:[%s6210_s24 + $0x40] sm:$0xff] (%p4500_p8)  ;;  %3635 = vst [vmem:[%s7198_s12 + $0x20] sm:$0xff] (%p4500_p8), %v3634_v57  ;;  %3639 = vst [vmem:[%s7198_s12 + $0x30] sm:$0xff] (%p4500_p8), %v3638_v22  ;;  %v3646_v31 = vld [vmem:[%s6210_s24 + $0x50] sm:$0xff] (%p4500_p8) }
 0x3cb   : > { %v3447_v41 = vadd.f32 %v3335_v6, %v6964_v30  ;;  %v2953_v48 = vpop.permute.xlu0 %2952  ;;  %v3448_v3 = vadd.f32 %v3336_v40, %v6968_v13  ;;  %v2979_v27 = vpop.permute.xlu1 %2978  ;;  %3641 = vst [vmem:[%s7198_s12 + $0x38] sm:$0xff] (%p4500_p8), %v3640_v60  ;;  %3643 = vst [vmem:[%s7198_s12 + $0x40] sm:$0xff] (%p4500_p8), %v3642_v53  ;;  %v3644_v6 = vld [vmem:[%s6210_s24 + $0x48] sm:$0xff] (%p4500_p8)  ;;  %v3648_v40 = vld [vmem:[%s6210_s24 + $0x58] sm:$0xff] (%p4500_p8) }
 0x3cc   : > { %v3113_v26 = vsel %vm1463_vm0, %v2951_v46, %v2953_v48  ;;  %v3125_v19 = vsel %vm1463_vm0, %v7026_v28, %v2979_v27  ;;  %v7655_v28 = vld [vmem:[#allocation22_spill] sm:$0xff]  ;;  %3645 = vst [vmem:[%s7198_s12 + $0x48] sm:$0xff] (%p4500_p8), %v3644_v6  ;;  %3647 = vst [vmem:[%s7198_s12 + $0x50] sm:$0xff] (%p4500_p8), %v3646_v31  ;;  %v3766_v22 = vld [vmem:[%s6210_s24 + $0x230] sm:$0xff] (%p4500_p8) }
 0x3cd   : > { %3559 = vst [vmem:[%s6210_s24 + $0x218] sm:$0xff] %v3447_v41  ;;  %3560 = vst [vmem:[%s6210_s24 + $0x220] sm:$0xff] %v3448_v3  ;;  %v3337_v37 = vadd.f32 %v3113_v26, %v7653_v25  ;;  %v3349_v43 = vadd.f32 %v3125_v19, %v7654_v7  ;;  %v3636_v46 = vld [vmem:[%s6210_s24 + $0x28] sm:$0xff] (%p4500_p8)  ;;  %v3650_v41 = vld [vmem:[%s6210_s24 + $0x60] sm:$0xff] (%p4500_p8) }
 0x3ce   : > { %3637 = vst [vmem:[%s7198_s12 + $0x28] sm:$0xff] (%p4500_p8), %v3636_v46  ;;  %3649 = vst [vmem:[%s7198_s12 + $0x58] sm:$0xff] (%p4500_p8), %v3648_v40  ;;  %v3652_v48 = vld [vmem:[%s6210_s24 + $0x68] sm:$0xff] (%p4500_p8)  ;;  %v3654_v3 = vld [vmem:[%s6210_s24 + $0x70] sm:$0xff] (%p4500_p8) }
 0x3cf   : > { %v3449_v0 = vadd.f32 %v3337_v37, %v6985_v9  ;;  %v2981_v30 = vpop.permute.xlu0 %2980  ;;  %v3461_v52 = vadd.f32 %v3349_v43, %v6973_v35  ;;  %v2983_v13 = vpop.permute.xlu1 %2982  ;;  %3651 = vst [vmem:[%s7198_s12 + $0x60] sm:$0xff] (%p4500_p8), %v3650_v41  ;;  %3653 = vst [vmem:[%s7198_s12 + $0x68] sm:$0xff] (%p4500_p8), %v3652_v48  ;;  %v3658_v26 = vld [vmem:[%s6210_s24 + $0x80] sm:$0xff] (%p4500_p8)  ;;  %v3660_v19 = vld [vmem:[%s6210_s24 + $0x88] sm:$0xff] (%p4500_p8) }
 0x3d0   : > { %v3126_v36 = vsel %vm1463_vm0, %v2979_v27, %v2981_v30  ;;  %v3127_v5 = vsel %vm1463_vm0, %v2981_v30, %v2983_v13  ;;  %3655 = vst [vmem:[%s7198_s12 + $0xe0] sm:$0xff] (%p4500_p8), %v3654_v3  ;;  %v3656_v27 = vld [vmem:[%s6210_s24 + $0x78] sm:$0xff] (%p4500_p8)  ;;  %3659 = vst [vmem:[%s7198_s12 + $0xf0] sm:$0xff] (%p4500_p8), %v3658_v26  ;;  %v3662_v25 = vld [vmem:[%s6210_s24 + $0x90] sm:$0xff] (%p4500_p8) }
 0x3d1   : > { %3561 = vst [vmem:[%s6210_s24 + $0x228] sm:$0xff] %v3449_v0  ;;  %3573 = vst [vmem:[%s6210_s24 + $0x288] sm:$0xff] %v3461_v52  ;;  %v3350_v15 = vadd.f32 %v3126_v36, %v7655_v28  ;;  %v3351_v1 = vadd.f32 %v3127_v5, %v7656_v14  ;;  %v3664_v37 = vld [vmem:[%s6210_s24 + $0x98] sm:$0xff] (%p4500_p8)  ;;  %v3666_v7 = vld [vmem:[%s6210_s24 + $0xa0] sm:$0xff] (%p4500_p8) }
 0x3d2   : > { %3657 = vst [vmem:[%s7198_s12 + $0xe8] sm:$0xff] (%p4500_p8), %v3656_v27  ;;  %3661 = vst [vmem:[%s7198_s12 + $0xf8] sm:$0xff] (%p4500_p8), %v3660_v19  ;;  %v3668_v43 = vld [vmem:[%s6210_s24 + $0xa8] sm:$0xff] (%p4500_p8)  ;;  %v3670_v0 = vld [vmem:[%s6210_s24 + $0xb0] sm:$0xff] (%p4500_p8) }
 0x3d3   : > { %v3462_v12 = vadd.f32 %v3350_v15, %v6979_v17  ;;  %v3463_v9 = vadd.f32 %v3351_v1, %v6992_v16  ;;  %v3009_v45 = vpop.permute.xlu0 %3008  ;;  %v3011_v49 = vpop.permute.xlu1 %3010  ;;  %3663 = vst [vmem:[%s7198_s12 + $0x100] sm:$0xff] (%p4500_p8), %v3662_v25  ;;  %3665 = vst [vmem:[%s7198_s12 + $0x108] sm:$0xff] (%p4500_p8), %v3664_v37  ;;  %v3672_v30 = vld [vmem:[%s6210_s24 + $0xb8] sm:$0xff] (%p4500_p8)  ;;  %v3674_v52 = vld [vmem:[%s6210_s24 + $0xc0] sm:$0xff] (%p4500_p8) }
 0x3d4   : > { %v3139_v35 = vsel %vm1463_vm0, %v7049_v32, %v3009_v45  ;;  %v3140_v59 = vsel %vm1463_vm0, %v3009_v45, %v3011_v49  ;;  %3667 = vst [vmem:[%s7198_s12 + $0x110] sm:$0xff] (%p4500_p8), %v3666_v7  ;;  %3669 = vst [vmem:[%s7198_s12 + $0x118] sm:$0xff] (%p4500_p8), %v3668_v43  ;;  %v3676_v13 = vld [vmem:[%s6210_s24 + $0xc8] sm:$0xff] (%p4500_p8)  ;;  %v3678_v36 = vld [vmem:[%s6210_s24 + $0xd0] sm:$0xff] (%p4500_p8) }
 0x3d5   : > { %3574 = vst [vmem:[%s6210_s24 + $0x290] sm:$0xff] %v3462_v12  ;;  %3575 = vst [vmem:[%s6210_s24 + $0x298] sm:$0xff] %v3463_v9  ;;  %v3363_v55 = vadd.f32 %v3139_v35, %v7657_v34  ;;  %v3364_v11 = vadd.f32 %v3140_v59, %v7658_v38  ;;  %v3680_v5 = vld [vmem:[%s6210_s24 + $0xd8] sm:$0xff] (%p4500_p8)  ;;  %v3682_v28 = vld [vmem:[%s6210_s24 + $0xe0] sm:$0xff] (%p4500_p8) }
 0x3d6   : > { %3671 = vst [vmem:[%s7198_s12 + $0x120] sm:$0xff] (%p4500_p8), %v3670_v0  ;;  %3673 = vst [vmem:[%s7198_s12 + $0x128] sm:$0xff] (%p4500_p8), %v3672_v30  ;;  %v3684_v15 = vld [vmem:[%s6210_s24 + $0xe8] sm:$0xff] (%p4500_p8)  ;;  %v3686_v14 = vld [vmem:[%s6210_s24 + $0xf0] sm:$0xff] (%p4500_p8) }
 0x3d7   : > { %v3475_v54 = vadd.f32 %v3363_v55, %v6995_v39  ;;  %v3013_v17 = vpop.permute.xlu0 %3012  ;;  %v3476_v16 = vadd.f32 %v3364_v11, %v7005_v33  ;;  %v3039_v58 = vpop.permute.xlu1 %3038  ;;  %3675 = vst [vmem:[%s7198_s12 + $0x130] sm:$0xff] (%p4500_p8), %v3674_v52  ;;  %3677 = vst [vmem:[%s7198_s12 + $0x138] sm:$0xff] (%p4500_p8), %v3676_v13  ;;  %v3688_v1 = vld [vmem:[%s6210_s24 + $0xf8] sm:$0xff] (%p4500_p8)  ;;  %v3690_v12 = vld [vmem:[%s6210_s24 + $0x100] sm:$0xff] (%p4500_p8) }
 0x3d8   : > { %v3141_v29 = vsel %vm1463_vm0, %v3011_v49, %v3013_v17  ;;  %v3153_v32 = vsel %vm1463_vm0, %v7066_v51, %v3039_v58  ;;  %v7661_v51 = vld [vmem:[#allocation28_spill] sm:$0xff]  ;;  %3679 = vst [vmem:[%s7198_s12 + $0x140] sm:$0xff] (%p4500_p8), %v3678_v36  ;;  %3681 = vst [vmem:[%s7198_s12 + $0x148] sm:$0xff] (%p4500_p8), %v3680_v5  ;;  %v3692_v9 = vld [vmem:[%s6210_s24 + $0x108] sm:$0xff] (%p4500_p8) }
 0x3d9   : > { %3587 = vst [vmem:[%s6210_s24 + $0x2f8] sm:$0xff] %v3475_v54  ;;  %3588 = vst [vmem:[%s6210_s24 + $0x300] sm:$0xff] %v3476_v16  ;;  %v3365_v8 = vadd.f32 %v3141_v29, %v7659_v61  ;;  %v3377_v10 = vadd.f32 %v3153_v32, %v7660_v42  ;;  %v3694_v45 = vld [vmem:[%s6210_s24 + $0x110] sm:$0xff] (%p4500_p8)  ;;  %v3696_v49 = vld [vmem:[%s6210_s24 + $0x118] sm:$0xff] (%p4500_p8) }
 0x3da   : > { %3683 = vst [vmem:[%s7198_s12 + $0x1c0] sm:$0xff] (%p4500_p8), %v3682_v28  ;;  %3685 = vst [vmem:[%s7198_s12 + $0x1c8] sm:$0xff] (%p4500_p8), %v3684_v15  ;;  %v3698_v35 = vld [vmem:[%s6210_s24 + $0x120] sm:$0xff] (%p4500_p8)  ;;  %v3700_v59 = vld [vmem:[%s6210_s24 + $0x128] sm:$0xff] (%p4500_p8) }
 0x3db   : > { %v3477_v39 = vadd.f32 %v3365_v8, %v7015_v4  ;;  %v3041_v2 = vpop.permute.xlu0 %3040  ;;  %v3489_v50 = vadd.f32 %v3377_v10, %v7009_v62  ;;  %v3043_v33 = vpop.permute.xlu1 %3042  ;;  %3610 = sbr.rel (!%p4500_p8) target bundleno = 1032 (0x408), region = 82  ;;  %v3626_v62 = vld [vmem:[%s6210_s24] sm:$0xff] (%p4500_p8)  ;;  %v3630_v4 = vld [vmem:[%s6210_s24 + $0x10] sm:$0xff] (%p4500_p8)  ;;  %3687 = vst [vmem:[%s7198_s12 + $0x1d0] sm:$0xff] (%p4500_p8), %v3686_v14  ;;  %3689 = vst [vmem:[%s7198_s12 + $0x1d8] sm:$0xff] (%p4500_p8), %v3688_v1 }
 0x3dc   : > { %v3154_v47 = vsel %vm1463_vm0, %v3039_v58, %v3041_v2  ;;  %v3155_v63 = vsel %vm1463_vm0, %v3041_v2, %v3043_v33  ;;  %3627 = vst [vmem:[%s7198_s12] sm:$0xff] (%p4500_p8), %v3626_v62  ;;  %3631 = vst [vmem:[%s7198_s12 + $0x10] sm:$0xff] (%p4500_p8), %v3630_v4  ;;  %v3702_v34 = vld [vmem:[%s6210_s24 + $0x130] sm:$0xff] (%p4500_p8)  ;;  %v3704_v55 = vld [vmem:[%s6210_s24 + $0x138] sm:$0xff] (%p4500_p8) }
 0x3dd   : > { %3589 = vst [vmem:[%s6210_s24 + $0x308] sm:$0xff] %v3477_v39  ;;  %3601 = vst [vmem:[%s6210_s24 + $0x368] sm:$0xff] %v3489_v50  ;;  %v3378_v44 = vadd.f32 %v3154_v47, %v7661_v51  ;;  %v3379_v23 = vadd.f32 %v3155_v63, %v7662_v18  ;;  %v3706_v38 = vld [vmem:[%s6210_s24 + $0x140] sm:$0xff] (%p4500_p8)  ;;  %v3708_v11 = vld [vmem:[%s6210_s24 + $0x148] sm:$0xff] (%p4500_p8) }
 0x3de   : > { %3691 = vst [vmem:[%s7198_s12 + $0x1e0] sm:$0xff] (%p4500_p8), %v3690_v12  ;;  %3693 = vst [vmem:[%s7198_s12 + $0x1e8] sm:$0xff] (%p4500_p8), %v3692_v9  ;;  %v3710_v54 = vld [vmem:[%s6210_s24 + $0x150] sm:$0xff] (%p4500_p8)  ;;  %v3712_v17 = vld [vmem:[%s6210_s24 + $0x158] sm:$0xff] (%p4500_p8) }
 0x3df   : > { %v3490_v24 = vadd.f32 %v3378_v44, %v7012_v21  ;;  %v3491_v56 = vadd.f32 %v3379_v23, %v7024_v20  ;;  %v3628_v21 = vld [vmem:[%s6210_s24 + $0x8] sm:$0xff] (%p4500_p8)  ;;  %v3632_v20 = vld [vmem:[%s6210_s24 + $0x18] sm:$0xff] (%p4500_p8)  ;;  %3695 = vst [vmem:[%s7198_s12 + $0x1f0] sm:$0xff] (%p4500_p8), %v3694_v45  ;;  %3697 = vst [vmem:[%s7198_s12 + $0x1f8] sm:$0xff] (%p4500_p8), %v3696_v49 }
 0x3e0   : > { %3629 = vst [vmem:[%s7198_s12 + $0x8] sm:$0xff] (%p4500_p8), %v3628_v21  ;;  %3633 = vst [vmem:[%s7198_s12 + $0x18] sm:$0xff] (%p4500_p8), %v3632_v20  ;;  %v3714_v16 = vld [vmem:[%s6210_s24 + $0x160] sm:$0xff] (%p4500_p8)  ;;  %v3716_v58 = vld [vmem:[%s6210_s24 + $0x168] sm:$0xff] (%p4500_p8) }
 0x3e1   : > { %3602 = vst [vmem:[%s6210_s24 + $0x370] sm:$0xff] %v3490_v24  ;;  %3603 = vst [vmem:[%s6210_s24 + $0x378] sm:$0xff] %v3491_v56  ;;  %v3718_v29 = vld [vmem:[%s6210_s24 + $0x170] sm:$0xff] (%p4500_p8)  ;;  %v3720_v32 = vld [vmem:[%s6210_s24 + $0x178] sm:$0xff] (%p4500_p8) }
 0x3e2   : > { %3699 = vst [vmem:[%s7198_s12 + $0x200] sm:$0xff] %v3698_v35  ;;  %3701 = vst [vmem:[%s7198_s12 + $0x208] sm:$0xff] %v3700_v59  ;;  %v3722_v61 = vld [vmem:[%s6210_s24 + $0x180] sm:$0xff]  ;;  %v3724_v8 = vld [vmem:[%s6210_s24 + $0x188] sm:$0xff] }
 0x3e3   : > { %3703 = vst [vmem:[%s7198_s12 + $0x210] sm:$0xff] %v3702_v34  ;;  %3705 = vst [vmem:[%s7198_s12 + $0x218] sm:$0xff] %v3704_v55  ;;  %v3726_v42 = vld [vmem:[%s6210_s24 + $0x190] sm:$0xff]  ;;  %v3728_v10 = vld [vmem:[%s6210_s24 + $0x198] sm:$0xff] }
 0x3e4   : > { %3707 = vst [vmem:[%s7198_s12 + $0x220] sm:$0xff] %v3706_v38  ;;  %3709 = vst [vmem:[%s7198_s12 + $0x228] sm:$0xff] %v3708_v11  ;;  %v3730_v39 = vld [vmem:[%s6210_s24 + $0x1a0] sm:$0xff]  ;;  %v3732_v2 = vld [vmem:[%s6210_s24 + $0x1a8] sm:$0xff] }
 0x3e5   : > { %3711 = vst [vmem:[%s7198_s12 + $0x2a0] sm:$0xff] %v3710_v54  ;;  %3713 = vst [vmem:[%s7198_s12 + $0x2a8] sm:$0xff] %v3712_v17  ;;  %v3734_v50 = vld [vmem:[%s6210_s24 + $0x1b0] sm:$0xff]  ;;  %v3736_v33 = vld [vmem:[%s6210_s24 + $0x1b8] sm:$0xff] }
 0x3e6   : > { %3715 = vst [vmem:[%s7198_s12 + $0x2b0] sm:$0xff] %v3714_v16  ;;  %3717 = vst [vmem:[%s7198_s12 + $0x2b8] sm:$0xff] %v3716_v58  ;;  %v3738_v47 = vld [vmem:[%s6210_s24 + $0x1c0] sm:$0xff]  ;;  %v3740_v63 = vld [vmem:[%s6210_s24 + $0x1c8] sm:$0xff] }
 0x3e7   : > { %3719 = vst [vmem:[%s7198_s12 + $0x2c0] sm:$0xff] %v3718_v29  ;;  %3721 = vst [vmem:[%s7198_s12 + $0x2c8] sm:$0xff] %v3720_v32  ;;  %v3742_v51 = vld [vmem:[%s6210_s24 + $0x1d0] sm:$0xff]  ;;  %v3744_v44 = vld [vmem:[%s6210_s24 + $0x1d8] sm:$0xff] }
 0x3e8   : > { %3723 = vst [vmem:[%s7198_s12 + $0x2d0] sm:$0xff] %v3722_v61  ;;  %3725 = vst [vmem:[%s7198_s12 + $0x2d8] sm:$0xff] %v3724_v8  ;;  %v3746_v18 = vld [vmem:[%s6210_s24 + $0x1e0] sm:$0xff]  ;;  %v3748_v23 = vld [vmem:[%s6210_s24 + $0x1e8] sm:$0xff] }
 0x3e9   : > { %3727 = vst [vmem:[%s7198_s12 + $0x2e0] sm:$0xff] %v3726_v42  ;;  %3729 = vst [vmem:[%s7198_s12 + $0x2e8] sm:$0xff] %v3728_v10  ;;  %v3750_v24 = vld [vmem:[%s6210_s24 + $0x1f0] sm:$0xff]  ;;  %v3752_v56 = vld [vmem:[%s6210_s24 + $0x1f8] sm:$0xff] }
 0x3ea   : > { %3731 = vst [vmem:[%s7198_s12 + $0x2f0] sm:$0xff] %v3730_v39  ;;  %3733 = vst [vmem:[%s7198_s12 + $0x2f8] sm:$0xff] %v3732_v2  ;;  %v3754_v62 = vld [vmem:[%s6210_s24 + $0x200] sm:$0xff]  ;;  %v3756_v21 = vld [vmem:[%s6210_s24 + $0x208] sm:$0xff] }
 0x3eb   : > { %3735 = vst [vmem:[%s7198_s12 + $0x300] sm:$0xff] %v3734_v50  ;;  %3737 = vst [vmem:[%s7198_s12 + $0x308] sm:$0xff] %v3736_v33  ;;  %v3758_v4 = vld [vmem:[%s6210_s24 + $0x210] sm:$0xff]  ;;  %v3760_v20 = vld [vmem:[%s6210_s24 + $0x218] sm:$0xff] }
 0x3ec   : > { %3739 = vst [vmem:[%s7198_s12 + $0x380] sm:$0xff] %v3738_v47  ;;  %3741 = vst [vmem:[%s7198_s12 + $0x388] sm:$0xff] %v3740_v63  ;;  %v3762_v57 = vld [vmem:[%s6210_s24 + $0x220] sm:$0xff]  ;;  %v3764_v46 = vld [vmem:[%s6210_s24 + $0x228] sm:$0xff] }
 0x3ed   : > { %3743 = vst [vmem:[%s7198_s12 + $0x390] sm:$0xff] %v3742_v51  ;;  %3745 = vst [vmem:[%s7198_s12 + $0x398] sm:$0xff] %v3744_v44  ;;  %v3768_v60 = vld [vmem:[%s6210_s24 + $0x238] sm:$0xff]  ;;  %v3770_v53 = vld [vmem:[%s6210_s24 + $0x240] sm:$0xff] }
 0x3ee   : > { %3747 = vst [vmem:[%s7198_s12 + $0x3a0] sm:$0xff] %v3746_v18  ;;  %3749 = vst [vmem:[%s7198_s12 + $0x3a8] sm:$0xff] %v3748_v23  ;;  %v3772_v6 = vld [vmem:[%s6210_s24 + $0x248] sm:$0xff]  ;;  %v3774_v31 = vld [vmem:[%s6210_s24 + $0x250] sm:$0xff] }
 0x3ef   : > { %3751 = vst [vmem:[%s7198_s12 + $0x3b0] sm:$0xff] %v3750_v24  ;;  %3753 = vst [vmem:[%s7198_s12 + $0x3b8] sm:$0xff] %v3752_v56  ;;  %v3776_v40 = vld [vmem:[%s6210_s24 + $0x258] sm:$0xff]  ;;  %v3778_v41 = vld [vmem:[%s6210_s24 + $0x260] sm:$0xff] }
 0x3f0   : > { %3755 = vst [vmem:[%s7198_s12 + $0x3c0] sm:$0xff] %v3754_v62  ;;  %3757 = vst [vmem:[%s7198_s12 + $0x3c8] sm:$0xff] %v3756_v21  ;;  %v3780_v48 = vld [vmem:[%s6210_s24 + $0x268] sm:$0xff]  ;;  %v3782_v3 = vld [vmem:[%s6210_s24 + $0x270] sm:$0xff] }
 0x3f1   : > { %3759 = vst [vmem:[%s7198_s12 + $0x3d0] sm:$0xff] %v3758_v4  ;;  %3761 = vst [vmem:[%s7198_s12 + $0x3d8] sm:$0xff] %v3760_v20  ;;  %v3784_v27 = vld [vmem:[%s6210_s24 + $0x278] sm:$0xff]  ;;  %v3786_v26 = vld [vmem:[%s6210_s24 + $0x280] sm:$0xff] }
 0x3f2   : > { %3763 = vst [vmem:[%s7198_s12 + $0x3e0] sm:$0xff] %v3762_v57  ;;  %3765 = vst [vmem:[%s7198_s12 + $0x3e8] sm:$0xff] %v3764_v46  ;;  %v3788_v19 = vld [vmem:[%s6210_s24 + $0x288] sm:$0xff]  ;;  %v3790_v25 = vld [vmem:[%s6210_s24 + $0x290] sm:$0xff] }
 0x3f3   : > { %3767 = vst [vmem:[%s7198_s12 + $0x460] sm:$0xff] %v3766_v22  ;;  %3769 = vst [vmem:[%s7198_s12 + $0x468] sm:$0xff] %v3768_v60  ;;  %v3792_v37 = vld [vmem:[%s6210_s24 + $0x298] sm:$0xff]  ;;  %v3794_v7 = vld [vmem:[%s6210_s24 + $0x2a0] sm:$0xff] }
 0x3f4   : > { %3771 = vst [vmem:[%s7198_s12 + $0x470] sm:$0xff] %v3770_v53  ;;  %3773 = vst [vmem:[%s7198_s12 + $0x478] sm:$0xff] %v3772_v6  ;;  %v3796_v43 = vld [vmem:[%s6210_s24 + $0x2a8] sm:$0xff]  ;;  %v3798_v0 = vld [vmem:[%s6210_s24 + $0x2b0] sm:$0xff] }
 0x3f5   : > { %3775 = vst [vmem:[%s7198_s12 + $0x480] sm:$0xff] %v3774_v31  ;;  %3777 = vst [vmem:[%s7198_s12 + $0x488] sm:$0xff] %v3776_v40  ;;  %v3800_v30 = vld [vmem:[%s6210_s24 + $0x2b8] sm:$0xff]  ;;  %v3802_v52 = vld [vmem:[%s6210_s24 + $0x2c0] sm:$0xff] }
 0x3f6   : > { %3779 = vst [vmem:[%s7198_s12 + $0x490] sm:$0xff] %v3778_v41  ;;  %3781 = vst [vmem:[%s7198_s12 + $0x498] sm:$0xff] %v3780_v48  ;;  %v3804_v13 = vld [vmem:[%s6210_s24 + $0x2c8] sm:$0xff]  ;;  %v3806_v36 = vld [vmem:[%s6210_s24 + $0x2d0] sm:$0xff] }
 0x3f7   : > { %3783 = vst [vmem:[%s7198_s12 + $0x4a0] sm:$0xff] %v3782_v3  ;;  %3785 = vst [vmem:[%s7198_s12 + $0x4a8] sm:$0xff] %v3784_v27  ;;  %v3808_v5 = vld [vmem:[%s6210_s24 + $0x2d8] sm:$0xff]  ;;  %v3810_v28 = vld [vmem:[%s6210_s24 + $0x2e0] sm:$0xff] }
 0x3f8   : > { %3787 = vst [vmem:[%s7198_s12 + $0x4b0] sm:$0xff] %v3786_v26  ;;  %3789 = vst [vmem:[%s7198_s12 + $0x4b8] sm:$0xff] %v3788_v19  ;;  %v3812_v15 = vld [vmem:[%s6210_s24 + $0x2e8] sm:$0xff]  ;;  %v3814_v14 = vld [vmem:[%s6210_s24 + $0x2f0] sm:$0xff] }
 0x3f9   : > { %3791 = vst [vmem:[%s7198_s12 + $0x4c0] sm:$0xff] %v3790_v25  ;;  %3793 = vst [vmem:[%s7198_s12 + $0x4c8] sm:$0xff] %v3792_v37  ;;  %v3816_v1 = vld [vmem:[%s6210_s24 + $0x2f8] sm:$0xff]  ;;  %v3818_v12 = vld [vmem:[%s6210_s24 + $0x300] sm:$0xff] }
 0x3fa   : > { %3795 = vst [vmem:[%s7198_s12 + $0x540] sm:$0xff] %v3794_v7  ;;  %3797 = vst [vmem:[%s7198_s12 + $0x548] sm:$0xff] %v3796_v43  ;;  %v3820_v9 = vld [vmem:[%s6210_s24 + $0x308] sm:$0xff]  ;;  %v3822_v45 = vld [vmem:[%s6210_s24 + $0x310] sm:$0xff] }
 0x3fb   : > { %3799 = vst [vmem:[%s7198_s12 + $0x550] sm:$0xff] %v3798_v0  ;;  %3801 = vst [vmem:[%s7198_s12 + $0x558] sm:$0xff] %v3800_v30  ;;  %v3824_v49 = vld [vmem:[%s6210_s24 + $0x318] sm:$0xff]  ;;  %v3826_v35 = vld [vmem:[%s6210_s24 + $0x320] sm:$0xff] }
 0x3fc   : > { %3803 = vst [vmem:[%s7198_s12 + $0x560] sm:$0xff] %v3802_v52  ;;  %3805 = vst [vmem:[%s7198_s12 + $0x568] sm:$0xff] %v3804_v13  ;;  %v3828_v59 = vld [vmem:[%s6210_s24 + $0x328] sm:$0xff]  ;;  %v3830_v34 = vld [vmem:[%s6210_s24 + $0x330] sm:$0xff] }
 0x3fd   : > { %3807 = vst [vmem:[%s7198_s12 + $0x570] sm:$0xff] %v3806_v36  ;;  %3809 = vst [vmem:[%s7198_s12 + $0x578] sm:$0xff] %v3808_v5  ;;  %v3832_v55 = vld [vmem:[%s6210_s24 + $0x338] sm:$0xff]  ;;  %v3834_v38 = vld [vmem:[%s6210_s24 + $0x340] sm:$0xff] }
 0x3fe   : > { %3811 = vst [vmem:[%s7198_s12 + $0x580] sm:$0xff] %v3810_v28  ;;  %3813 = vst [vmem:[%s7198_s12 + $0x588] sm:$0xff] %v3812_v15  ;;  %v3836_v11 = vld [vmem:[%s6210_s24 + $0x348] sm:$0xff]  ;;  %v3838_v54 = vld [vmem:[%s6210_s24 + $0x350] sm:$0xff] }
 0x3ff   : > { %3815 = vst [vmem:[%s7198_s12 + $0x590] sm:$0xff] %v3814_v14  ;;  %3817 = vst [vmem:[%s7198_s12 + $0x598] sm:$0xff] %v3816_v1  ;;  %v3840_v17 = vld [vmem:[%s6210_s24 + $0x358] sm:$0xff]  ;;  %v3842_v16 = vld [vmem:[%s6210_s24 + $0x360] sm:$0xff] }
 0x400   : > { %3819 = vst [vmem:[%s7198_s12 + $0x5a0] sm:$0xff] %v3818_v12  ;;  %3821 = vst [vmem:[%s7198_s12 + $0x5a8] sm:$0xff] %v3820_v9  ;;  %v3844_v58 = vld [vmem:[%s6210_s24 + $0x368] sm:$0xff]  ;;  %v3846_v29 = vld [vmem:[%s6210_s24 + $0x370] sm:$0xff] }
 0x401   : > { %3823 = vst [vmem:[%s7198_s12 + $0x620] sm:$0xff] %v3822_v45  ;;  %3825 = vst [vmem:[%s7198_s12 + $0x628] sm:$0xff] %v3824_v49  ;;  %v3848_v32 = vld [vmem:[%s6210_s24 + $0x378] sm:$0xff] }
 0x402   : > { %3827 = vst [vmem:[%s7198_s12 + $0x630] sm:$0xff] %v3826_v35  ;;  %3829 = vst [vmem:[%s7198_s12 + $0x638] sm:$0xff] %v3828_v59 }
 0x403   : > { %3831 = vst [vmem:[%s7198_s12 + $0x640] sm:$0xff] %v3830_v34  ;;  %3833 = vst [vmem:[%s7198_s12 + $0x648] sm:$0xff] %v3832_v55 }
 0x404   : > { %3835 = vst [vmem:[%s7198_s12 + $0x650] sm:$0xff] %v3834_v38  ;;  %3837 = vst [vmem:[%s7198_s12 + $0x658] sm:$0xff] %v3836_v11 }
 0x405   : > { %3839 = vst [vmem:[%s7198_s12 + $0x660] sm:$0xff] %v3838_v54  ;;  %3841 = vst [vmem:[%s7198_s12 + $0x668] sm:$0xff] %v3840_v17 }
 0x406   : > { %3843 = vst [vmem:[%s7198_s12 + $0x670] sm:$0xff] %v3842_v16  ;;  %3845 = vst [vmem:[%s7198_s12 + $0x678] sm:$0xff] %v3844_v58 }
 0x407   : > { %3847 = vst [vmem:[%s7198_s12 + $0x680] sm:$0xff] %v3846_v29  ;;  %3849 = vst [vmem:[%s7198_s12 + $0x688] sm:$0xff] %v3848_v32 }
 0x408 PF: > { %p10_p13 = scmp.ge.s32.totalorder %s4475_s18, 4   ;;  %s7663_s12 = smov %s4410_s13 }
 0x409   : > { %s7664_s13 = smov %s4494_s25  ;;  %s7665_s14 = smov %s4418_s15 }
 0x40a   : > { %s7666_s15 = smov %s4485_s22  ;;  %s7667_s16 = smov %s4475_s18 }
 0x40b   :  { %12 = sbr.rel (!%p10_p13) target bundleno = 3 (0x3), region = 144 }

</bundles_post_ra>
